<compile_context>
chip_gen: v5e
topology: v5e:2x2
jax: 0.10.0
libtpu: 0.0.40
codegen_flags: <defaults>
</compile_context>

<pallas_src>
import functools
import math

import jax
import jax.numpy as jnp
from jax.experimental import pallas as pl
from jax.experimental.pallas import tpu as pltpu


_SQRT_HALF = 0.7071067811865476


def _erf_poly(x):
    # Abramowitz & Stegun 7.1.26 (|error| < 1.5e-7), odd-extended.  Uses only
    # ops with guaranteed Mosaic lowerings (abs / mul / add / exp / where).
    a1, a2, a3, a4, a5 = (0.254829592, -0.284496736, 1.421413741,
                          -1.453152027, 1.061405429)
    p = 0.3275911
    ax = jnp.abs(x)
    t = 1.0 / (1.0 + p * ax)
    poly = ((((a5 * t + a4) * t + a3) * t + a2) * t + a1) * t
    y = 1.0 - poly * jnp.exp(-(ax * ax))
    return jnp.where(x < 0.0, -y, y)


def _gelu_exact(x):
    # Matches torch.nn.GELU() default (erf form) to ~1e-6 absolute.
    return 0.5 * x * (1.0 + _erf_poly(x * _SQRT_HALF))


def _banded_conv(x2d, t_ref, img_rows):
    """3x3 conv (pad=1) on rows flattened as (B*H, W*Cin).

    t_ref holds (3, W*Cin, W*Cout) banded slabs (kw taps and the W-axis zero
    padding are folded into the band structure).  The result is
        out[r] = x[r-1] @ t[0] + x[r] @ t[1] + x[r+1] @ t[2]
    where out-of-image rows contribute zero: the shift is a static jnp.roll
    (slice + concat) and a per-image boundary mask (row % H) zeroes both the
    zero-padding rows and any cross-image leakage within the batched block.
    """
    p0 = jnp.dot(x2d, t_ref[0], preferred_element_type=jnp.float32)
    p1 = jnp.dot(x2d, t_ref[1], preferred_element_type=jnp.float32)
    p2 = jnp.dot(x2d, t_ref[2], preferred_element_type=jnp.float32)
    row = jax.lax.broadcasted_iota(jnp.int32, p1.shape, 0)
    rin = row % img_rows
    # roll(p, +1)[r] = p[r-1] ; roll(p, -1)[r] = p[r+1]   (jnp.roll convention)
    above = jnp.where(rin == 0, 0.0, jnp.roll(p0, 1, axis=0))
    below = jnp.where(rin == img_rows - 1, 0.0, jnp.roll(p2, -1, axis=0))
    return p1 + above + below


def _stem_fused_kernel(*refs, trigger):
    if trigger:
        x_ref, t1_ref, t2_ref, shift_ref, o_ref = refs
    else:
        x_ref, t1_ref, t2_ref, o_ref = refs

    b, hgt, wcin = x_ref.shape
    x = x_ref[...].reshape(b * hgt, wcin)                  # (B*H, W*Cin)
    h = _banded_conv(x, t1_ref, hgt)                       # (B*H, W*Ch) f32
    if trigger:
        # BN scale is already folded into t1; add the shift, exact GELU (f32).
        h = _gelu_exact(h + shift_ref[...])
    out = _banded_conv(h.astype(t2_ref.dtype), t2_ref, hgt)   # (B*H, W*Cout)
    o_ref[...] = out.reshape(o_ref.shape).astype(o_ref.dtype)  # lane-dense


def _toeplitz_slabs(w_hwio, w_spatial, dtype):
    """Fold kw taps + W-axis zero padding of a 3x3 conv into 3 band slabs.

    Returns t with shape (3, W*Cin, W*Cout) such that
      t[kh, (j+kw-1)*Cin + c, j*Cout + o] = w[kh, kw, c, o]  (0 <= j+kw-1 < W)
    so (x[row].reshape(W*Cin) @ t[kh]) is the kh-tap contribution to output
    row (row - (kh - 1)).
    """
    _, _, cin, cout = w_hwio.shape
    a = jnp.arange(w_spatial)[:, None]
    b = jnp.arange(w_spatial)[None, :]
    slabs = []
    for kh in range(3):
        acc = jnp.zeros((w_spatial * cin, w_spatial * cout), jnp.float32)
        for kw in range(3):
            band = (a - b == (kw - 1)).astype(jnp.float32)     # (W, W)
            acc = acc + jnp.kron(band, w_hwio[kh, kw].astype(jnp.float32))
        slabs.append(acc)
    return jnp.stack(slabs, axis=0).astype(dtype)


def _pad_channels_for_lanes(c, w, lane=128):
    """Smallest padded channel count so W*C is a multiple of 128 (if cheap)."""
    if (w * c) % lane == 0:
        return c
    step = lane // math.gcd(w, lane)
    c_pad = -(-c // step) * step
    if w * c_pad <= max(lane, 2 * w * c):   # cap inflation to ~2x / one vreg
        return c_pad
    return c


def _pick_batch_tile(n, hgt, target_rows=256, max_rows=1024):
    """Largest divisor of N such that B_tile*H stays modest, >=256 rows if possible."""
    best = 1
    for b in range(1, n + 1):
        if n % b:
            continue
        if b * hgt > max_rows:
            break
        best = b
        if b * hgt >= target_rows:
            break
    return best


def stem_block_forward(x_nchw, w1_hwio, w2_hwio, bn_scale=None, bn_shift=None,
                       *, compute_dtype=jnp.float32, batch_tile=None):
    """StemBlock forward: conv3x3 -> [BN(eval)+GELU] -> conv3x3 (stride 1)."""
    n, cin, hgt, wid = x_nchw.shape
    ch = w1_hwio.shape[-1]
    cout = w2_hwio.shape[-1]
    trigger = bn_scale is not None
    out_dtype = x_nchw.dtype

    # Lane padding: make the contraction dims W*Cin / W*Ch multiples of 128.
    cin_p = _pad_channels_for_lanes(cin, wid)
    ch_p = _pad_channels_for_lanes(ch, wid)

    # NCHW -> NHWC -> (N, H, W*Cin_p) lane-flattened rows (layout plumbing).
    x = jnp.transpose(x_nchw, (0, 2, 3, 1))
    if cin_p != cin:
        x = jnp.pad(x, ((0, 0), (0, 0), (0, 0), (0, cin_p - cin)))
    x = x.reshape(n, hgt, wid * cin_p).astype(compute_dtype)

    # Fold eval-mode BN scale into conv1 weights (exact by linearity), pad.
    w1 = (w1_hwio * bn_scale) if trigger else w1_hwio
    if cin_p != cin or ch_p != ch:
        w1 = jnp.pad(w1, ((0, 0), (0, 0), (0, cin_p - cin), (0, ch_p - ch)))
    w2 = w2_hwio
    if ch_p != ch:
        w2 = jnp.pad(w2, ((0, 0), (0, 0), (0, ch_p - ch), (0, 0)))

    t1 = _toeplitz_slabs(w1, wid, compute_dtype)      # (3, W*Cin_p, W*Ch_p)
    t2 = _toeplitz_slabs(w2, wid, compute_dtype)      # (3, W*Ch_p,  W*Cout)

    wcin, wch, wcout = wid * cin_p, wid * ch_p, wid * cout

    b_tile = batch_tile if batch_tile is not None else _pick_batch_tile(n, hgt)
    assert n % b_tile == 0
    grid = (n // b_tile,)

    in_specs = [
        pl.BlockSpec((b_tile, hgt, wcin), lambda i: (i, 0, 0)),
        pl.BlockSpec((3, wcin, wch), lambda i: (0, 0, 0)),
        pl.BlockSpec((3, wch, wcout), lambda i: (0, 0, 0)),
    ]
    args = [x, t1, t2]
    if trigger:
        shift_full = jnp.pad(bn_shift.astype(jnp.float32), (0, ch_p - ch))
        shift_flat = jnp.tile(shift_full, wid).reshape(1, wch)
        in_specs.append(pl.BlockSpec((1, wch), lambda i: (0, 0)))
        args.append(shift_flat)

    # Cost estimate (advisory) and explicit VMEM budget.
    flops = 2 * 3 * (n * hgt) * (wcin * wch + wch * wcout)
    dsz = jnp.dtype(compute_dtype).itemsize
    osz = jnp.dtype(out_dtype).itemsize
    bytes_accessed = int(x.size * dsz + t1.size * dsz + t2.size * dsz
                         + n * hgt * wcout * osz)
    cost = pl.CostEstimate(
        flops=int(flops),
        transcendentals=int(n * hgt * wch) if trigger else 0,
        bytes_accessed=bytes_accessed)

    blk_bytes = (2 * b_tile * hgt * wcin * dsz          # x blocks (dbl-buf)
                 + 2 * (t1.size + t2.size) * dsz        # weight slabs (dbl-buf)
                 + 2 * b_tile * hgt * wcout * osz       # out blocks (dbl-buf)
                 + 6 * b_tile * hgt * max(wch, wcout) * 4)  # f32 intermediates
    vmem_limit = int(min(64 << 20, max(16 << 20, 2 * blk_bytes)))

    out = pl.pallas_call(
        functools.partial(_stem_fused_kernel, trigger=trigger),
        out_shape=jax.ShapeDtypeStruct((n, hgt, wcout), out_dtype),
        grid_spec=pltpu.PrefetchScalarGridSpec(
            num_scalar_prefetch=0,
            grid=grid,
            in_specs=in_specs,
            out_specs=pl.BlockSpec((b_tile, hgt, wcout), lambda i: (i, 0, 0)),
        ),
        compiler_params=pltpu.CompilerParams(
            dimension_semantics=("parallel",),
            vmem_limit_bytes=vmem_limit),
        cost_estimate=cost,
    )(*args)

    # (N, H, W*Cout) -> NCHW.
    return jnp.transpose(out.reshape(n, hgt, wid, cout), (0, 3, 1, 2))


class StemBlockPallas:
    """Pallas port of StemBlock (stride=1 path, eval-mode BatchNorm).

    Default compute dtype is bfloat16 (MXU-native on v5e/v6e/v7x) with f32
    accumulation; pass compute_dtype=jnp.float32 for reference-exact results.
    """

    def __init__(self, in_channels=3, hidden_channels=0, out_channels=64,
                 norm_trigger=False, key=None, compute_dtype=jnp.bfloat16):
        if hidden_channels == 0:
            hidden_channels = out_channels
        if key is None:
            key = jax.random.PRNGKey(0)
        self.trigger = norm_trigger
        self.compute_dtype = compute_dtype
        self.eps = 1e-5
        k1, k2, k3, k4, k5, k6 = jax.random.split(key, 6)
        # PyTorch conv weights are (Cout, Cin, kh, kw); store HWIO internally.
        w1_oihw = 0.1 * jax.random.normal(
            k1, (hidden_channels, in_channels, 3, 3), jnp.float32)
        w2_oihw = 0.1 * jax.random.normal(
            k2, (out_channels, hidden_channels, 3, 3), jnp.float32)
        self.w1 = jnp.transpose(w1_oihw, (2, 3, 1, 0))
        self.w2 = jnp.transpose(w2_oihw, (2, 3, 1, 0))
        if self.trigger:
            # Synthetic but non-trivial eval-mode BatchNorm parameters.
            self.gamma = 1.0 + 0.1 * jax.random.normal(k3, (hidden_channels,))
            self.beta = 0.1 * jax.random.normal(k4, (hidden_channels,))
            self.running_mean = 0.1 * jax.random.normal(k5, (hidden_channels,))
            self.running_var = jax.random.uniform(
                k6, (hidden_channels,), minval=0.5, maxval=1.5)

    def __call__(self, x_nchw):
        if self.trigger:
            inv_std = jax.lax.rsqrt(self.running_var + self.eps)
            scale = self.gamma * inv_std
            shift = self.beta - self.running_mean * scale
        else:
            scale = shift = None
        return stem_block_forward(x_nchw, self.w1, self.w2, scale, shift,
                                  compute_dtype=self.compute_dtype)


# ----------------------------- XLA reference -------------------------------
def _conv3x3_ref(x_nchw, w_hwio):
    return jax.lax.conv_general_dilated(
        x_nchw, w_hwio, window_strides=(1, 1), padding=((1, 1), (1, 1)),
        dimension_numbers=("NCHW", "HWIO", "NCHW"),
        precision=jax.lax.Precision.HIGHEST)


def _stem_ref(x_nchw, stem):
    y = _conv3x3_ref(x_nchw, stem.w1)
    if stem.trigger:
        c = lambda v: v.reshape(1, -1, 1, 1)
        y = (y - c(stem.running_mean)) * jax.lax.rsqrt(
            c(stem.running_var) + stem.eps) * c(stem.gamma) + c(stem.beta)
        y = jax.nn.gelu(y, approximate=False)          # torch nn.GELU() (erf)
    return _conv3x3_ref(y, stem.w2)


if __name__ == "__main__":
    key = jax.random.PRNGKey(0)
    kx, kp, kq = jax.random.split(key, 3)

    # Small shapes consistent with the module's forward (NCHW input).
    n, c_in, hgt, wid = 2, 3, 16, 16
    hidden, c_out = 8, 16

    x = jax.random.normal(kx, (n, c_in, hgt, wid), jnp.float32)

    with jax.default_matmul_precision("float32"):
        # f32 compute path: conv -> conv (norm_trigger=False), near-exact.
        stem_f32 = StemBlockPallas(in_channels=c_in, hidden_channels=hidden,
                                   out_channels=c_out, norm_trigger=False,
                                   key=kp, compute_dtype=jnp.float32)
        y = jax.block_until_ready(stem_f32(x))
        assert y.shape == (n, c_out, hgt, wid), y.shape
        y_ref = _stem_ref(x, stem_f32)
        err = float(jnp.max(jnp.abs(y - y_ref)))
        assert err < 5e-3, err

        # norm_trigger=True: conv -> BN(eval) -> GELU -> conv, fused in-kernel.
        stem_bn = StemBlockPallas(in_channels=c_in, hidden_channels=hidden,
                                  out_channels=c_out, norm_trigger=True,
                                  key=kq, compute_dtype=jnp.float32)
        y_bn = jax.block_until_ready(stem_bn(x))
        y_bn_ref = _stem_ref(x, stem_bn)
        err_bn = float(jnp.max(jnp.abs(y_bn - y_bn_ref)))
        assert err_bn < 5e-3, err_bn

        # Default (bf16 operands, f32 MXU accumulation) -> loose tolerance.
        stem_bf16 = StemBlockPallas(in_channels=c_in, hidden_channels=hidden,
                                    out_channels=c_out, norm_trigger=True,
                                    key=kq)
        y_bf16 = jax.block_until_ready(stem_bf16(x))
        err_bf16 = float(jnp.max(jnp.abs(y_bf16.astype(jnp.float32) - y_bn_ref)))
        assert err_bf16 < 8e-2, err_bf16

    print("KERNEL_OK")
</pallas_src>

<mosaic_0001>
module attributes {stable_mosaic.version = 11 : i64} {
  func.func @_stem_fused_kernel(%arg0: i32, %arg1: memref<2x16x128xf32, #tpu.memory_space<vmem>>, %arg2: memref<3x128x128xf32, #tpu.memory_space<vmem>>, %arg3: memref<3x128x256xf32, #tpu.memory_space<vmem>>, %arg4: memref<2x16x256xf32, #tpu.memory_space<vmem>>) attributes {dimension_semantics = [#tpu.dimension_semantics<parallel>], iteration_bounds = array<i64: 1>, scalar_prefetch = 0 : i64, scratch_operands = 0 : i64, tpu.core_type = #tpu.core_type<tc>, window_params = [{transform_indices = @transform_0, window_bounds = array<i64: 2, 16, 128>}, {pipeline_mode = #tpu.pipeline_mode<synchronous>, transform_indices = @transform_1, window_bounds = array<i64: 3, 128, 128>}, {pipeline_mode = #tpu.pipeline_mode<synchronous>, transform_indices = @transform_2, window_bounds = array<i64: 3, 128, 256>}, {transform_indices = @transform_3, window_bounds = array<i64: 2, 16, 256>}]} {
    %c0 = arith.constant 0 : index
    %c0_0 = arith.constant 0 : index
    %c0_1 = arith.constant 0 : index
    %0 = vector.load %arg1[%c0, %c0_0, %c0_1] : memref<2x16x128xf32, #tpu.memory_space<vmem>>, vector<2x16x128xf32>
    %1 = vector.shape_cast %0 : vector<2x16x128xf32> to vector<32x128xf32>
    %c0_2 = arith.constant 0 : index
    %c0_3 = arith.constant 0 : index
    %c0_4 = arith.constant 0 : index
    %2 = vector.load %arg2[%c0_2, %c0_3, %c0_4] : memref<3x128x128xf32, #tpu.memory_space<vmem>>, vector<1x128x128xf32>
    %3 = vector.shape_cast %2 : vector<1x128x128xf32> to vector<128x128xf32>
    %cst = arith.constant dense<0.000000e+00> : vector<32x128xf32>
    %4 = tpu.matmul %1, %3, %cst {dimension_numbers = #tpu.dot_dimension_numbers<[1], [0], [0], [1], [0, 0, 1, 1], [], []>, precision = #tpu.contract_precision<fp32>} : vector<32x128xf32>, vector<128x128xf32>, vector<32x128xf32> -> vector<32x128xf32>
    %c1 = arith.constant 1 : index
    %c0_5 = arith.constant 0 : index
    %c0_6 = arith.constant 0 : index
    %5 = vector.load %arg2[%c1, %c0_5, %c0_6] : memref<3x128x128xf32, #tpu.memory_space<vmem>>, vector<1x128x128xf32>
    %6 = vector.shape_cast %5 : vector<1x128x128xf32> to vector<128x128xf32>
    %cst_7 = arith.constant dense<0.000000e+00> : vector<32x128xf32>
    %7 = tpu.matmul %1, %6, %cst_7 {dimension_numbers = #tpu.dot_dimension_numbers<[1], [0], [0], [1], [0, 0, 1, 1], [], []>, precision = #tpu.contract_precision<fp32>} : vector<32x128xf32>, vector<128x128xf32>, vector<32x128xf32> -> vector<32x128xf32>
    %c2 = arith.constant 2 : index
    %c0_8 = arith.constant 0 : index
    %c0_9 = arith.constant 0 : index
    %8 = vector.load %arg2[%c2, %c0_8, %c0_9] : memref<3x128x128xf32, #tpu.memory_space<vmem>>, vector<1x128x128xf32>
    %9 = vector.shape_cast %8 : vector<1x128x128xf32> to vector<128x128xf32>
    %cst_10 = arith.constant dense<0.000000e+00> : vector<32x128xf32>
    %10 = tpu.matmul %1, %9, %cst_10 {dimension_numbers = #tpu.dot_dimension_numbers<[1], [0], [0], [1], [0, 0, 1, 1], [], []>, precision = #tpu.contract_precision<fp32>} : vector<32x128xf32>, vector<128x128xf32>, vector<32x128xf32> -> vector<32x128xf32>
    %11 = tpu.iota {dimensions = array<i32: 0>} : vector<32x128xi32>
    %c16_i32 = arith.constant 16 : i32
    %c0_i32 = arith.constant 0 : i32
    %12 = arith.cmpi eq, %c16_i32, %c0_i32 : i32
    %c1_i32 = arith.constant 1 : i32
    %13 = arith.select %12, %c1_i32, %c16_i32 : i32
    %14 = vector.broadcast %13 : i32 to vector<32x128xi32>
    %15 = arith.remsi %11, %14 : vector<32x128xi32>
    %c0_i32_11 = arith.constant 0 : i32
    %16 = vector.broadcast %c0_i32_11 : i32 to vector<32x128xi32>
    %17 = arith.cmpi ne, %15, %16 : vector<32x128xi32>
    %c0_i32_12 = arith.constant 0 : i32
    %18 = vector.broadcast %c0_i32_12 : i32 to vector<32x128xi32>
    %19 = arith.cmpi slt, %15, %18 : vector<32x128xi32>
    %c0_i32_13 = arith.constant 0 : i32
    %20 = arith.cmpi slt, %13, %c0_i32_13 : i32
    %21 = vector.broadcast %20 : i1 to vector<32x128xi1>
    %22 = vector.broadcast %21 : vector<32x128xi1> to vector<32x128xi1>
    %23 = arith.xori %19, %22 : vector<32x128xi1>
    %24 = arith.andi %23, %17 : vector<32x128xi1>
    %25 = vector.broadcast %13 : i32 to vector<32x128xi32>
    %26 = arith.addi %15, %25 : vector<32x128xi32>
    %27 = arith.select %24, %26, %15 : vector<32x128xi1>, vector<32x128xi32>
    %c0_i32_14 = arith.constant 0 : i32
    %28 = vector.broadcast %c0_i32_14 : i32 to vector<32x128xi32>
    %29 = arith.cmpi eq, %27, %28 : vector<32x128xi32>
    %30 = vector.extract_strided_slice %4 {offsets = [31, 0], sizes = [1, 128], strides = [1, 1]} : vector<32x128xf32> to vector<1x128xf32>
    %31 = vector.extract_strided_slice %4 {offsets = [0, 0], sizes = [31, 128], strides = [1, 1]} : vector<32x128xf32> to vector<31x128xf32>
    %32 = tpu.concatenate %30, %31 in 0 : vector<1x128xf32>, vector<31x128xf32> -> vector<32x128xf32>
    %cst_15 = arith.constant 0.000000e+00 : f32
    %33 = vector.broadcast %cst_15 : f32 to vector<32x128xf32>
    %34 = arith.select %29, %33, %32 : vector<32x128xi1>, vector<32x128xf32>
    %c15_i32 = arith.constant 15 : i32
    %35 = vector.broadcast %c15_i32 : i32 to vector<32x128xi32>
    %36 = arith.cmpi eq, %27, %35 : vector<32x128xi32>
    %37 = vector.extract_strided_slice %10 {offsets = [1, 0], sizes = [31, 128], strides = [1, 1]} : vector<32x128xf32> to vector<31x128xf32>
    %38 = vector.extract_strided_slice %10 {offsets = [0, 0], sizes = [1, 128], strides = [1, 1]} : vector<32x128xf32> to vector<1x128xf32>
    %39 = tpu.concatenate %37, %38 in 0 : vector<31x128xf32>, vector<1x128xf32> -> vector<32x128xf32>
    %cst_16 = arith.constant 0.000000e+00 : f32
    %40 = vector.broadcast %cst_16 : f32 to vector<32x128xf32>
    %41 = arith.select %36, %40, %39 : vector<32x128xi1>, vector<32x128xf32>
    %42 = arith.addf %7, %34 : vector<32x128xf32>
    %43 = arith.addf %42, %41 : vector<32x128xf32>
    %c0_17 = arith.constant 0 : index
    %c0_18 = arith.constant 0 : index
    %c0_19 = arith.constant 0 : index
    %44 = vector.load %arg3[%c0_17, %c0_18, %c0_19] : memref<3x128x256xf32, #tpu.memory_space<vmem>>, vector<1x128x256xf32>
    %45 = vector.shape_cast %44 : vector<1x128x256xf32> to vector<128x256xf32>
    %cst_20 = arith.constant dense<0.000000e+00> : vector<32x256xf32>
    %46 = tpu.matmul %43, %45, %cst_20 {dimension_numbers = #tpu.dot_dimension_numbers<[1], [0], [0], [1], [0, 0, 1, 1], [], []>, precision = #tpu.contract_precision<fp32>} : vector<32x128xf32>, vector<128x256xf32>, vector<32x256xf32> -> vector<32x256xf32>
    %c1_21 = arith.constant 1 : index
    %c0_22 = arith.constant 0 : index
    %c0_23 = arith.constant 0 : index
    %47 = vector.load %arg3[%c1_21, %c0_22, %c0_23] : memref<3x128x256xf32, #tpu.memory_space<vmem>>, vector<1x128x256xf32>
    %48 = vector.shape_cast %47 : vector<1x128x256xf32> to vector<128x256xf32>
    %cst_24 = arith.constant dense<0.000000e+00> : vector<32x256xf32>
    %49 = tpu.matmul %43, %48, %cst_24 {dimension_numbers = #tpu.dot_dimension_numbers<[1], [0], [0], [1], [0, 0, 1, 1], [], []>, precision = #tpu.contract_precision<fp32>} : vector<32x128xf32>, vector<128x256xf32>, vector<32x256xf32> -> vector<32x256xf32>
    %c2_25 = arith.constant 2 : index
    %c0_26 = arith.constant 0 : index
    %c0_27 = arith.constant 0 : index
    %50 = vector.load %arg3[%c2_25, %c0_26, %c0_27] : memref<3x128x256xf32, #tpu.memory_space<vmem>>, vector<1x128x256xf32>
    %51 = vector.shape_cast %50 : vector<1x128x256xf32> to vector<128x256xf32>
    %cst_28 = arith.constant dense<0.000000e+00> : vector<32x256xf32>
    %52 = tpu.matmul %43, %51, %cst_28 {dimension_numbers = #tpu.dot_dimension_numbers<[1], [0], [0], [1], [0, 0, 1, 1], [], []>, precision = #tpu.contract_precision<fp32>} : vector<32x128xf32>, vector<128x256xf32>, vector<32x256xf32> -> vector<32x256xf32>
    %53 = tpu.iota {dimensions = array<i32: 0>} : vector<32x256xi32>
    %c16_i32_29 = arith.constant 16 : i32
    %c0_i32_30 = arith.constant 0 : i32
    %54 = arith.cmpi eq, %c16_i32_29, %c0_i32_30 : i32
    %c1_i32_31 = arith.constant 1 : i32
    %55 = arith.select %54, %c1_i32_31, %c16_i32_29 : i32
    %56 = vector.broadcast %55 : i32 to vector<32x256xi32>
    %57 = arith.remsi %53, %56 : vector<32x256xi32>
    %c0_i32_32 = arith.constant 0 : i32
    %58 = vector.broadcast %c0_i32_32 : i32 to vector<32x256xi32>
    %59 = arith.cmpi ne, %57, %58 : vector<32x256xi32>
    %c0_i32_33 = arith.constant 0 : i32
    %60 = vector.broadcast %c0_i32_33 : i32 to vector<32x256xi32>
    %61 = arith.cmpi slt, %57, %60 : vector<32x256xi32>
    %c0_i32_34 = arith.constant 0 : i32
    %62 = arith.cmpi slt, %55, %c0_i32_34 : i32
    %63 = vector.broadcast %62 : i1 to vector<32x256xi1>
    %64 = vector.broadcast %63 : vector<32x256xi1> to vector<32x256xi1>
    %65 = arith.xori %61, %64 : vector<32x256xi1>
    %66 = arith.andi %65, %59 : vector<32x256xi1>
    %67 = vector.broadcast %55 : i32 to vector<32x256xi32>
    %68 = arith.addi %57, %67 : vector<32x256xi32>
    %69 = arith.select %66, %68, %57 : vector<32x256xi1>, vector<32x256xi32>
    %c0_i32_35 = arith.constant 0 : i32
    %70 = vector.broadcast %c0_i32_35 : i32 to vector<32x256xi32>
    %71 = arith.cmpi eq, %69, %70 : vector<32x256xi32>
    %72 = vector.extract_strided_slice %46 {offsets = [31, 0], sizes = [1, 256], strides = [1, 1]} : vector<32x256xf32> to vector<1x256xf32>
    %73 = vector.extract_strided_slice %46 {offsets = [0, 0], sizes = [31, 256], strides = [1, 1]} : vector<32x256xf32> to vector<31x256xf32>
    %74 = tpu.concatenate %72, %73 in 0 : vector<1x256xf32>, vector<31x256xf32> -> vector<32x256xf32>
    %cst_36 = arith.constant 0.000000e+00 : f32
    %75 = vector.broadcast %cst_36 : f32 to vector<32x256xf32>
    %76 = arith.select %71, %75, %74 : vector<32x256xi1>, vector<32x256xf32>
    %c15_i32_37 = arith.constant 15 : i32
    %77 = vector.broadcast %c15_i32_37 : i32 to vector<32x256xi32>
    %78 = arith.cmpi eq, %69, %77 : vector<32x256xi32>
    %79 = vector.extract_strided_slice %52 {offsets = [1, 0], sizes = [31, 256], strides = [1, 1]} : vector<32x256xf32> to vector<31x256xf32>
    %80 = vector.extract_strided_slice %52 {offsets = [0, 0], sizes = [1, 256], strides = [1, 1]} : vector<32x256xf32> to vector<1x256xf32>
    %81 = tpu.concatenate %79, %80 in 0 : vector<31x256xf32>, vector<1x256xf32> -> vector<32x256xf32>
    %cst_38 = arith.constant 0.000000e+00 : f32
    %82 = vector.broadcast %cst_38 : f32 to vector<32x256xf32>
    %83 = arith.select %78, %82, %81 : vector<32x256xi1>, vector<32x256xf32>
    %84 = arith.addf %49, %76 : vector<32x256xf32>
    %85 = arith.addf %84, %83 : vector<32x256xf32>
    %86 = vector.shape_cast %85 : vector<32x256xf32> to vector<2x16x256xf32>
    %c0_39 = arith.constant 0 : index
    %c0_40 = arith.constant 0 : index
    %c0_41 = arith.constant 0 : index
    %87 = vector.load %arg4[%c0_39, %c0_40, %c0_41] : memref<2x16x256xf32, #tpu.memory_space<vmem>>, vector<2x16x256xf32>
    tpu.vector_store %arg4[%c0_39, %c0_40, %c0_41], %86 {strides = array<i32>} : memref<2x16x256xf32, #tpu.memory_space<vmem>>, vector<2x16x256xf32>,
    return
  }
  func.func @transform_0(%arg0: i32) -> (i32, i32, i32) {
    %c0_i32 = arith.constant 0 : i32
    %c0_i32_0 = arith.constant 0 : i32
    %c0_i32_1 = arith.constant 0 : i32
    return %arg0, %c0_i32, %c0_i32_0 : i32, i32, i32
  }
  func.func @transform_1(%arg0: i32) -> (i32, i32, i32) {
    %c0_i32 = arith.constant 0 : i32
    %c0_i32_0 = arith.constant 0 : i32
    %c0_i32_1 = arith.constant 0 : i32
    %c0_i32_2 = arith.constant 0 : i32
    return %c0_i32, %c0_i32_0, %c0_i32_1 : i32, i32, i32
  }
  func.func @transform_2(%arg0: i32) -> (i32, i32, i32) {
    %c0_i32 = arith.constant 0 : i32
    %c0_i32_0 = arith.constant 0 : i32
    %c0_i32_1 = arith.constant 0 : i32
    %c0_i32_2 = arith.constant 0 : i32
    return %c0_i32, %c0_i32_0, %c0_i32_1 : i32, i32, i32
  }
  func.func @transform_3(%arg0: i32) -> (i32, i32, i32) {
    %c0_i32 = arith.constant 0 : i32
    %c0_i32_0 = arith.constant 0 : i32
    %c0_i32_1 = arith.constant 0 : i32
    return %arg0, %c0_i32, %c0_i32_0 : i32, i32, i32
  }
}

</mosaic_0001>

<bundles_post_ra>
// kernel: tpu_custom_call.1
= control target key start
LH: loop header
LB: loop body
LE: loop exit
PB: predicated region body
PF: predicated region fallthrough
CT: control target
= control target key end

     0   :  { %8 = vsyncpa [#allocation3], 0  ;;  %s7551_s0 = inlined_call_operand.hbm [shape: f32[2,16,128], index: 0, kind: input, shape index: {}]   ;;  %s7552_s1 = inlined_call_operand.hbm [shape: f32[3,128,128], index: 1, kind: input, shape index: {}]   ;;  %s7553_s2 = inlined_call_operand.hbm [shape: f32[3,128,256], index: 2, kind: input, shape index: {}]   ;;  %s7554_s3 = inlined_call_operand.hbm [shape: f32[2,16,256], index: 3, kind: output, shape index: {}]  }
   0x1   :  { %9 = vsyncpa [#allocation6], 0 }
   0x2   :  { %10 = vsyncpa [#allocation4], 0  ;;  %s28_s14 = sshll.u32 %s7552_s1, 4  ;;  %s4491_s15 = smov [#allocation5]   ;;  %s29_s14 = int_to_ptr.hbm [resolvable:$true] %s28_s14 }
   0x3   :  { %s30_s16 = sshll.u32 %s4491_s15, 4  ;;  %s15_s19 = sshll.u32 %s7551_s0, 4  ;;  %s31_s16 = int_to_ptr.vmem [resolvable:$true] %s30_s16  ;;  %s16_s19 = int_to_ptr.hbm [resolvable:$true] %s15_s19 }
   0x4   :  { %s4492_s20 = smov 128   ;;  %s4493_s21 = smov 8  }
   0x5   :  { %36 = dma.hbm_to_vmem [thread:$0]  %s29_s14, 6144, %s31_s16, [#allocation6], %s4492_s20, %s4492_s20, %s4493_s21  }
   0x6   :  { %s4494_s22 = smov [#allocation2]   ;;  %s41_s26 = sshll.u32 %s7553_s2, 4  ;;  %s42_s26 = int_to_ptr.hbm [resolvable:$true] %s41_s26 }
   0x7   :  { %s17_s23 = sshll.u32 %s4494_s22, 4  ;;  %s4495_s1 = smov [#allocation7]   ;;  %s18_s23 = int_to_ptr.vmem [resolvable:$true] %s17_s23 }
   0x8   :  { %23 = dma.hbm_to_vmem [thread:$0]  %s16_s19, 512, %s18_s23, [#allocation3], %s4492_s20, %s4492_s20, %s4493_s21  }
   0x9   :  { %s43_s27 = sshll.u32 %s4495_s1, 4  ;;  %s4496_s28 = smov 256   ;;  %s44_s27 = int_to_ptr.vmem [resolvable:$true] %s43_s27 }
   0xa   :  { %s4497_s29 = smov 16  }
   0xb   :  { %49 = dma.hbm_to_vmem [thread:$0]  %s42_s26, 12288, %s44_s27, [#allocation6], %s4496_s28, %s4496_s28, %s4497_s29  }
   0xc   :  { %4485 = dma.done.wait [#allocation3], 512  }
   0xd   :  { %4486 = vsyncadd [#allocation3], 4294966784 }
   0xe   :  { %4487 = dma.done.wait [#allocation6], 18432  }
   0xf   :  { %4488 = vsyncadd [#allocation6], 4294948864  ;;  %v81_v0 = vld [vmem:[#allocation5 + $0x78] sm:$0xff]  ;;  %v80_v1 = vld [vmem:[#allocation5 + $0x70] sm:$0xff]  ;;  %vm1047_vm0 = vcmask 1040384   ;;  %vm1071_vm3 = vcmask 1046528  }
  0x10   :  { %v79_v2 = vld [vmem:[#allocation5 + $0x68] sm:$0xff]  ;;  %v4531_v3 = vand.u32 4294901760, %v81_v0  ;;  %v4533_v4 = vand.u32 4294901760, %v80_v1  ;;  %v78_v6 = vld [vmem:[#allocation5 + $0x60] sm:$0xff]  ;;  %v77_v7 = vld [vmem:[#allocation5 + $0x58] sm:$0xff]  ;;  %s4498_s0 = smov [#allocation8]  }
  0x11   :  { %v4535_v5 = vand.u32 4294901760, %v79_v2  ;;  %v76_v8 = vld [vmem:[#allocation5 + $0x50] sm:$0xff]  ;;  %v4537_v9 = vand.u32 4294901760, %v78_v6  ;;  %v4539_v10 = vand.u32 4294901760, %v77_v7  ;;  %v75_v12 = vld [vmem:[#allocation5 + $0x48] sm:$0xff]  ;;  %v74_v13 = vld [vmem:[#allocation5 + $0x40] sm:$0xff] }
  0x12   :  { %v4541_v11 = vand.u32 4294901760, %v76_v8  ;;  %83 = vmatpush.msra.mxu0 %v4531_v3  ;;  %v4545_v14 = vsub.f32 %v81_v0, %v4531_v3  ;;  %v4548_v15 = vsub.f32 %v80_v1, %v4533_v4  ;;  %330 = vmatpush.msra.mxu3 %v4531_v3  ;;  %v4554_v17 = vand.u32 4294901760, %v75_v12  ;;  %v73_v18 = vld [vmem:[#allocation5 + $0x38] sm:$0xff]  ;;  %v72_v26 = vld [vmem:[#allocation5 + $0x30] sm:$0xff]  ;;  %v71_v36 = vld [vmem:[#allocation5 + $0x28] sm:$0xff]  ;;  %s4333_s2 = sshll.u32 %s4498_s0, 4  ;;  %s4334_s2 = int_to_ptr.vmem [resolvable:$true] %s4333_s2 }
  0x13   :  { %v4552_v16 = vsub.f32 %v79_v2, %v4535_v5  ;;  %v4557_v19 = vsub.f32 %v78_v6, %v4537_v9  ;;  %v4560_v20 = vsub.f32 %v77_v7, %v4539_v10  ;;  %v4570_v25 = vand.u32 4294901760, %v74_v13  ;;  %v70_v41 = vld [vmem:[#allocation5 + $0x20] sm:$0xff]  ;;  %v69_v49 = vld [vmem:[#allocation5 + $0x18] sm:$0xff]  ;;  %v68_v55 = vld [vmem:[#allocation5 + $0x10] sm:$0xff]  ;;  %s4335_s5 = sshll.u32 %s7554_s3, 4  ;;  %s4336_s5 = int_to_ptr.hbm [resolvable:$true] %s4335_s5 }
  0x14   :  { %v4563_v21 = vsub.f32 %v76_v8, %v4541_v11  ;;  %85 = vmatpush.msra.mxu0 %v4533_v4  ;;  %262 = vmatpush.msra.mxu2 %v4545_v14  ;;  %v7570_v22 = vand.u32 4294901760, %v4545_v14  ;;  %v7568_v23 = vand.u32 4294901760, %v4548_v15  ;;  %v4574_v28 = vand.u32 4294901760, %v73_v18  ;;  %v62_v56 = vld [vmem:[#allocation2] sm:$0xff]  ;;  %v67_v62 = vld [vmem:[#allocation5 + $0x8] sm:$0xff]  ;;  %v549_v6 = vld [vmem:[#allocation5 + $0x178] sm:$0xff] }
  0x15   :  { %v7566_v24 = vand.u32 4294901760, %v4552_v16  ;;  %332 = vmatpush.msra.mxu3 %v4533_v4  ;;  %v7565_v27 = vand.u32 4294901760, %v4557_v19  ;;  %v4577_v29 = vsub.f32 %v75_v12, %v4554_v17  ;;  %v7564_v33 = vand.u32 4294901760, %v4560_v20  ;;  %v66_v12 = vld [vmem:[#allocation5] sm:$0xff] }
  0x16   :  { %87 = vmatpush.msra.mxu0 %v4535_v5  ;;  %265 = vmatpush.msra.mxu2 %v4548_v15  ;;  %v150_v30 = vsub.f32 %v4545_v14, %v7570_v22  ;;  %v156_v31 = vsub.f32 %v4548_v15, %v7568_v23  ;;  %v4592_v34 = vand.u32 4294901760, %v72_v26  ;;  %v7562_v35 = vand.u32 4294901760, %v4563_v21  ;;  %v543_v22 = vld [vmem:[#allocation5 + $0x148] sm:$0xff] }
  0x17   :  { %v162_v32 = vsub.f32 %v4552_v16, %v7566_v24  ;;  %334 = vmatpush.msra.mxu3 %v4535_v5  ;;  %v168_v39 = vsub.f32 %v4557_v19, %v7565_v27  ;;  %v4601_v40 = vsub.f32 %v74_v13, %v4570_v25  ;;  %v7561_v42 = vand.u32 4294901760, %v4577_v29  ;;  %v544_v24 = vld [vmem:[#allocation5 + $0x150] sm:$0xff] }
  0x18   :  { %89 = vmatpush.msra.mxu0 %v4537_v9  ;;  %v151_v37 = vand.u32 4294901760, %v150_v30  ;;  %268 = vmatpush.msra.mxu2 %v4552_v16  ;;  %v157_v38 = vand.u32 4294901760, %v156_v31  ;;  %v4606_v43 = vsub.f32 %v73_v18, %v4574_v28  ;;  %v174_v45 = vsub.f32 %v4560_v20, %v7564_v33  ;;  %v63_v31 = vld [vmem:[#allocation2 + $0x8] sm:$0xff] }
  0x19   :  { %336 = vmatpush.msra.mxu3 %v4537_v9  ;;  %v163_v44 = vand.u32 4294901760, %v162_v32  ;;  %v4612_v46 = vand.u32 4294901760, %v71_v36  ;;  %v180_v47 = vsub.f32 %v4563_v21, %v7562_v35  ;;  %v4619_v48 = vand.u32 4294901760, %v70_v41 }
  0x1a   :  { %91 = vmatpush.msra.mxu0 %v4539_v10  ;;  %152 = vmatpush.msra.mxu1 %v151_v37  ;;  %v169_v50 = vand.u32 4294901760, %v168_v39  ;;  %v7560_v51 = vand.u32 4294901760, %v4601_v40  ;;  %v4624_v52 = vsub.f32 %v72_v26, %v4592_v34  ;;  %v186_v53 = vsub.f32 %v4577_v29, %v7561_v42  ;;  %v545_v42 = vld [vmem:[#allocation5 + $0x158] sm:$0xff] }
  0x1b   :  { %271 = vmatpush.msra.mxu2 %v4557_v19  ;;  %338 = vmatpush.msra.mxu3 %v4539_v10  ;;  %v7558_v54 = vand.u32 4294901760, %v4606_v43  ;;  %v175_v57 = vand.u32 4294901760, %v174_v45  ;;  %v4633_v58 = vand.u32 4294901760, %v69_v49  ;;  %v4636_v59 = vsub.f32 %v71_v36, %v4612_v46  ;;  %v548_v45 = vld [vmem:[#allocation5 + $0x170] sm:$0xff] }
  0x1c   :  { %93 = vmatpush.msra.mxu0 %v4541_v11  ;;  %158 = vmatpush.msra.mxu1 %v157_v38  ;;  %v181_v60 = vand.u32 4294901760, %v180_v47  ;;  %v4641_v61 = vsub.f32 %v70_v41, %v4619_v48  ;;  %v192_v63 = vsub.f32 %v4601_v40, %v7560_v51  ;;  %v4647_v0 = vand.u32 4294901760, %v68_v55 }
  0x1d   :  { %274 = vmatpush.msra.mxu2 %v4560_v20  ;;  %340 = vmatpush.msra.mxu3 %v4541_v11  ;;  %v7557_v1 = vand.u32 4294901760, %v4624_v52  ;;  %v4650_v2 = vand.u32 4294901760, %v62_v56  ;;  %v187_v7 = vand.u32 4294901760, %v186_v53  ;;  %v198_v8 = vsub.f32 %v4606_v43, %v7558_v54 }
  0x1e   :  { %95 = vmatpush.msra.mxu0 %v4554_v17  ;;  %164 = vmatpush.msra.mxu1 %v163_v44  ;;  %7747 = vst [vmem:[#allocation12_spill] sm:$0xff] %v4647_v0  ;;  %v4658_v13 = vand.u32 4294901760, %v67_v62  ;;  %v7556_v18 = vand.u32 4294901760, %v4636_v59  ;;  %v4662_v26 = vsub.f32 %v69_v49, %v4633_v58  ;;  %v7555_v32 = vand.u32 4294901760, %v4641_v61 }
  0x1f   :  { %277 = vmatpush.msra.mxu2 %v4563_v21  ;;  %342 = vmatpush.msra.mxu3 %v4554_v17  ;;  %v4665_v30 = vsub.f32 %v62_v56, %v4650_v2  ;;  %v4670_v36 = vand.u32 4294901760, %v549_v6  ;;  %v193_v37 = vand.u32 4294901760, %v192_v63  ;;  %v204_v38 = vsub.f32 %v4624_v52, %v7557_v1 }
  0x20   :  { %97 = vmatpush.msra.mxu0 %v4570_v25  ;;  %170 = vmatpush.msra.mxu1 %v169_v50  ;;  %7748 = vst [vmem:[#allocation13_spill] sm:$0xff] %v4658_v13  ;;  %v4676_v39 = vand.u32 4294901760, %v66_v12  ;;  %v4679_v41 = vsub.f32 %v68_v55, %v4647_v0  ;;  %v4686_v47 = vand.u32 4294901760, %v63_v31  ;;  %v199_v49 = vand.u32 4294901760, %v198_v8 }
  0x21   :  { %280 = vmatpush.msra.mxu2 %v4577_v29  ;;  %344 = vmatpush.msra.mxu3 %v4570_v25  ;;  %7749 = vst [vmem:[#allocation14_spill] sm:$0xff] %v4665_v30  ;;  %v4684_v44 = vand.u32 4294901760, %v4665_v30  ;;  %v210_v50 = vsub.f32 %v4636_v59, %v7556_v18  ;;  %v7559_v53 = vand.u32 4294901760, %v4662_v26  ;;  %v4694_v55 = vsub.f32 %v67_v62, %v4658_v13  ;;  %v546_v18 = vld [vmem:[#allocation5 + $0x160] sm:$0xff] }
  0x22   :  { %99 = vmatpush.msra.mxu0 %v4574_v28  ;;  %176 = vmatpush.msra.mxu1 %v175_v57  ;;  %7750 = vst [vmem:[#allocation15_spill] sm:$0xff] %v4676_v39  ;;  %v216_v56 = vsub.f32 %v4641_v61, %v7555_v32  ;;  %v4702_v57 = vsub.f32 %v549_v6, %v4670_v36  ;;  %v205_v63 = vand.u32 4294901760, %v204_v38  ;;  %v4709_v8 = vand.u32 4294901760, %v548_v45 }
  0x23   :  { %283 = vmatpush.msra.mxu2 %v4601_v40  ;;  %346 = vmatpush.msra.mxu3 %v4574_v28  ;;  %7751 = vst [vmem:[#allocation16_spill] sm:$0xff] %v4684_v44  ;;  %v4707_v62 = vsub.f32 %v66_v12, %v4676_v39  ;;  %v117_v6 = vsub.f32 %v4665_v30, %v4684_v44  ;;  %v7567_v38 = vand.u32 4294901760, %v4694_v55  ;;  %v4736_v51 = vand.u32 4294901760, %v546_v18 }
  0x24   :  { %101 = vmatpush.msra.mxu0 %v4592_v34  ;;  %182 = vmatpush.msra.mxu1 %v181_v60  ;;  %v547_v60 = vld [vmem:[#allocation5 + $0x168] sm:$0xff]  ;;  %v4716_v32 = vsub.f32 %v63_v31, %v4686_v47  ;;  %v222_v12 = vsub.f32 %v4662_v26, %v7559_v53  ;;  %v217_v54 = vand.u32 4294901760, %v216_v56  ;;  %v7569_v31 = vand.u32 4294901760, %v4702_v57  ;;  %v64_v56 = vld [vmem:[#allocation2 + $0x10] sm:$0xff] }
  0x25   :  { %286 = vmatpush.msra.mxu2 %v4606_v43  ;;  %348 = vmatpush.msra.mxu3 %v4592_v34  ;;  %v4723_v1 = vand.u32 4294901760, %v547_v60  ;;  %v4734_v53 = vsub.f32 %v548_v45, %v4709_v8  ;;  %v4739_v35 = vand.u32 4294901760, %v117_v6  ;;  %v234_v45 = vsub.f32 %v4694_v55, %v7567_v38 }
  0x26   :  { %103 = vmatpush.msra.mxu0 %v4612_v46  ;;  %188 = vmatpush.msra.mxu1 %v187_v7  ;;  %v7563_v7 = vand.u32 4294901760, %v4679_v41  ;;  %7752 = vst [vmem:[#allocation17_spill] sm:$0xff] %v4716_v32  ;;  %v618_v6 = vsub.f32 %v4702_v57, %v7569_v31  ;;  %v4757_v27 = vand.u32 4294901760, %v545_v42  ;;  %v4767_v23 = vsub.f32 %v546_v18, %v4736_v51 }
  0x27   :  { %289 = vmatpush.msra.mxu2 %v4624_v52  ;;  %350 = vmatpush.msra.mxu3 %v4612_v46  ;;  %7753 = vst [vmem:[#allocation18_spill] sm:$0xff] %v4739_v35  ;;  %v4750_v33 = vsub.f32 %v547_v60, %v4723_v1 }
  0x28   :  { %105 = vmatpush.msra.mxu0 %v4619_v48  ;;  %194 = vmatpush.msra.mxu1 %v193_v37  ;;  %v211_v37 = vand.u32 4294901760, %v210_v50  ;;  %v7571_v50 = vand.u32 4294901760, %v4707_v62  ;;  %v619_v18 = vand.u32 4294901760, %v618_v6  ;;  %v4781_v38 = vsub.f32 %v545_v42, %v4757_v27 }
  0x29   :  { %292 = vmatpush.msra.mxu2 %v4636_v59  ;;  %352 = vmatpush.msra.mxu3 %v4619_v48 }
  0x2a   :  { %107 = vmatpush.msra.mxu0 %v4633_v58  ;;  %200 = vmatpush.msra.mxu1 %v199_v49  ;;  %v228_v49 = vsub.f32 %v4679_v41, %v7563_v7  ;;  %v223_v7 = vand.u32 4294901760, %v222_v12  ;;  %v240_v60 = vsub.f32 %v4707_v62, %v7571_v50 }
  0x2b   :  { %295 = vmatpush.msra.mxu2 %v4641_v61  ;;  %354 = vmatpush.msra.mxu3 %v4633_v58 }
  0x2c   :  { %109 = vmatpush.msra.mxu0 %v4647_v0  ;;  %206 = vmatpush.msra.mxu1 %v205_v63  ;;  %v4743_v63 = vand.u32 4294901760, %v4716_v32  ;;  %v229_v12 = vand.u32 4294901760, %v228_v49  ;;  %v235_v49 = vand.u32 4294901760, %v234_v45  ;;  %v241_v45 = vand.u32 4294901760, %v240_v60 }
  0x2d   :  { %298 = vmatpush.msra.mxu2 %v4662_v26  ;;  %356 = vmatpush.msra.mxu3 %v4647_v0  ;;  %v7579_v0 = vand.u32 4294901760, %v4767_v23 }
  0x2e   :  { %7754 = vst [vmem:[#allocation19_spill] sm:$0xff] %v4743_v63  ;;  %111 = vmatpush.msra.mxu0 %v4658_v13  ;;  %212 = vmatpush.msra.mxu1 %v211_v37  ;;  %v4759_v37 = vand.u32 4294901760, %v64_v56  ;;  %v125_v31 = vsub.f32 %v4716_v32, %v4743_v63 }
  0x2f   :  { %301 = vmatpush.msra.mxu2 %v4679_v41  ;;  %358 = vmatpush.msra.mxu3 %v4658_v13  ;;  %v4776_v13 = vand.u32 4294901760, %v544_v24 }
  0x30   :  { %113 = vmatpush.msra.mxu0 %v4676_v39  ;;  %218 = vmatpush.msra.mxu1 %v217_v54  ;;  %v7755_v54 = vand.u32 4294901760, %v4545_v14  ;;  %v7756_v14 = vand.u32 4294901760, %v4548_v15  ;;  %v4796_v42 = vand.u32 4294901760, %v125_v31  ;;  %v7760_v15 = vand.u32 4294901760, %v4750_v33  ;;  %v540_v31 = vld [vmem:[#allocation5 + $0x130] sm:$0xff] }
  0x31   :  { %119 = vmatmul.f32.vlgmr.msra.gmra.mxu0 %v4739_v35  ;;  %304 = vmatpush.msra.mxu2 %v4694_v55  ;;  %v4784_v35 = vsub.f32 %v64_v56, %v4759_v37  ;;  %v7759_v56 = vand.u32 4294901760, %v4552_v16  ;;  %v7761_v16 = vand.u32 4294901760, %v4557_v19  ;;  %v7762_v19 = vand.u32 4294901760, %v4560_v20 }
  0x32   :  { %224 = vmatpush.msra.mxu1 %v223_v7  ;;  %389 = vmatpush.msrb.mxu0 %v7755_v54  ;;  %v542_v7 = vld [vmem:[#allocation5 + $0x140] sm:$0xff]  ;;  %v7757_v54 = vand.u32 4294901760, %v4734_v53  ;;  %7758 = vst [vmem:[#allocation20_spill] sm:$0xff] %v4796_v42  ;;  %v630_v6 = vsub.f32 %v4750_v33, %v7760_v15  ;;  %v7764_v20 = vand.u32 4294901760, %v4563_v21 }
  0x33   :  { %307 = vmatpush.msra.mxu2 %v4707_v62  ;;  %360 = vmatpush.msra.mxu3 %v4676_v39  ;;  %v4792_v39 = vand.u32 4294901760, %v543_v22  ;;  %v4806_v60 = vand.u32 4294901760, %v542_v7 }
  0x34   :  { %230 = vmatpush.msra.mxu1 %v229_v12  ;;  %393 = vmatpush.msrb.mxu0 %v7756_v14  ;;  %v624_v50 = vsub.f32 %v4734_v53, %v7757_v54  ;;  %v4804_v12 = vsub.f32 %v544_v24, %v4776_v13  ;;  %v541_v14 = vld [vmem:[#allocation5 + $0x138] sm:$0xff]  ;;  %v636_v24 = vsub.f32 %v4767_v23, %v7579_v0 }
  0x35   :  { %310 = vmatmul.f32.vlgmr.msra.gmra.mxu2 %v4665_v30  ;;  %364 = vmatmul.f32.vlgmr.msra.gmra.mxu3 %v4684_v44  ;;  %v65_v54 = vld [vmem:[#allocation2 + $0x18] sm:$0xff]  ;;  %v4819_v15 = vsub.f32 %v543_v22, %v4792_v39  ;;  %v4832_v22 = vsub.f32 %v542_v7, %v4806_v60 }
  0x36   :  { %236 = vmatpush.msra.mxu1 %v235_v49  ;;  %397 = vmatpush.msrb.mxu0 %v7759_v56  ;;  %v4811_v49 = vand.u32 4294901760, %v4784_v35  ;;  %v625_v56 = vand.u32 4294901760, %v624_v50  ;;  %v4825_v44 = vand.u32 4294901760, %v65_v54  ;;  %v631_v50 = vand.u32 4294901760, %v630_v6 }
  0x37   :  { %551 = vmatpush.msrb.mxu2 %v4670_v36  ;;  %620 = vmatpush.msrb.mxu3 %v619_v18  ;;  %v4823_v18 = vand.u32 4294901760, %v541_v14  ;;  %v637_v6 = vand.u32 4294901760, %v636_v24  ;;  %v7586_v7 = vand.u32 4294901760, %v4819_v15  ;;  %v7765_v21 = vand.u32 4294901760, %v4804_v12 }
  0x38   :  { %242 = vmatpush.msra.mxu1 %v241_v45  ;;  %401 = vmatpush.msrb.mxu0 %v7761_v16  ;;  %v7763_v16 = vand.u32 4294901760, %v4781_v38  ;;  %v133_v30 = vsub.f32 %v4784_v35, %v4811_v49  ;;  %v538_v45 = vld [vmem:[#allocation5 + $0x120] sm:$0xff] }
  0x39   :  { %553 = vmatpush.msrb.mxu2 %v4709_v8  ;;  %127 = vmatmul.f32.gmra.mxu0 %v4796_v42  ;;  %v539_v42 = vld [vmem:[#allocation5 + $0x128] sm:$0xff]  ;;  %v4873_v24 = vand.u32 4294901760, %v538_v45 }
  0x3a   :  { %244 = vmatmul.f32.vlgmr.msra.gmra.mxu1 %v4650_v2  ;;  %405 = vmatpush.msrb.mxu0 %v7762_v19  ;;  %v642_v0 = vsub.f32 %v4781_v38, %v7763_v16  ;;  %v4844_v19 = vand.u32 4294901760, %v540_v31  ;;  %v4852_v16 = vsub.f32 %v65_v54, %v4825_v44  ;;  %v4864_v54 = vand.u32 4294901760, %v133_v30 }
  0x3b   :  { %468 = vmatpush.msrb.mxu1 %v4531_v3  ;;  %555 = vmatpush.msrb.mxu2 %v4723_v1  ;;  %v4849_v3 = vsub.f32 %v541_v14, %v4823_v18 }
  0x3c   :  { %626 = vmatpush.msrb.mxu3 %v625_v56  ;;  %409 = vmatpush.msrb.mxu0 %v7764_v20  ;;  %v648_v56 = vsub.f32 %v4804_v12, %v7765_v21  ;;  %v4859_v20 = vand.u32 4294901760, %v539_v42  ;;  %v643_v14 = vand.u32 4294901760, %v642_v0  ;;  %v4871_v21 = vsub.f32 %v540_v31, %v4844_v19 }
  0x3d   :  { %470 = vmatpush.msrb.mxu1 %v4533_v4  ;;  %557 = vmatpush.msrb.mxu2 %v4736_v51  ;;  %v7766_v4 = vand.u32 4294901760, %v4577_v29  ;;  %v4879_v29 = vand.u32 4294901760, %v4852_v16  ;;  %v7767_v0 = vand.u32 4294901760, %v4601_v40  ;;  %v7768_v31 = vand.u32 4294901760, %v4832_v22 }
  0x3e   :  { %632 = vmatpush.msrb.mxu3 %v631_v50  ;;  %315 = vmatmul.f32.gmra.mxu2 %v4716_v32  ;;  %v654_v50 = vsub.f32 %v4819_v15, %v7586_v7  ;;  %v537_v32 = vld [vmem:[#allocation5 + $0x118] sm:$0xff]  ;;  %v649_v30 = vand.u32 4294901760, %v648_v56  ;;  %v536_v7 = vld [vmem:[#allocation5 + $0x110] sm:$0xff]  ;;  %v7769_v40 = vand.u32 4294901760, %v4606_v43  ;;  %v534_v56 = vld [vmem:[#allocation5 + $0x100] sm:$0xff] }
  0x3f   :  { %472 = vmatpush.msrb.mxu1 %v4535_v5  ;;  %413 = vmatpush.msrb.mxu0 %v7766_v4  ;;  %v4888_v4 = vsub.f32 %v539_v42, %v4859_v20  ;;  %v4898_v5 = vsub.f32 %v538_v45, %v4873_v24  ;;  %v7770_v42 = vand.u32 4294901760, %v4849_v3  ;;  %v4907_v43 = vand.u32 4294901760, %v536_v7 }
  0x40   :  { %559 = vmatpush.msrb.mxu2 %v4757_v27  ;;  %638 = vmatpush.msrb.mxu3 %v637_v6  ;;  %v660_v6 = vsub.f32 %v4832_v22, %v7768_v31  ;;  %v535_v31 = vld [vmem:[#allocation5 + $0x108] sm:$0xff] }
  0x41   :  { %370 = vmatmul.f32.gmra.mxu3 %v4743_v63  ;;  %474 = vmatpush.msrb.mxu1 %v4537_v9  ;;  %v4891_v9 = vand.u32 4294901760, %v537_v32  ;;  %v141_v63 = vsub.f32 %v4852_v16, %v4879_v29 }
  0x42   :  { %417 = vmatpush.msrb.mxu0 %v7767_v0  ;;  %561 = vmatpush.msrb.mxu2 %v4776_v13  ;;  %v655_v0 = vand.u32 4294901760, %v654_v50  ;;  %v7771_v50 = vand.u32 4294901760, %v4624_v52  ;;  %v661_v45 = vand.u32 4294901760, %v660_v6 }
  0x43   :  { %644 = vmatpush.msrb.mxu3 %v643_v14  ;;  %135 = vmatmul.f32.gmra.mxu0 %v4864_v54  ;;  %v666_v14 = vsub.f32 %v4849_v3, %v7770_v42  ;;  %v4917_v42 = vand.u32 4294901760, %v535_v31 }
  0x44   :  { %248 = vmatmul.f32.gmra.mxu1 %v4686_v47  ;;  %421 = vmatpush.msrb.mxu0 %v7769_v40  ;;  %v4927_v40 = vand.u32 4294901760, %v141_v63  ;;  %v7775_v63 = vand.u32 4294901760, %v4641_v61  ;;  %v7777_v61 = vand.u32 4294901760, %v4662_v26 }
  0x45   :  { %476 = vmatpush.msrb.mxu1 %v4539_v10  ;;  %563 = vmatpush.msrb.mxu2 %v4792_v39  ;;  %v4915_v10 = vsub.f32 %v537_v32, %v4891_v9  ;;  %v4930_v32 = vsub.f32 %v536_v7, %v4907_v43 }
  0x46   :  { %650 = vmatpush.msrb.mxu3 %v649_v30  ;;  %425 = vmatpush.msrb.mxu0 %v7771_v50  ;;  %v7772_v30 = vand.u32 4294901760, %v4871_v21  ;;  %v667_v50 = vand.u32 4294901760, %v666_v14  ;;  %v7776_v14 = vand.u32 4294901760, %v4898_v5 }
  0x47   :  { %478 = vmatpush.msrb.mxu1 %v4541_v11  ;;  %565 = vmatpush.msrb.mxu2 %v4806_v60  ;;  %v7773_v11 = vand.u32 4294901760, %v4636_v59  ;;  %v4942_v59 = vsub.f32 %v535_v31, %v4917_v42 }
  0x48   :  { %656 = vmatpush.msrb.mxu3 %v655_v0  ;;  %320 = vmatmul.f32.gmra.mxu2 %v4784_v35  ;;  %v672_v52 = vsub.f32 %v4871_v21, %v7772_v30  ;;  %v4932_v0 = vand.u32 4294901760, %v534_v56  ;;  %v7774_v30 = vand.u32 4294901760, %v4888_v4 }
  0x49   :  { %480 = vmatpush.msrb.mxu1 %v4554_v17  ;;  %429 = vmatpush.msrb.mxu0 %v7773_v11  ;;  %v689_v17 = vand.u32 4294901760, %v4915_v10 }
  0x4a   :  { %567 = vmatpush.msrb.mxu2 %v4823_v18  ;;  %662 = vmatpush.msrb.mxu3 %v661_v45  ;;  %v678_v6 = vsub.f32 %v4888_v4, %v7774_v30  ;;  %v673_v7 = vand.u32 4294901760, %v672_v52  ;;  %v684_v45 = vsub.f32 %v4898_v5, %v7776_v14  ;;  %v4953_v11 = vsub.f32 %v534_v56, %v4932_v0  ;;  %v7781_v14 = vld [vmem:[#allocation12_spill] sm:$0xff] }
  0x4b   :  { %376 = vmatmul.f32.gmra.mxu3 %v4811_v49  ;;  %482 = vmatpush.msrb.mxu1 %v4570_v25  ;;  %v695_v25 = vand.u32 4294901760, %v4930_v32  ;;  %v690_v52 = vsub.f32 %v4915_v10, %v689_v17  ;;  %v7778_v56 = vand.u32 4294901760, %v4679_v41 }
  0x4c   :  { %433 = vmatpush.msrb.mxu0 %v7775_v63  ;;  %569 = vmatpush.msrb.mxu2 %v4844_v19  ;;  %v679_v31 = vand.u32 4294901760, %v678_v6  ;;  %v685_v30 = vand.u32 4294901760, %v684_v45  ;;  %v707_v26 = vand.u32 4294901760, %v4953_v11  ;;  %v7779_v6 = vand.u32 4294901760, %v4694_v55  ;;  %v7783_v45 = vld [vmem:[#allocation18_spill] sm:$0xff] }
  0x4d   :  { %668 = vmatpush.msrb.mxu3 %v667_v50  ;;  %143 = vmatmul.f32.gmra.mxu0 %v4927_v40  ;;  %v701_v50 = vand.u32 4294901760, %v4942_v59  ;;  %v691_v41 = vand.u32 4294901760, %v690_v52  ;;  %v7780_v55 = vand.u32 4294901760, %v4707_v62  ;;  %v7782_v62 = vld [vmem:[#allocation13_spill] sm:$0xff]  ;;  %v7789_v52 = vld [vmem:[#allocation20_spill] sm:$0xff] }
  0x4e   :  { %252 = vmatmul.f32.gmra.mxu1 %v4759_v37  ;;  %437 = vmatpush.msrb.mxu0 %v7777_v61  ;;  %v7785_v61 = vld [vmem:[#allocation15_spill] sm:$0xff] }
  0x4f   :  { %484 = vmatpush.msrb.mxu1 %v4574_v28  ;;  %571 = vmatpush.msrb.mxu2 %v4859_v20  ;;  %v696_v28 = vsub.f32 %v4930_v32, %v695_v25 }
  0x50   :  { %674 = vmatpush.msrb.mxu3 %v673_v7  ;;  %441 = vmatpush.msrb.mxu0 %v7778_v56  ;;  %v526_v56 = vld [vmem:[#allocation5 + $0xc8] sm:$0xff] }
  0x51   :  { %486 = vmatpush.msrb.mxu1 %v4592_v34  ;;  %573 = vmatpush.msrb.mxu2 %v4873_v24  ;;  %v702_v34 = vsub.f32 %v4942_v59, %v701_v50  ;;  %v697_v63 = vand.u32 4294901760, %v696_v28 }
  0x52   :  { %680 = vmatpush.msrb.mxu3 %v679_v31  ;;  %325 = vmatmul.f32.gmra.mxu2 %v4852_v16  ;;  %v7786_v31 = vand.u32 4294901760, %v4734_v53 }
  0x53   :  { %488 = vmatpush.msrb.mxu1 %v4612_v46  ;;  %445 = vmatpush.msrb.mxu0 %v7779_v6  ;;  %v708_v46 = vsub.f32 %v4953_v11, %v707_v26  ;;  %v703_v7 = vand.u32 4294901760, %v702_v34 }
  0x54   :  { %575 = vmatpush.msrb.mxu2 %v4891_v9  ;;  %686 = vmatpush.msrb.mxu3 %v685_v30  ;;  %v525_v30 = vld [vmem:[#allocation5 + $0xc0] sm:$0xff] }
  0x55   :  { %382 = vmatmul.f32.gmra.mxu3 %v4879_v29  ;;  %490 = vmatpush.msrb.mxu1 %v4619_v48  ;;  %v709_v48 = vand.u32 4294901760, %v708_v46 }
  0x56   :  { %449 = vmatpush.msrb.mxu0 %v7780_v55  ;;  %577 = vmatpush.msrb.mxu2 %v4907_v43 }
  0x57   :  { %692 = vmatpush.msrb.mxu3 %v691_v41  ;;  %256 = vmatmul.f32.gmra.mxu1 %v4825_v44  ;;  %v5140_v41 = vand.u32 4294901760, %v525_v30 }
  0x58   :  { %451 = vmatmul.f32.vlgmr.msrb.gmra.mxu0 %v4650_v2  ;;  %492 = vmatpush.msrb.mxu1 %v4633_v58  ;;  %v7784_v58 = vand.u32 4294901760, %v4702_v57 }
  0x59   :  { %579 = vmatpush.msrb.mxu2 %v4917_v42  ;;  %698 = vmatpush.msrb.mxu3 %v697_v63  ;;  %v524_v63 = vld [vmem:[#allocation5 + $0xb8] sm:$0xff] }
  0x5a   :  { %730 = vmatpush.msra.mxu0 %v4702_v57  ;;  %494 = vmatpush.msrb.mxu1 %v7781_v14  ;;  %v7787_v57 = vand.u32 4294901760, %v4750_v33  ;;  %v7800_v14 = vld [vmem:[#allocation16_spill] sm:$0xff] }
  0x5b   :  { %581 = vmatpush.msrb.mxu2 %v4932_v0  ;;  %704 = vmatpush.msrb.mxu3 %v703_v7 }
  0x5c   :  { %733 = vmatpush.msra.mxu0 %v4734_v53  ;;  %496 = vmatpush.msrb.mxu1 %v7782_v62  ;;  %v7788_v53 = vand.u32 4294901760, %v4767_v23  ;;  %v523_v62 = vld [vmem:[#allocation5 + $0xb0] sm:$0xff] }
  0x5d   :  { %587 = vmatmul.f32.vlgmr.msrb.gmra.mxu2 %v7783_v45  ;;  %710 = vmatpush.msrb.mxu3 %v709_v48 }
  0x5e   :  { %736 = vmatpush.msra.mxu0 %v4750_v33  ;;  %857 = vmatpush.msra.mxu2 %v7784_v58  ;;  %v7790_v33 = vand.u32 4294901760, %v4781_v38 }
  0x5f   :  { %498 = vmatpush.msrb.mxu1 %v7785_v61  ;;  %712 = vmatmul.f32.vlgmr.msrb.gmra.mxu3 %v4650_v2  ;;  %v5159_v61 = vand.u32 4294901760, %v524_v63 }
  0x60   :  { %739 = vmatpush.msra.mxu0 %v4767_v23  ;;  %861 = vmatpush.msra.mxu2 %v7786_v31  ;;  %v7791_v23 = vand.u32 4294901760, %v4804_v12 }
  0x61   :  { %936 = vmatpush.msra.mxu3 %v4670_v36  ;;  %455 = vmatmul.f32.gmra.mxu0 %v4686_v47 }
  0x62   :  { %500 = vmatmul.f32.vlgmr.msrb.gmra.mxu1 %v4650_v2  ;;  %742 = vmatpush.msra.mxu0 %v4781_v38 }
  0x63   :  { %798 = vmatpush.msra.mxu1 %v4670_v36  ;;  %865 = vmatpush.msra.mxu2 %v7787_v57  ;;  %v532_v36 = vld [vmem:[#allocation5 + $0xf8] sm:$0xff]  ;;  %v5163_v57 = vsub.f32 %v525_v30, %v5140_v41 }
  0x64   :  { %938 = vmatpush.msra.mxu3 %v4709_v8  ;;  %745 = vmatpush.msra.mxu0 %v4804_v12  ;;  %v5061_v38 = vand.u32 4294901760, %v532_v36  ;;  %v530_v12 = vld [vmem:[#allocation5 + $0xe8] sm:$0xff] }
  0x65   :  { %800 = vmatpush.msra.mxu1 %v4709_v8  ;;  %869 = vmatpush.msra.mxu2 %v7788_v53  ;;  %v7796_v8 = vand.u32 4294901760, %v4888_v4  ;;  %v522_v53 = vld [vmem:[#allocation5 + $0xa8] sm:$0xff] }
  0x66   :  { %940 = vmatpush.msra.mxu3 %v4723_v1  ;;  %595 = vmatmul.f32.gmra.mxu2 %v7789_v52 }
  0x67   :  { %802 = vmatpush.msra.mxu1 %v4723_v1  ;;  %748 = vmatpush.msra.mxu0 %v4819_v15  ;;  %v7792_v1 = vand.u32 4294901760, %v4819_v15 }
  0x68   :  { %873 = vmatpush.msra.mxu2 %v7790_v33  ;;  %942 = vmatpush.msra.mxu3 %v4736_v51 }
  0x69   :  { %716 = vmatmul.f32.gmra.mxu3 %v4686_v47  ;;  %804 = vmatpush.msra.mxu1 %v4736_v51  ;;  %v7793_v51 = vand.u32 4294901760, %v4832_v22 }
  0x6a   :  { %751 = vmatpush.msra.mxu0 %v4832_v22  ;;  %877 = vmatpush.msra.mxu2 %v7791_v23  ;;  %v5074_v22 = vand.u32 4294901760, %v530_v12 }
  0x6b   :  { %944 = vmatpush.msra.mxu3 %v4757_v27  ;;  %459 = vmatmul.f32.gmra.mxu0 %v4759_v37 }
  0x6c   :  { %504 = vmatmul.f32.gmra.mxu1 %v4686_v47  ;;  %754 = vmatpush.msra.mxu0 %v4849_v3 }
  0x6d   :  { %806 = vmatpush.msra.mxu1 %v4757_v27  ;;  %881 = vmatpush.msra.mxu2 %v7792_v1  ;;  %v7794_v27 = vand.u32 4294901760, %v4849_v3  ;;  %v5077_v3 = vsub.f32 %v532_v36, %v5061_v38  ;;  %v5171_v1 = vand.u32 4294901760, %v523_v62  ;;  %v5180_v36 = vand.u32 4294901760, %v522_v53 }
  0x6e   :  { %946 = vmatpush.msra.mxu3 %v4776_v13  ;;  %757 = vmatpush.msra.mxu0 %v4871_v21 }
  0x6f   :  { %808 = vmatpush.msra.mxu1 %v4776_v13  ;;  %885 = vmatpush.msra.mxu2 %v7793_v51  ;;  %v7795_v13 = vand.u32 4294901760, %v4871_v21  ;;  %v528_v21 = vld [vmem:[#allocation5 + $0xd8] sm:$0xff] }
  0x70   :  { %948 = vmatpush.msra.mxu3 %v4792_v39  ;;  %603 = vmatmul.f32.gmra.mxu2 %v4864_v54 }
  0x71   :  { %810 = vmatpush.msra.mxu1 %v4792_v39  ;;  %760 = vmatpush.msra.mxu0 %v4888_v4  ;;  %v531_v39 = vld [vmem:[#allocation5 + $0xf0] sm:$0xff]  ;;  %v5096_v4 = vsub.f32 %v530_v12, %v5074_v22 }
  0x72   :  { %889 = vmatpush.msra.mxu2 %v7794_v27  ;;  %950 = vmatpush.msra.mxu3 %v4806_v60  ;;  %v5068_v15 = vand.u32 4294901760, %v531_v39  ;;  %v521_v27 = vld [vmem:[#allocation5 + $0xa0] sm:$0xff] }
  0x73   :  { %720 = vmatmul.f32.gmra.mxu3 %v4759_v37  ;;  %812 = vmatpush.msra.mxu1 %v4806_v60  ;;  %v7797_v60 = vand.u32 4294901760, %v4898_v5 }
  0x74   :  { %763 = vmatpush.msra.mxu0 %v4898_v5  ;;  %893 = vmatpush.msra.mxu2 %v7795_v13  ;;  %v1156_v5 = vand.u32 4294901760, %v5077_v3 }
  0x75   :  { %952 = vmatpush.msra.mxu3 %v4823_v18  ;;  %463 = vmatmul.f32.gmra.mxu0 %v4825_v44 }
  0x76   :  { %508 = vmatmul.f32.gmra.mxu1 %v4759_v37  ;;  %766 = vmatpush.msra.mxu0 %v4915_v10  ;;  %v527_v10 = vld [vmem:[#allocation5 + $0xd0] sm:$0xff] }
  0x77   :  { %814 = vmatpush.msra.mxu1 %v4823_v18  ;;  %897 = vmatpush.msra.mxu2 %v7796_v8  ;;  %v529_v18 = vld [vmem:[#allocation5 + $0xe0] sm:$0xff]  ;;  %v7590_v8 = vand.u32 4294901760, %v5163_v57 }
  0x78   :  { %954 = vmatpush.msra.mxu3 %v4844_v19  ;;  %769 = vmatpush.msra.mxu0 %v4930_v32  ;;  %v5103_v32 = vand.u32 4294901760, %v528_v21 }
  0x79   :  { %816 = vmatpush.msra.mxu1 %v4844_v19  ;;  %901 = vmatpush.msra.mxu2 %v7797_v60  ;;  %v5084_v19 = vand.u32 4294901760, %v529_v18 }
  0x7a   :  { %956 = vmatpush.msra.mxu3 %v4859_v20  ;;  %611 = vmatmul.f32.gmra.mxu2 %v4927_v40  ;;  %v5130_v28 = vsub.f32 %v528_v21, %v5103_v32  ;;  %v5195_v21 = vsub.f32 %v523_v62, %v5171_v1 }
  0x7b   :  { %818 = vmatpush.msra.mxu1 %v4859_v20  ;;  %772 = vmatpush.msra.mxu0 %v4942_v59  ;;  %v5087_v20 = vsub.f32 %v531_v39, %v5068_v15  ;;  %v5117_v59 = vand.u32 4294901760, %v527_v10  ;;  %v5183_v39 = vsub.f32 %v524_v63, %v5159_v61 }
  0x7c   :  { %905 = vmatpush.msra.mxu2 %v689_v17  ;;  %958 = vmatpush.msra.mxu3 %v4873_v24  ;;  %v1180_v7 = vand.u32 4294901760, %v5130_v28 }
  0x7d   :  { %724 = vmatmul.f32.gmra.mxu3 %v4825_v44  ;;  %820 = vmatpush.msra.mxu1 %v4873_v24  ;;  %v7798_v24 = vld [vmem:[#allocation14_spill] sm:$0xff]  ;;  %v1162_v17 = vand.u32 4294901760, %v5087_v20  ;;  %v5143_v34 = vsub.f32 %v527_v10, %v5117_v59  ;;  %v520_v10 = vld [vmem:[#allocation5 + $0x98] sm:$0xff]  ;;  %v7589_v30 = vand.u32 4294901760, %v5183_v39 }
  0x7e   :  { %775 = vmatpush.msra.mxu0 %v4953_v11  ;;  %909 = vmatpush.msra.mxu2 %v695_v25  ;;  %v5107_v25 = vsub.f32 %v529_v18, %v5084_v19  ;;  %v5127_v11 = vand.u32 4294901760, %v526_v56  ;;  %v1181_v23 = vsub.f32 %v5130_v28, %v1180_v7  ;;  %v5192_v18 = vand.u32 4294901760, %v521_v27 }
  0x7f   :  { %960 = vmatpush.msra.mxu3 %v4891_v9  ;;  %512 = vmatmul.f32.gmra.mxu1 %v4825_v44  ;;  %v7595_v31 = vand.u32 4294901760, %v5143_v34  ;;  %v5210_v63 = vand.u32 4294901760, %v520_v10 }
  0x80   :  { %778 = vmatmul.f32.vlgmr.msra.gmra.mxu0 %v7798_v24  ;;  %822 = vmatpush.msra.mxu1 %v4891_v9  ;;  %v1157_v9 = vsub.f32 %v5077_v3, %v1156_v5  ;;  %v5154_v48 = vsub.f32 %v526_v56, %v5127_v11  ;;  %v1182_v12 = vand.u32 4294901760, %v1181_v23  ;;  %v5215_v62 = vsub.f32 %v521_v27, %v5192_v18 }
  0x81   :  { %913 = vmatpush.msra.mxu2 %v701_v50  ;;  %962 = vmatpush.msra.mxu3 %v4907_v43  ;;  %v1168_v50 = vand.u32 4294901760, %v5096_v4  ;;  %v1187_v13 = vsub.f32 %v5143_v34, %v7595_v31  ;;  %v1205_v23 = vsub.f32 %v5183_v39, %v7589_v30 }
  0x82   :  { %1090 = vmatpush.msrb.mxu0 %v5061_v38  ;;  %824 = vmatpush.msra.mxu1 %v4907_v43  ;;  %v1163_v43 = vsub.f32 %v5087_v20, %v1162_v17  ;;  %v7592_v51 = vand.u32 4294901760, %v5154_v48 }
  0x83   :  { %917 = vmatpush.msra.mxu2 %v707_v26  ;;  %964 = vmatpush.msra.mxu3 %v4917_v42  ;;  %v1174_v26 = vand.u32 4294901760, %v5107_v25  ;;  %v1169_v6 = vsub.f32 %v5096_v4, %v1168_v50  ;;  %v1188_v56 = vand.u32 4294901760, %v1187_v13 }
  0x84   :  { %1092 = vmatpush.msrb.mxu0 %v5068_v15  ;;  %826 = vmatpush.msra.mxu1 %v4917_v42  ;;  %v1158_v42 = vand.u32 4294901760, %v1157_v9  ;;  %v1164_v46 = vand.u32 4294901760, %v1163_v43  ;;  %v1193_v60 = vsub.f32 %v5154_v48, %v7592_v51  ;;  %v1199_v9 = vsub.f32 %v5163_v57, %v7590_v8 }
  0x85   :  { %919 = vmatmul.f32.vlgmr.msra.gmra.mxu2 %v4650_v2  ;;  %966 = vmatpush.msra.mxu3 %v4932_v0  ;;  %v1175_v55 = vsub.f32 %v5107_v25, %v1174_v26  ;;  %v1170_v58 = vand.u32 4294901760, %v1169_v6  ;;  %v5206_v43 = vsub.f32 %v522_v53, %v5180_v36  ;;  %v7801_v6 = vld [vmem:[#allocation19_spill] sm:$0xff] }
  0x86   :  { %1094 = vmatpush.msrb.mxu0 %v5074_v22  ;;  %1269 = vmatpush.msrb.mxu2 %v5077_v3  ;;  %v7802_v3 = vand.u32 4294901760, %v5143_v34 }
  0x87   :  { %828 = vmatpush.msra.mxu1 %v4932_v0  ;;  %968 = vmatmul.f32.vlgmr.msra.gmra.mxu3 %v4650_v2  ;;  %v7799_v0 = vld [vmem:[#allocation17_spill] sm:$0xff]  ;;  %v1176_v33 = vand.u32 4294901760, %v1175_v55  ;;  %v7591_v55 = vand.u32 4294901760, %v5195_v21  ;;  %v7593_v13 = vand.u32 4294901760, %v5206_v43 }
  0x88   :  { %1096 = vmatpush.msrb.mxu0 %v5084_v19  ;;  %1272 = vmatpush.msrb.mxu2 %v5087_v20  ;;  %v7803_v20 = vand.u32 4294901760, %v5154_v48 }
  0x89   :  { %1337 = vmatpush.msrb.mxu3 %v5061_v38  ;;  %783 = vmatmul.f32.gmra.mxu0 %v7799_v0 }
  0x8a   :  { %832 = vmatmul.f32.vlgmr.msra.gmra.mxu1 %v7800_v14  ;;  %1098 = vmatpush.msrb.mxu0 %v5103_v32 }
  0x8b   :  { %1159 = vmatpush.msrb.mxu1 %v1158_v42  ;;  %1275 = vmatpush.msrb.mxu2 %v5096_v4  ;;  %v519_v42 = vld [vmem:[#allocation5 + $0x90] sm:$0xff] }
  0x8c   :  { %1339 = vmatpush.msrb.mxu3 %v5068_v15  ;;  %1100 = vmatpush.msrb.mxu0 %v5117_v59  ;;  %v5219_v53 = vand.u32 4294901760, %v519_v42 }
  0x8d   :  { %1165 = vmatpush.msrb.mxu1 %v1164_v46  ;;  %1278 = vmatpush.msrb.mxu2 %v5107_v25  ;;  %v1194_v46 = vand.u32 4294901760, %v1193_v60  ;;  %v5231_v60 = vsub.f32 %v520_v10, %v5210_v63  ;;  %v1206_v10 = vand.u32 4294901760, %v1205_v23 }
  0x8e   :  { %1341 = vmatpush.msrb.mxu3 %v5074_v22  ;;  %923 = vmatmul.f32.gmra.mxu2 %v4686_v47  ;;  %v5243_v8 = vsub.f32 %v519_v42, %v5219_v53 }
  0x8f   :  { %1171 = vmatpush.msrb.mxu1 %v1170_v58  ;;  %1102 = vmatpush.msrb.mxu0 %v5127_v11  ;;  %v518_v58 = vld [vmem:[#allocation5 + $0x88] sm:$0xff] }
  0x90   :  { %1281 = vmatpush.msrb.mxu2 %v5130_v28  ;;  %1343 = vmatpush.msrb.mxu3 %v5084_v19  ;;  %v5228_v27 = vand.u32 4294901760, %v518_v58  ;;  %v1234_v23 = vand.u32 4294901760, %v5243_v8 }
  0x91   :  { %972 = vmatmul.f32.gmra.mxu3 %v4686_v47  ;;  %1177 = vmatpush.msrb.mxu1 %v1176_v33  ;;  %v1200_v33 = vand.u32 4294901760, %v1199_v9  ;;  %v7594_v9 = vand.u32 4294901760, %v5215_v62 }
  0x92   :  { %1104 = vmatpush.msrb.mxu0 %v5140_v41  ;;  %1284 = vmatpush.msrb.mxu2 %v5143_v34  ;;  %v5253_v51 = vsub.f32 %v518_v58, %v5228_v27 }
  0x93   :  { %1345 = vmatpush.msrb.mxu3 %v5103_v32  ;;  %788 = vmatmul.f32.gmra.mxu0 %v4784_v35 }
  0x94   :  { %838 = vmatmul.f32.gmra.mxu1 %v7801_v6  ;;  %1106 = vmatpush.msrb.mxu0 %v5159_v61 }
  0x95   :  { %1183 = vmatpush.msrb.mxu1 %v1182_v12  ;;  %1287 = vmatpush.msrb.mxu2 %v5154_v48  ;;  %v517_v12 = vld [vmem:[#allocation5 + $0x80] sm:$0xff] }
  0x96   :  { %1347 = vmatpush.msrb.mxu3 %v5117_v59  ;;  %1108 = vmatpush.msrb.mxu0 %v5171_v1  ;;  %v5240_v30 = vand.u32 4294901760, %v517_v12 }
  0x97   :  { %1189 = vmatpush.msrb.mxu1 %v1188_v56  ;;  %1290 = vmatpush.msrb.mxu2 %v5163_v57  ;;  %v1211_v56 = vsub.f32 %v5195_v21, %v7591_v55  ;;  %v1228_v55 = vand.u32 4294901760, %v5231_v60 }
  0x98   :  { %1349 = vmatpush.msrb.mxu3 %v5127_v11  ;;  %927 = vmatmul.f32.gmra.mxu2 %v4759_v37 }
  0x99   :  { %1195 = vmatpush.msrb.mxu1 %v1194_v46  ;;  %1110 = vmatpush.msrb.mxu0 %v5180_v36  ;;  %v1217_v46 = vsub.f32 %v5206_v43, %v7593_v13  ;;  %v1212_v42 = vand.u32 4294901760, %v1211_v56  ;;  %v5264_v13 = vsub.f32 %v517_v12, %v5240_v30  ;;  %v1229_v56 = vsub.f32 %v5231_v60, %v1228_v55 }
  0x9a   :  { %1293 = vmatpush.msrb.mxu2 %v5183_v39  ;;  %1351 = vmatpush.msrb.mxu3 %v5140_v41  ;;  %v1235_v12 = vsub.f32 %v5243_v8, %v1234_v23 }
  0x9b   :  { %976 = vmatmul.f32.gmra.mxu3 %v4759_v37  ;;  %1201 = vmatpush.msrb.mxu1 %v1200_v33  ;;  %v1223_v33 = vsub.f32 %v5215_v62, %v7594_v9  ;;  %v1218_v58 = vand.u32 4294901760, %v1217_v46  ;;  %v1240_v9 = vand.u32 4294901760, %v5253_v51  ;;  %v1230_v46 = vand.u32 4294901760, %v1229_v56 }
  0x9c   :  { %1112 = vmatpush.msrb.mxu0 %v5192_v18  ;;  %1296 = vmatpush.msrb.mxu2 %v5195_v21 }
  0x9d   :  { %1353 = vmatpush.msrb.mxu3 %v5159_v61  ;;  %793 = vmatmul.f32.gmra.mxu0 %v4852_v16  ;;  %v1224_v31 = vand.u32 4294901760, %v1223_v33  ;;  %v1236_v33 = vand.u32 4294901760, %v1235_v12 }
  0x9e   :  { %844 = vmatmul.f32.gmra.mxu1 %v4811_v49  ;;  %1114 = vmatpush.msrb.mxu0 %v5210_v63 }
  0x9f   :  { %1207 = vmatpush.msrb.mxu1 %v1206_v10  ;;  %1299 = vmatpush.msrb.mxu2 %v5206_v43  ;;  %v1246_v10 = vand.u32 4294901760, %v5264_v13 }
  0xa0   :  { %1355 = vmatpush.msrb.mxu3 %v5171_v1  ;;  %1116 = vmatpush.msrb.mxu0 %v5219_v53 }
  0xa1   :  { %1213 = vmatpush.msrb.mxu1 %v1212_v42  ;;  %1302 = vmatpush.msrb.mxu2 %v5215_v62  ;;  %v1241_v42 = vsub.f32 %v5253_v51, %v1240_v9 }
  0xa2   :  { %1357 = vmatpush.msrb.mxu3 %v5180_v36  ;;  %931 = vmatmul.f32.gmra.mxu2 %v4825_v44 }
  0xa3   :  { %1219 = vmatpush.msrb.mxu1 %v1218_v58  ;;  %1118 = vmatpush.msrb.mxu0 %v5228_v27  ;;  %v1247_v58 = vsub.f32 %v5264_v13, %v1246_v10  ;;  %v1242_v56 = vand.u32 4294901760, %v1241_v42 }
  0xa4   :  { %1305 = vmatpush.msrb.mxu2 %v5231_v60  ;;  %1359 = vmatpush.msrb.mxu3 %v5192_v18  ;;  %v1551_v60 = vld [vmem:[#allocation7 + $0xc0] sm:$0xff] }
  0xa5   :  { %980 = vmatmul.f32.gmra.mxu3 %v4825_v44  ;;  %1225 = vmatpush.msrb.mxu1 %v1224_v31  ;;  %v1248_v31 = vand.u32 4294901760, %v1247_v58 }
  0xa6   :  { %1120 = vmatpush.msrb.mxu0 %v5240_v30  ;;  %1308 = vmatpush.msrb.mxu2 %v5243_v8  ;;  %v1557_v8 = vld [vmem:[#allocation7 + $0xf0] sm:$0xff] }
  0xa7   :  { %1361 = vmatpush.msrb.mxu3 %v5210_v63  ;;  %850 = vmatmul.f32.gmra.mxu1 %v4879_v29 }
  0xa8   :  { %1126 = vmatmul.f32.vlgmr.msrb.gmra.mxu0 %v7783_v45  ;;  %1231 = vmatpush.msrb.mxu1 %v1230_v46  ;;  %v1549_v46 = vld [vmem:[#allocation7 + $0xb0] sm:$0xff] }
  0xa9   :  { %1311 = vmatpush.msrb.mxu2 %v5253_v51  ;;  %1363 = vmatpush.msrb.mxu3 %v5219_v53 }
  0xaa   :  { %1396 = vmatpush.msra.mxu0 %v1156_v5  ;;  %1237 = vmatpush.msrb.mxu1 %v1236_v33  ;;  %v7807_v5 = vand.u32 4294901760, %v5206_v43 }
  0xab   :  { %1314 = vmatpush.msrb.mxu2 %v5264_v13  ;;  %1365 = vmatpush.msrb.mxu3 %v5228_v27 }
  0xac   :  { %1400 = vmatpush.msra.mxu0 %v1162_v17  ;;  %1243 = vmatpush.msrb.mxu1 %v1242_v56 }
  0xad   :  { %1317 = vmatmul.f32.vlgmr.msrb.gmra.mxu2 %v7798_v24  ;;  %1367 = vmatpush.msrb.mxu3 %v5240_v30 }
  0xae   :  { %1404 = vmatpush.msra.mxu0 %v1168_v50  ;;  %1249 = vmatpush.msrb.mxu1 %v1248_v31  ;;  %v5307_v45 = vpop.f32.mrf.mxu0 }
  0xaf   :  { %1371 = vmatmul.f32.vlgmr.msrb.gmra.mxu3 %v7800_v14  ;;  %1251 = vmatmul.f32.vlgmr.msrb.gmra.mxu1 %v4650_v2 }
  0xb0   :  { %1408 = vmatpush.msra.mxu0 %v1174_v26  ;;  %1475 = vmatpush.msra.mxu1 %v5061_v38 }
  0xb1   :  { %1134 = vmatmul.f32.gmra.mxu0 %v7789_v52 }
  0xb2   :  { %1412 = vmatpush.msra.mxu0 %v1180_v7  ;;  %1477 = vmatpush.msra.mxu1 %v5068_v15  ;;  %v7804_v15 = vand.u32 4294901760, %v5163_v57 }
  0xb4   :  { %1416 = vmatpush.msra.mxu0 %v7802_v3  ;;  %1479 = vmatpush.msra.mxu1 %v5074_v22  ;;  %v7805_v22 = vand.u32 4294901760, %v5183_v39  ;;  %v5485_v3 = vand.u32 4294901760, %v1549_v46 }
  0xb5   :  { %1322 = vmatmul.f32.gmra.mxu2 %v7799_v0 }
  0xb6   :  { %1420 = vmatpush.msra.mxu0 %v7803_v20  ;;  %1481 = vmatpush.msra.mxu1 %v5084_v19  ;;  %v5327_v52 = vpop.f32.mrf.mxu0  ;;  %v7806_v19 = vand.u32 4294901760, %v5195_v21  ;;  %v1555_v21 = vld [vmem:[#allocation7 + $0xe0] sm:$0xff]  ;;  %7812 = vst [vmem:[#allocation15_spill] sm:$0xff] %v5485_v3 }
  0xb7   :  { %1377 = vmatmul.f32.gmra.mxu3 %v7801_v6  ;;  %1255 = vmatmul.f32.gmra.mxu1 %v4686_v47  ;;  %v5329_v38 = vpop.f32.mrf.mxu1  ;;  %v5446_v6 = vand.u32 4294901760, %v1555_v21  ;;  %v1547_v20 = vld [vmem:[#allocation7 + $0xa0] sm:$0xff] }
  0xb8   :  { %1424 = vmatpush.msra.mxu0 %v7804_v15  ;;  %1483 = vmatpush.msra.mxu1 %v5103_v32 }
  0xb9   :  { %1142 = vmatmul.f32.gmra.mxu0 %v4864_v54  ;;  %v7808_v54 = vand.u32 4294901760, %v5215_v62  ;;  %v5452_v62 = vsub.f32 %v1555_v21, %v5446_v6 }
  0xba   :  { %1428 = vmatpush.msra.mxu0 %v7805_v22  ;;  %1485 = vmatpush.msra.mxu1 %v5117_v59 }
  0xbc   :  { %1432 = vmatpush.msra.mxu0 %v7806_v19  ;;  %1487 = vmatpush.msra.mxu1 %v5127_v11  ;;  %v5492_v19 = vand.u32 4294901760, %v1547_v20 }
  0xbd   :  { %1327 = vmatmul.f32.gmra.mxu2 %v4784_v35  ;;  %v5361_v35 = vpop.f32.mrf.mxu2 }
  0xbe   :  { %1436 = vmatpush.msra.mxu0 %v7807_v5  ;;  %1489 = vmatpush.msra.mxu1 %v5140_v41  ;;  %7813 = vst [vmem:[#allocation20_spill] sm:$0xff] %v5492_v19 }
  0xbf   :  { %1383 = vmatmul.f32.gmra.mxu3 %v4811_v49  ;;  %1259 = vmatmul.f32.gmra.mxu1 %v4759_v37  ;;  %v5372_v49 = vpop.f32.mrf.mxu3 }
  0xc0   :  { %1440 = vmatpush.msra.mxu0 %v7808_v54  ;;  %1491 = vmatpush.msra.mxu1 %v5159_v61  ;;  %v5351_v4 = vpop.f32.mrf.mxu0  ;;  %v5496_v54 = vsub.f32 %v1549_v46, %v5485_v3 }
  0xc1   :  { %1150 = vmatmul.f32.gmra.mxu0 %v4927_v40  ;;  %v5353_v24 = vpop.f32.mrf.mxu1 }
  0xc2   :  { %1444 = vmatpush.msra.mxu0 %v1228_v55  ;;  %1493 = vmatpush.msra.mxu1 %v5171_v1 }
  0xc4   :  { %1448 = vmatpush.msra.mxu0 %v1234_v23  ;;  %1495 = vmatpush.msra.mxu1 %v5180_v36  ;;  %v7598_v23 = vand.u32 4294901760, %v5452_v62 }
  0xc5   :  { %1332 = vmatmul.f32.gmra.mxu2 %v4852_v16 }
  0xc6   :  { %1452 = vmatpush.msra.mxu0 %v1240_v9  ;;  %1497 = vmatpush.msra.mxu1 %v5192_v18  ;;  %v5439_v18 = vand.u32 4294901760, %v1557_v8  ;;  %v1633_v58 = vsub.f32 %v5452_v62, %v7598_v23 }
  0xc7   :  { %1389 = vmatmul.f32.gmra.mxu3 %v4879_v29  ;;  %1263 = vmatmul.f32.gmra.mxu1 %v4825_v44  ;;  %v5382_v29 = vpop.f32.mrf.mxu2  ;;  %v5386_v32 = vpop.f32.mrf.mxu3 }
  0xc8   :  { %1456 = vmatpush.msra.mxu0 %v1246_v10  ;;  %1499 = vmatpush.msra.mxu1 %v5210_v63  ;;  %v5444_v43 = vsub.f32 %v1557_v8, %v5439_v18  ;;  %v1553_v63 = vld [vmem:[#allocation7 + $0xd0] sm:$0xff]  ;;  %v5472_v10 = vand.u32 4294901760, %v1551_v60  ;;  %v1634_v15 = vand.u32 4294901760, %v1633_v58  ;;  %v1543_v58 = vld [vmem:[#allocation7 + $0x80] sm:$0xff] }
  0xc9   :  { %1458 = vmatmul.f32.vlgmr.msra.gmra.mxu0 %v4650_v2  ;;  %1560 = vmatpush.msra.mxu2 %v5439_v18  ;;  %v1545_v8 = vld [vmem:[#allocation7 + $0x90] sm:$0xff] }
  0xca   :  { %1501 = vmatpush.msra.mxu1 %v5219_v53  ;;  %v5376_v16 = vpop.f32.mrf.mxu0  ;;  %v7599_v55 = vand.u32 4294901760, %v5444_v43  ;;  %1739 = vmatpush.msrb.mxu0 %v5444_v43  ;;  %v5455_v53 = vand.u32 4294901760, %v1553_v63  ;;  %v5483_v31 = vsub.f32 %v1551_v60, %v5472_v10  ;;  %v5503_v60 = vsub.f32 %v1547_v20, %v5492_v19 }
  0xcb   :  { %v5378_v40 = vpop.f32.mrf.mxu1  ;;  %1562 = vmatpush.msra.mxu2 %v5446_v6 }
  0xcc   :  { %1503 = vmatpush.msra.mxu1 %v5228_v27  ;;  %v1627_v9 = vsub.f32 %v5444_v43, %v7599_v55  ;;  %v5468_v12 = vsub.f32 %v1553_v63, %v5455_v53  ;;  %1742 = vmatpush.msrb.mxu0 %v5452_v62  ;;  %v7597_v5 = vand.u32 4294901760, %v5483_v31 }
  0xcd   :  { %1564 = vmatpush.msra.mxu2 %v5455_v53 }
  0xce   :  { %1505 = vmatpush.msra.mxu1 %v5240_v30  ;;  %v1628_v33 = vand.u32 4294901760, %v1627_v9  ;;  %v7596_v56 = vand.u32 4294901760, %v5468_v12  ;;  %1745 = vmatpush.msrb.mxu0 %v5468_v12  ;;  %v5505_v9 = vand.u32 4294901760, %v1545_v8  ;;  %v1645_v46 = vsub.f32 %v5483_v31, %v7597_v5 }
  0xcf   :  { %1507 = vmatmul.f32.vlgmr.msra.gmra.mxu1 %v4650_v2  ;;  %v5393_v59 = vpop.f32.mrf.mxu2  ;;  %v5396_v50 = vpop.f32.mrf.mxu3  ;;  %1566 = vmatpush.msra.mxu2 %v5472_v10 }
  0xd0   :  { %1807 = vmatpush.msrb.mxu1 %v5439_v18  ;;  %1629 = vmatpush.msra.mxu3 %v1628_v33  ;;  %v1639_v22 = vsub.f32 %v5468_v12, %v7596_v56  ;;  %7815 = vst [vmem:[#allocation17_spill] sm:$0xff] %v5505_v9  ;;  %v7600_v33 = vand.u32 4294901760, %v5496_v54  ;;  %v5516_v20 = vsub.f32 %v1545_v8, %v5505_v9  ;;  %v1646_v23 = vand.u32 4294901760, %v1645_v46 }
  0xd1   :  { %1462 = vmatmul.f32.gmra.mxu0 %v4686_v47  ;;  %1568 = vmatpush.msra.mxu2 %v5485_v3 }
  0xd2   :  { %1809 = vmatpush.msrb.mxu1 %v5446_v6  ;;  %1748 = vmatpush.msrb.mxu0 %v5483_v31  ;;  %v1640_v63 = vand.u32 4294901760, %v1639_v22  ;;  %v5518_v22 = vand.u32 4294901760, %v1543_v58  ;;  %v1651_v55 = vsub.f32 %v5496_v54, %v7600_v33 }
  0xd3   :  { %1635 = vmatpush.msra.mxu3 %v1634_v15  ;;  %v7601_v15 = vand.u32 4294901760, %v5503_v60  ;;  %1570 = vmatpush.msra.mxu2 %v5492_v19 }
  0xd4   :  { %v5388_v17 = vpop.f32.mrf.mxu1  ;;  %1811 = vmatpush.msrb.mxu1 %v5455_v53  ;;  %1751 = vmatpush.msrb.mxu0 %v5496_v54  ;;  %7816 = vst [vmem:[#allocation16_spill] sm:$0xff] %v5518_v22  ;;  %v1652_v46 = vand.u32 4294901760, %v1651_v55 }
  0xd5   :  { %v5390_v25 = vpop.f32.mrf.mxu0  ;;  %1641 = vmatpush.msra.mxu3 %v1640_v63  ;;  %v1541_v63 = vld [vmem:[#allocation7 + $0x70] sm:$0xff]  ;;  %v1657_v8 = vsub.f32 %v5503_v60, %v7601_v15  ;;  %1572 = vmatpush.msra.mxu2 %v5505_v9 }
  0xd6   :  { %1813 = vmatpush.msrb.mxu1 %v5472_v10  ;;  %1754 = vmatpush.msrb.mxu0 %v5503_v60  ;;  %v5539_v33 = vand.u32 4294901760, %v1541_v63 }
  0xd7   :  { %1511 = vmatmul.f32.gmra.mxu1 %v4686_v47  ;;  %v5404_v28 = vpop.f32.mrf.mxu2  ;;  %1647 = vmatpush.msra.mxu3 %v1646_v23 }
  0xd8   :  { %v5406_v26 = vpop.f32.mrf.mxu3  ;;  %1815 = vmatpush.msrb.mxu1 %v5485_v3  ;;  %1757 = vmatpush.msrb.mxu0 %v5516_v20  ;;  %7820 = vst [vmem:[#allocation23_spill] sm:$0xff] %v5539_v33  ;;  %v5550_v55 = vsub.f32 %v1541_v63, %v5539_v33 }
  0xd9   :  { %1466 = vmatmul.f32.gmra.mxu0 %v4759_v37  ;;  %1574 = vmatpush.msra.mxu2 %v5518_v22 }
  0xda   :  { %1817 = vmatpush.msrb.mxu1 %v5492_v19  ;;  %1653 = vmatpush.msra.mxu3 %v1652_v46  ;;  %v7611_v63 = vand.u32 4294901760, %v5550_v55 }
  0xdb   :  { %1576 = vmatpush.msra.mxu2 %v5539_v33 }
  0xdc   :  { %1819 = vmatpush.msrb.mxu1 %v5505_v9 }
  0xde   :  { %v5399_v11 = vpop.f32.mrf.mxu0  ;;  %1821 = vmatpush.msrb.mxu1 %v5518_v22 }
  0xdf   :  { %1515 = vmatmul.f32.gmra.mxu1 %v4759_v37  ;;  %v5401_v2 = vpop.f32.mrf.mxu1 }
  0xe0   :  { %v5413_v34 = vpop.f32.mrf.mxu2  ;;  %1823 = vmatpush.msrb.mxu1 %v5539_v33 }
  0xe1   :  { %1470 = vmatmul.f32.gmra.mxu0 %v4825_v44 }
  0xe2   :  { %v5415_v0 = vpop.f32.mrf.mxu3 }
  0xe7   :  { %1519 = vmatmul.f32.gmra.mxu1 %v4825_v44 }
  0xe8   :  { %v5409_v47 = vpop.f32.mrf.mxu0 }
  0xe9   :  { %v5411_v41 = vpop.f32.mrf.mxu1  ;;  %v5421_v48 = vpop.f32.mrf.mxu2 }
  0xec   :  { %v5423_v14 = vpop.f32.mrf.mxu3 }
  0xf2   :  { %v5417_v37 = vpop.f32.mrf.mxu0 }
  0xf3   :  { %v5419_v7 = vpop.f32.mrf.mxu1  ;;  %v5429_v44 = vpop.f32.mrf.mxu2 }
  0xf6   :  { %v5431_v1 = vpop.f32.mrf.mxu3 }
  0xfc   :  { %v5425_v61 = vpop.f32.mrf.mxu1 }
  0xfd   :  { %v5427_v57 = vpop.f32.mrf.mxu0  ;;  %v5437_v39 = vpop.f32.mrf.mxu2 }
  0xfe   :  { %7809 = vst [vmem:[#allocation12_spill] sm:$0xff] %v5437_v39 }
 0x100   :  { %v5441_v30 = vpop.f32.mrf.mxu3 }
 0x101   :  { %7810 = vst [vmem:[#allocation13_spill] sm:$0xff] %v5441_v30  ;;  %v7603_v30 = vand.u32 4294901760, %v5516_v20 }
 0x103   :  { %v1663_v15 = vsub.f32 %v5516_v20, %v7603_v30 }
 0x106   :  { %v5433_v51 = vpop.f32.mrf.mxu0 }
 0x107   :  { %v5435_v36 = vpop.f32.mrf.mxu1 }
 0x108   :  { %v5475_v42 = vpop.f32.mrf.mxu2 }
 0x10a   :  { %v5500_v21 = vpop.f32.mrf.mxu3 }
 0x10b   :  { %7814 = vst [vmem:[#allocation14_spill] sm:$0xff] %v5500_v21 }
 0x110   :  { %v5458_v13 = vpop.f32.mrf.mxu0 }
 0x111   :  { %7811 = vst [vmem:[#allocation18_spill] sm:$0xff] %v5458_v13  ;;  %v5460_v27 = vpop.f32.mrf.mxu1  ;;  %v5541_v39 = vpop.f32.mrf.mxu2  ;;  %v1658_v13 = vand.u32 4294901760, %v1657_v8  ;;  %v1664_v8 = vand.u32 4294901760, %v1663_v15  ;;  %v246_v15 = vadd.f32 %v5329_v38, %v5307_v45  ;;  %v1675_v45 = vsub.f32 %v5550_v55, %v7611_v63 }
 0x113   :  { %1659 = vmatpush.msra.mxu3 %v1658_v13  ;;  %v250_v13 = vadd.f32 %v5353_v24, %v5327_v52  ;;  %v254_v52 = vadd.f32 %v5378_v40, %v5351_v4  ;;  %v258_v24 = vadd.f32 %v5388_v17, %v5376_v16  ;;  %v1676_v63 = vand.u32 4294901760, %v1675_v45 }
 0x114   :  { %v5569_v21 = vpop.f32.mrf.mxu3 }
 0x115   :  { %1665 = vmatpush.msra.mxu3 %v1664_v8  ;;  %v317_v17 = vadd.f32 %v5382_v29, %v250_v13  ;;  %v322_v29 = vadd.f32 %v5393_v59, %v254_v52 }
 0x11a   :  { %v5521_v56 = vpop.f32.mrf.mxu0 }
 0x11b   :  { %7817 = vst [vmem:[#allocation19_spill] sm:$0xff] %v5521_v56  ;;  %v5523_v5 = vpop.f32.mrf.mxu1  ;;  %v5535_v56 = vsub.f32 %v1543_v58, %v5518_v22  ;;  %v1537_v58 = vld [vmem:[#allocation7 + $0x50] sm:$0xff]  ;;  %v1535_v22 = vld [vmem:[#allocation7 + $0x40] sm:$0xff] }
 0x11c   :  { %7818 = vst [vmem:[#allocation21_spill] sm:$0xff] %v5523_v5  ;;  %v1539_v5 = vld [vmem:[#allocation7 + $0x60] sm:$0xff]  ;;  %v5558_v9 = vand.u32 4294901760, %v1537_v58  ;;  %v5574_v3 = vand.u32 4294901760, %v1535_v22 }
 0x11d   :  { %7819 = vst [vmem:[#allocation22_spill] sm:$0xff] %v5535_v56  ;;  %v7606_v19 = vand.u32 4294901760, %v5535_v56  ;;  %1760 = vmatpush.msrb.mxu0 %v5535_v56  ;;  %v5553_v23 = vand.u32 4294901760, %v1539_v5 }
 0x11e   :  { %7822 = vst [vmem:[#allocation25_spill] sm:$0xff] %v5558_v9  ;;  %v5589_v33 = vsub.f32 %v1535_v22, %v5574_v3 }
 0x11f   :  { %7821 = vst [vmem:[#allocation24_spill] sm:$0xff] %v5553_v23  ;;  %v1669_v30 = vsub.f32 %v5535_v56, %v7606_v19  ;;  %v5564_v46 = vsub.f32 %v1539_v5, %v5553_v23  ;;  %1763 = vmatpush.msrb.mxu0 %v5550_v55  ;;  %v5572_v56 = vsub.f32 %v1537_v58, %v5558_v9  ;;  %v1531_v58 = vld [vmem:[#allocation7 + $0x20] sm:$0xff] }
 0x120   :  { %7824 = vst [vmem:[#allocation27_spill] sm:$0xff] %v5574_v3  ;;  %1825 = vmatpush.msrb.mxu1 %v5553_v23  ;;  %1578 = vmatpush.msra.mxu2 %v5553_v23  ;;  %v7616_v40 = vand.u32 4294901760, %v5589_v33 }
 0x121   :  { %v1670_v19 = vand.u32 4294901760, %v1669_v30  ;;  %7823 = vst [vmem:[#allocation26_spill] sm:$0xff] %v5572_v56  ;;  %v7613_v38 = vand.u32 4294901760, %v5564_v46  ;;  %1766 = vmatpush.msrb.mxu0 %v5564_v46  ;;  %v1533_v30 = vld [vmem:[#allocation7 + $0x30] sm:$0xff] }
 0x122   :  { %7826 = vst [vmem:[#allocation29_spill] sm:$0xff] %v5589_v33  ;;  %v5591_v23 = vand.u32 4294901760, %v1533_v30  ;;  %1827 = vmatpush.msrb.mxu1 %v5558_v9  ;;  %1580 = vmatpush.msra.mxu2 %v5558_v9  ;;  %v7828_v9 = vand.u32 4294901760, %v5572_v56 }
 0x123   :  { %1671 = vmatpush.msra.mxu3 %v1670_v19  ;;  %v1681_v22 = vsub.f32 %v5564_v46, %v7613_v38  ;;  %1769 = vmatpush.msrb.mxu0 %v5572_v56  ;;  %v984_v19 = vlaneseq }
 0x124   :  { %v5585_v5 = vpop.f32.mrf.mxu1  ;;  %7827 = vst [vmem:[#allocation30_spill] sm:$0xff] %v5591_v23  ;;  %v1687_v4 = vsub.f32 %v5572_v56, %v7828_v9  ;;  %v5611_v16 = vsub.f32 %v1533_v30, %v5591_v23  ;;  %1829 = vmatpush.msrb.mxu1 %v5574_v3  ;;  %1582 = vmatpush.msra.mxu2 %v5574_v3  ;;  %v5619_v9 = vpop.f32.mrf.mxu2 }
 0x125   :  { %7825 = vst [vmem:[#allocation28_spill] sm:$0xff] %v5585_v5  ;;  %v5599_v8 = vpop.f32.mrf.mxu0  ;;  %v312_v5 = vadd.f32 %v5361_v35, %v246_v15  ;;  %1677 = vmatpush.msra.mxu3 %v1676_v63  ;;  %v1682_v45 = vand.u32 4294901760, %v1681_v22  ;;  %1772 = vmatpush.msrb.mxu0 %v5589_v33  ;;  %v5617_v35 = vand.u32 4294901760, %v1531_v58  ;;  %v1529_v15 = vld [vmem:[#allocation7 + $0x10] sm:$0xff]  ;;  %v1693_v30 = vsub.f32 %v5589_v33, %v7616_v40  ;;  %v1527_v22 = vld [vmem:[#allocation7] sm:$0xff] }
 0x126   :  { %v1688_v38 = vand.u32 4294901760, %v1687_v4  ;;  %v7619_v56 = vand.u32 4294901760, %v5611_v16  ;;  %v5625_v3 = vand.u32 4294901760, %v1529_v15  ;;  %1831 = vmatpush.msrb.mxu1 %v5591_v23  ;;  %1584 = vmatpush.msra.mxu2 %v5591_v23  ;;  %v327_v63 = vadd.f32 %v5404_v28, %v258_v24  ;;  %v5647_v28 = vpop.f32.mrf.mxu3 }
 0x127   :  { %1683 = vmatpush.msra.mxu3 %v1682_v45  ;;  %v5632_v13 = vsub.f32 %v1531_v58, %v5617_v35  ;;  %1775 = vmatpush.msrb.mxu0 %v5611_v16  ;;  %v1694_v4 = vand.u32 4294901760, %v1693_v30  ;;  %v5641_v23 = vand.u32 4294901760, %v1527_v22  ;;  %v5649_v58 = vshrl.u32 %v984_v19, 7 }
 0x128   :  { %7829 = vst [vmem:[#allocation31_spill] sm:$0xff] %v5625_v3  ;;  %v1699_v40 = vsub.f32 %v5611_v16, %v7619_v56  ;;  %v5639_v33 = vsub.f32 %v1529_v15, %v5625_v3  ;;  %1833 = vmatpush.msrb.mxu1 %v5617_v35  ;;  %1586 = vmatpush.msra.mxu2 %v5617_v35 }
 0x129   :  { %1689 = vmatpush.msra.mxu3 %v1688_v38  ;;  %v7631_v59 = vand.u32 4294901760, %v5632_v13  ;;  %1778 = vmatpush.msrb.mxu0 %v5632_v13  ;;  %v5655_v15 = vsub.f32 %v1527_v22, %v5641_v23  ;;  %v366_v38 = vadd.f32 %v5372_v49, %v312_v5  ;;  %v384_v30 = vadd.f32 %v5406_v26, %v327_v63 }
 0x12a   :  { %v1700_v24 = vand.u32 4294901760, %v1699_v40  ;;  %v7621_v45 = vand.u32 4294901760, %v5639_v33  ;;  %1835 = vmatpush.msrb.mxu1 %v5625_v3  ;;  %1588 = vmatpush.msra.mxu2 %v5625_v3  ;;  %v372_v40 = vadd.f32 %v5386_v32, %v317_v17  ;;  %v378_v22 = vadd.f32 %v5396_v50, %v322_v29  ;;  %v1558_v17 = vld [vmem:[#allocation7 + $0xf8] sm:$0xff] }
 0x12b   :  { %1695 = vmatpush.msra.mxu3 %v1694_v4  ;;  %v1705_v19 = vsub.f32 %v5632_v13, %v7631_v59  ;;  %1781 = vmatpush.msrb.mxu0 %v5639_v33  ;;  %v7630_v49 = vand.u32 4294901760, %v5655_v15  ;;  %v453_v26 = vadd.f32 %v5390_v25, %v366_v38  ;;  %v718_v5 = vadd.f32 %v5423_v14, %v5421_v48  ;;  %v7858_v59 = vld [vmem:[#allocation21_spill] sm:$0xff] }
 0x12c   :  { %v5651_v52 = vpop.f32.mrf.mxu1  ;;  %v1711_v3 = vsub.f32 %v5639_v33, %v7621_v45  ;;  %1837 = vmatpush.msrb.mxu1 %v5641_v23  ;;  %1590 = vmatpush.msra.mxu2 %v5641_v23  ;;  %v465_v32 = vadd.f32 %v5417_v37, %v384_v30  ;;  %v5681_v29 = vadd.s32 16, %v5649_v58  ;;  %v5686_v45 = vand.u32 4294901760, %v1558_v17  ;;  %v5699_v38 = vpop.f32.mrf.mxu2 }
 0x12d   :  { %1701 = vmatpush.msra.mxu3 %v1700_v24  ;;  %v1706_v50 = vand.u32 4294901760, %v1705_v19  ;;  %1784 = vmatpush.msrb.mxu0 %v5655_v15  ;;  %v1717_v4 = vsub.f32 %v5655_v15, %v7630_v49  ;;  %v7830_v25 = vand.u32 4294901760, %v5444_v43  ;;  %v457_v37 = vadd.f32 %v5399_v11, %v372_v40  ;;  %v1554_v40 = vld [vmem:[#allocation7 + $0xd8] sm:$0xff] }
 0x12e   :  { %v5667_v56 = vpop.f32.mrf.mxu0  ;;  %v1712_v63 = vand.u32 4294901760, %v1711_v3  ;;  %v714_v48 = vadd.f32 %v5415_v0, %v5413_v34  ;;  %v5694_v14 = vadd.f32 %v5425_v61, %v465_v32  ;;  %v1556_v3 = vld [vmem:[#allocation7 + $0xe8] sm:$0xff]  ;;  %v5697_v24 = vadd.f32 %v5401_v2, %v453_v26 }
 0x12f   :  { %1866 = vmatpush.msrb.mxu2 %v7830_v25  ;;  %1707 = vmatpush.msra.mxu3 %v1706_v50  ;;  %v1718_v30 = vand.u32 4294901760, %v1717_v4  ;;  %v5703_v43 = vsub.f32 %v1558_v17, %v5686_v45  ;;  %v5705_v11 = vand.u32 4294901760, %v1556_v3  ;;  %v7831_v34 = vand.u32 4294901760, %v5452_v62 }
 0x130   :  { %1994 = vmatpush.msra.mxu0 %v5686_v45  ;;  %v461_v0 = vadd.f32 %v5409_v47, %v378_v22  ;;  %v5711_v61 = vadd.f32 %v5411_v41, %v457_v37  ;;  %v785_v2 = vadd.f32 %v5433_v51, %v718_v5  ;;  %v993_v19 = vand.u32 15, %v5649_v58 }
 0x131   :  { %1870 = vmatpush.msrb.mxu2 %v7831_v34  ;;  %1713 = vmatpush.msra.mxu3 %v1712_v63  ;;  %v1007_v26 = vand.u32 15, %v5681_v29  ;;  %v7626_v62 = vand.u32 4294901760, %v5703_v43  ;;  %v5720_v50 = vand.u32 4294901760, %v1554_v40  ;;  %v5723_v47 = vsub.f32 %v1556_v3, %v5705_v11  ;;  %v1552_v29 = vld [vmem:[#allocation7 + $0xc8] sm:$0xff]  ;;  %v5733_v63 = vpop.f32.mrf.mxu3  ;;  %v1550_v3 = vld [vmem:[#allocation7 + $0xb8] sm:$0xff] }
 0x132   :  { %1996 = vmatpush.msra.mxu0 %v5705_v11  ;;  %v7832_v41 = vand.u32 4294901760, %v5468_v12  ;;  %v5728_v51 = vadd.f32 %v5419_v7, %v461_v0  ;;  %v7628_v22 = vrot.slane %v5694_v14, 7  ;;  %v780_v5 = vadd.f32 %v5427_v57, %v714_v48 }
 0x133   :  { %v840_v17 = vadd.f32 %v5460_v27, %v785_v2  ;;  %1719 = vmatpush.msra.mxu3 %v1718_v30  ;;  %v2061_v12 = vsub.f32 %v5703_v43, %v7626_v62  ;;  %v7624_v7 = vand.u32 4294901760, %v5723_v47  ;;  %v5743_v25 = vand.u32 4294901760, %v1552_v29  ;;  %v7848_v62 = vld [vmem:[#allocation20_spill] sm:$0xff] }
 0x134   :  { %v5716_v32 = vpop.f32.mrf.mxu1  ;;  %1874 = vmatpush.msrb.mxu2 %v7832_v41  ;;  %1998 = vmatpush.msra.mxu0 %v5720_v50  ;;  %v5746_v57 = vsub.f32 %v1554_v40, %v5720_v50  ;;  %v1048_v27 = vrot.slane %v5697_v24, 7  ;;  %v1049_v37 = vrot.slane %v5711_v61, 7  ;;  %v834_v48 = vadd.f32 %v5435_v36, %v780_v5 }
 0x135   :  { %1945 = vmatpush.msrb.mxu3 %v5439_v18  ;;  %vm5751_vm1 = vcmp.eq.s32.totalorder %v993_v19, 0  ;;  %v7833_v18 = vmov 0  ;;  %v7836_v30 = vand.u32 4294901760, %v5483_v31  ;;  %v2062_v34 = vand.u32 4294901760, %v2061_v12  ;;  %v1548_v19 = vld [vmem:[#allocation7 + $0xa8] sm:$0xff] }
 0x136   :  { %v5735_v4 = vpop.f32.mrf.mxu0  ;;  %v7834_v18 = vsel %vm5751_vm1, 4294967295, %v7833_v18  ;;  %v2067_v0 = vsub.f32 %v5723_v47, %v7624_v7  ;;  %2000 = vmatpush.msra.mxu0 %v5743_v25  ;;  %v7623_v24 = vand.u32 4294901760, %v5746_v57  ;;  %v5763_v36 = vand.u32 4294901760, %v1550_v3 }
 0x137   :  { %7835 = vst [vmem:[#allocation32_spill] sm:$0xff] %v7834_v18  ;;  %1878 = vmatpush.msrb.mxu2 %v7836_v30  ;;  %1947 = vmatpush.msrb.mxu3 %v5446_v6  ;;  %v7627_v61 = vrot.slane %v5728_v51, 7  ;;  %v925_v2 = vadd.f32 %v5541_v39, %v840_v17  ;;  %v1058_v31 = vsel %vm1047_vm0, %v7628_v22, %v1048_v27  ;;  %v7837_v40 = vand.u32 4294901760, %v5496_v54  ;;  %v1546_v30 = vld [vmem:[#allocation7 + $0x98] sm:$0xff] }
 0x138   :  { %v5771_v6 = vsub.f32 %v1552_v29, %v5743_v25  ;;  %vm5775_vm2 = vcmp.eq.s32.totalorder %v1007_v26, 0  ;;  %v7838_v41 = vmov 0  ;;  %2063 = vmatpush.msra.mxu1 %v2062_v34  ;;  %v2068_v5 = vand.u32 4294901760, %v2067_v0  ;;  %2002 = vmatpush.msra.mxu0 %v5763_v36  ;;  %v1318_v0 = vpop.f32.mrf.mxu2 }
 0x139   :  { %1882 = vmatpush.msrb.mxu2 %v7837_v40  ;;  %v7839_v41 = vsel %vm5775_vm2, 4294967295, %v7838_v41  ;;  %1949 = vmatpush.msrb.mxu3 %v5455_v53  ;;  %v2073_v39 = vsub.f32 %v5746_v57, %v7623_v24  ;;  %v5783_v17 = vand.u32 4294901760, %v1548_v19  ;;  %v5786_v29 = vsub.f32 %v1550_v3, %v5763_v36 }
 0x13a   :  { %7840 = vst [vmem:[#allocation33_spill] sm:$0xff] %v7839_v41  ;;  %v722_v54 = vadd.f32 %v5431_v1, %v5429_v44  ;;  %v921_v26 = vadd.f32 %v5475_v42, %v834_v48  ;;  %v5792_v12 = vsel %vm1047_vm0, %v1048_v27, %v1049_v37  ;;  %v7622_v53 = vand.u32 4294901760, %v5771_v6  ;;  %2069 = vmatpush.msra.mxu1 %v2068_v5  ;;  %v1544_v5 = vld [vmem:[#allocation7 + $0x88] sm:$0xff] }
 0x13b   :  { %v7841_v34 = vand.u32 4294901760, %v5503_v60  ;;  %1951 = vmatpush.msrb.mxu3 %v5472_v10  ;;  %v2074_v44 = vand.u32 4294901760, %v2073_v39  ;;  %v7625_v1 = vand.u32 4294901760, %v5786_v29  ;;  %v5802_v42 = vand.u32 4294901760, %v1546_v30  ;;  %2004 = vmatpush.msra.mxu0 %v5783_v17 }
 0x13c   :  { %v5798_v40 = vpop.f32.mrf.mxu1  ;;  %v5805_v27 = vsub.f32 %v1548_v19, %v5783_v17  ;;  %v5808_v48 = vadd.f32 %v5569_v21, %v925_v2  ;;  %v1059_v60 = vsel %vm5751_vm1, 0.0, %v1058_v31  ;;  %v5815_v3 = vsel %vm1047_vm0, %v1049_v37, %v7627_v61  ;;  %v7843_v2 = vld [vmem:[#allocation15_spill] sm:$0xff] }
 0x13d   :  { %1886 = vmatpush.msrb.mxu2 %v7841_v34  ;;  %v2079_v10 = vsub.f32 %v5771_v6, %v7622_v53  ;;  %v7842_v19 = vand.u32 4294901760, %v5516_v20  ;;  %1953 = vmatpush.msrb.mxu3 %v7843_v2  ;;  %v2085_v37 = vsub.f32 %v5786_v29, %v7625_v1  ;;  %v5830_v39 = vand.u32 4294901760, %v1544_v5  ;;  %v7845_v53 = vld [vmem:[#allocation14_spill] sm:$0xff]  ;;  %v1372_v1 = vpop.f32.mrf.mxu3 }
 0x13e   :  { %v5823_v21 = vpop.f32.mrf.mxu0  ;;  %2075 = vmatpush.msra.mxu1 %v2074_v44  ;;  %v7629_v31 = vand.u32 4294901760, %v5805_v27  ;;  %v5833_v34 = vsub.f32 %v1546_v30, %v5802_v42  ;;  %v5836_v24 = vadd.f32 %v7845_v53, %v921_v26  ;;  %v1128_v20 = vadd.f32 %v5599_v8, %v1059_v60  ;;  %2006 = vmatpush.msra.mxu0 %v5802_v42  ;;  %v1542_v44 = vld [vmem:[#allocation7 + $0x78] sm:$0xff]  ;;  %v7846_v2 = vld [vmem:[#allocation22_spill] sm:$0xff] }
 0x13f   :  { %1890 = vmatpush.msrb.mxu2 %v7842_v19  ;;  %v2080_v19 = vand.u32 4294901760, %v2079_v10  ;;  %v7847_v7 = vand.u32 4294901760, %v7846_v2  ;;  %1955 = vmatpush.msrb.mxu3 %v7848_v62  ;;  %v2086_v61 = vand.u32 4294901760, %v2085_v37  ;;  %v5847_v53 = vand.u32 4294901760, %v1542_v44  ;;  %v7850_v8 = vld [vmem:[#allocation18_spill] sm:$0xff]  ;;  %v7852_v37 = vld [vmem:[#allocation17_spill] sm:$0xff] }
 0x140   :  { %7844 = vst [vmem:[#allocation15_spill] sm:$0xff] %v5833_v34  ;;  %v2091_v30 = vsub.f32 %v5805_v27, %v7629_v31  ;;  %v7632_v26 = vand.u32 4294901760, %v5833_v34  ;;  %v790_v60 = vadd.f32 %v7850_v8, %v722_v54  ;;  %v1253_v22 = vadd.f32 %v5651_v52, %v1128_v20  ;;  %2008 = vmatpush.msra.mxu0 %v5830_v39  ;;  %v7856_v20 = vld [vmem:[#allocation12_spill] sm:$0xff] }
 0x141   :  { %1894 = vmatpush.msrb.mxu2 %v7847_v7  ;;  %7849 = vst [vmem:[#allocation14_spill] sm:$0xff] %v5847_v53  ;;  %2081 = vmatpush.msra.mxu1 %v2080_v19  ;;  %v5854_v62 = vsub.f32 %v1544_v5, %v5830_v39  ;;  %v1540_v7 = vld [vmem:[#allocation7 + $0x68] sm:$0xff]  ;;  %v5863_v54 = vsub.f32 %v1542_v44, %v5847_v53  ;;  %v7855_v52 = vand.u32 4294901760, %v5550_v55  ;;  %v7635_v8 = vrot.slane %v5836_v24, 1  ;;  %v7859_v44 = vld [vmem:[#allocation16_spill] sm:$0xff] }
 0x142   :  { %1957 = vmatpush.msrb.mxu3 %v7852_v37  ;;  %v2092_v2 = vand.u32 4294901760, %v2091_v30  ;;  %v2097_v31 = vsub.f32 %v5833_v34, %v7632_v26  ;;  %v5860_v49 = vand.u32 4294901760, %v1540_v7  ;;  %v7857_v19 = vld [vmem:[#allocation13_spill] sm:$0xff]  ;;  %v846_v37 = vadd.f32 %v7858_v59, %v790_v60  ;;  %2010 = vmatpush.msra.mxu0 %v5847_v53  ;;  %v1538_v26 = vld [vmem:[#allocation7 + $0x58] sm:$0xff]  ;;  %v7868_v60 = vld [vmem:[#allocation24_spill] sm:$0xff] }
 0x143   :  { %7851 = vst [vmem:[#allocation22_spill] sm:$0xff] %v5854_v62  ;;  %1898 = vmatpush.msrb.mxu2 %v7855_v52  ;;  %v726_v5 = vadd.f32 %v7857_v19, %v7856_v20  ;;  %2087 = vmatpush.msra.mxu1 %v2086_v61  ;;  %v7636_v30 = vand.u32 4294901760, %v5854_v62  ;;  %v7645_v55 = vand.u32 4294901760, %v5863_v54  ;;  %v5877_v52 = vand.u32 4294901760, %v1538_v26 }
 0x144   :  { %7853 = vst [vmem:[#allocation20_spill] sm:$0xff] %v5860_v49  ;;  %v5873_v10 = vpop.f32.mrf.mxu1  ;;  %1959 = vmatpush.msrb.mxu3 %v7859_v44  ;;  %v2098_v18 = vand.u32 4294901760, %v2097_v31  ;;  %v5880_v20 = vsub.f32 %v1540_v7, %v5860_v49  ;;  %v7860_v59 = vand.u32 4294901760, %v5564_v46  ;;  %v1319_v61 = vadd.f32 %v1318_v0, %v1253_v22  ;;  %2012 = vmatpush.msra.mxu0 %v5860_v49  ;;  %v1536_v46 = vld [vmem:[#allocation7 + $0x48] sm:$0xff]  ;;  %v1323_v22 = vpop.f32.mrf.mxu2  ;;  %v7862_v44 = vld [vmem:[#allocation23_spill] sm:$0xff] }
 0x145   :  { %7854 = vst [vmem:[#allocation18_spill] sm:$0xff] %v5863_v54  ;;  %v7861_v19 = vrot.slane %v5808_v48, 1  ;;  %2093 = vmatpush.msra.mxu1 %v2092_v2  ;;  %v2103_v7 = vsub.f32 %v5854_v62, %v7636_v30  ;;  %v5906_v2 = vsub.f32 %v1538_v26, %v5877_v52  ;;  %v7867_v49 = vld [vmem:[#allocation19_spill] sm:$0xff]  ;;  %v929_v53 = vadd.f32 %v5619_v9, %v846_v37  ;;  %v7870_v9 = vld [vmem:[#allocation29_spill] sm:$0xff] }
 0x146   :  { %1902 = vmatpush.msrb.mxu2 %v7860_v59  ;;  %v1459_v0 = vpop.f32.mrf.mxu0  ;;  %1961 = vmatpush.msrb.mxu3 %v7862_v44  ;;  %v2109_v59 = vsub.f32 %v5863_v54, %v7645_v55  ;;  %v795_v62 = vadd.f32 %v7867_v49, %v726_v5  ;;  %v1136_v44 = vadd.f32 %v5667_v56, %v5792_v12  ;;  %v1534_v55 = vld [vmem:[#allocation7 + $0x38] sm:$0xff]  ;;  %v7869_v26 = vand.u32 4294901760, %v5880_v20 }
 0x147   :  { %v5892_v31 = vsel %vm1071_vm3, %v7635_v8, %v7861_v19  ;;  %v5903_v19 = vand.u32 4294901760, %v1536_v46  ;;  %7864 = vst [vmem:[#allocation12_spill] sm:$0xff] %v5906_v2  ;;  %v7865_v8 = vld [vmem:[#allocation26_spill] sm:$0xff]  ;;  %2099 = vmatpush.msra.mxu1 %v2098_v18  ;;  %v2104_v34 = vand.u32 4294901760, %v2103_v7  ;;  %2014 = vmatpush.msra.mxu0 %v5877_v52  ;;  %v5920_v49 = vand.u32 4294901760, %v1534_v55  ;;  %v1378_v7 = vpop.f32.mrf.mxu3 }
 0x148   :  { %v7866_v30 = vand.u32 4294901760, %v7865_v8  ;;  %1963 = vmatpush.msrb.mxu3 %v7868_v60  ;;  %v2110_v54 = vand.u32 4294901760, %v2109_v59  ;;  %v2115_v8 = vsub.f32 %v5880_v20, %v7869_v26  ;;  %v7871_v5 = vand.u32 4294901760, %v7870_v9  ;;  %v1532_v60 = vld [vmem:[#allocation7 + $0x28] sm:$0xff] }
 0x149   :  { %7863 = vst [vmem:[#allocation17_spill] sm:$0xff] %v5903_v19  ;;  %v1373_v56 = vadd.f32 %v1372_v1, %v1319_v61  ;;  %v1257_v18 = vadd.f32 %v5716_v32, %v1136_v44  ;;  %v5926_v12 = vadd.s32 8, %v5649_v58  ;;  %2105 = vmatpush.msra.mxu1 %v2104_v34  ;;  %2016 = vmatpush.msra.mxu0 %v5903_v19  ;;  %v7872_v59 = vld [vmem:[#allocation25_spill] sm:$0xff]  ;;  %v5936_v61 = vand.u32 4294901760, %v1532_v60  ;;  %v7874_v44 = vld [vmem:[#allocation28_spill] sm:$0xff] }
 0x14a   :  { %1906 = vmatpush.msrb.mxu2 %v7866_v30  ;;  %v7648_v30 = vand.u32 4294901760, %v5906_v2  ;;  %v5930_v37 = vsub.f32 %v1536_v46, %v5903_v19  ;;  %1965 = vmatpush.msrb.mxu3 %v7872_v59  ;;  %v2116_v26 = vand.u32 4294901760, %v2115_v8  ;;  %v5939_v32 = vsub.f32 %v1534_v55, %v5920_v49  ;;  %v1530_v59 = vld [vmem:[#allocation7 + $0x18] sm:$0xff] }
 0x14b   :  { %v7873_v34 = vand.u32 4294901760, %v5611_v16  ;;  %v5944_v46 = vadd.f32 %v5647_v28, %v929_v53  ;;  %v852_v9 = vadd.f32 %v7874_v44, %v795_v62  ;;  %2111 = vmatpush.msra.mxu1 %v2110_v54  ;;  %2018 = vmatpush.msra.mxu0 %v5920_v49  ;;  %v5951_v16 = vand.u32 4294901760, %v1530_v59 }
 0x14c   :  { %1910 = vmatpush.msrb.mxu2 %v7871_v5  ;;  %v2121_v1 = vsub.f32 %v5906_v2, %v7648_v30  ;;  %v1460_v5 = vadd.f32 %v1459_v0, %v1373_v56  ;;  %v2126_v8 = vand.u32 4294901760, %v5930_v37  ;;  %v1508_v30 = vpop.f32.mrf.mxu1  ;;  %v7875_v2 = vld [vmem:[#allocation27_spill] sm:$0xff]  ;;  %v2132_v19 = vand.u32 4294901760, %v5939_v32  ;;  %v1528_v56 = vld [vmem:[#allocation7 + $0x8] sm:$0xff] }
 0x14d   :  { %1967 = vmatpush.msrb.mxu3 %v7875_v2  ;;  %v5954_v28 = vsub.f32 %v1532_v60, %v5936_v61  ;;  %v7876_v53 = vand.u32 4294901760, %v5632_v13  ;;  %v1324_v62 = vadd.f32 %v1323_v22, %v1257_v18  ;;  %v1000_v0 = vand.u32 15, %v5926_v12  ;;  %2117 = vmatpush.msra.mxu1 %v2116_v26 }
 0x14e   :  { %1914 = vmatpush.msrb.mxu2 %v7873_v34  ;;  %v2122_v55 = vand.u32 4294901760, %v2121_v1  ;;  %v1509_v54 = vadd.f32 %v1508_v30, %v1460_v5  ;;  %v2127_v2 = vsub.f32 %v5930_v37, %v2126_v8  ;;  %2020 = vmatpush.msra.mxu0 %v5936_v61  ;;  %v1463_v1 = vpop.f32.mrf.mxu0  ;;  %v7877_v34 = vld [vmem:[#allocation30_spill] sm:$0xff]  ;;  %v2133_v13 = vsub.f32 %v5939_v32, %v2132_v19 }
 0x14f   :  { %1969 = vmatpush.msrb.mxu3 %v7877_v34  ;;  %v2138_v22 = vand.u32 4294901760, %v5954_v28  ;;  %v5968_v30 = vand.u32 4294901760, %v1528_v56  ;;  %v5971_v18 = vsub.f32 %v1530_v59, %v5951_v16  ;;  %v7878_v12 = vand.u32 4294901760, %v5639_v33  ;;  %v1328_v34 = vpop.f32.mrf.mxu2 }
 0x150   :  { %1918 = vmatpush.msrb.mxu2 %v7876_v53  ;;  %v1075_v60 = vrot.slane %v5944_v46, 1  ;;  %v7879_v26 = vsel %vm5775_vm2, 0.0, %v5815_v3  ;;  %v1523_v5 = vadd.f32 %v1509_v54, %v5892_v31  ;;  %2123 = vmatpush.msra.mxu1 %v2122_v55  ;;  %v2128_v53 = vand.u32 4294901760, %v2127_v2  ;;  %v7882_v2 = vld [vmem:[#allocation31_spill] sm:$0xff] }
 0x151   :  { %v1144_v44 = vadd.f32 %v5735_v4, %v7879_v26  ;;  %2022 = vmatpush.msra.mxu0 %v5951_v16  ;;  %1971 = vmatpush.msrb.mxu3 %v5617_v35  ;;  %v2134_v59 = vand.u32 4294901760, %v2133_v13  ;;  %v2139_v33 = vsub.f32 %v5954_v28, %v2138_v22  ;;  %v5989_v3 = vsub.f32 %v1528_v56, %v5968_v30 }
 0x152   :  { %1922 = vmatpush.msrb.mxu2 %v7878_v12  ;;  %v2144_v12 = vand.u32 4294901760, %v5971_v18  ;;  %v7880_v4 = vand.u32 4294901760, %v5655_v15  ;;  %v1379_v31 = vadd.f32 %v1378_v7, %v1324_v62  ;;  %v5994_v54 = vand.u32 4294901760, %v1523_v5  ;;  %2129 = vmatpush.msra.mxu1 %v2128_v53  ;;  %v1384_v62 = vpop.f32.mrf.mxu3 }
 0x153   :  { %v1261_v55 = vadd.f32 %v5798_v40, %v1144_v44  ;;  %2024 = vmatpush.msra.mxu0 %v5968_v30  ;;  %v933_v35 = vadd.f32 %v5699_v38, %v852_v9  ;;  %1973 = vmatpush.msrb.mxu3 %v7882_v2  ;;  %v2140_v13 = vand.u32 4294901760, %v2139_v33  ;;  %v2150_v15 = vand.u32 4294901760, %v5989_v3 }
 0x154   :  { %1926 = vmatpush.msrb.mxu2 %v7880_v4  ;;  %7881 = vst [vmem:[#allocation13_spill] sm:$0xff] %v5994_v54  ;;  %v2145_v56 = vsub.f32 %v5971_v18, %v2144_v12  ;;  %v1464_v26 = vadd.f32 %v1463_v1, %v1379_v31  ;;  %v6004_v7 = vsub.f32 %v1523_v5, %v5994_v54  ;;  %vm6007_vm4 = vcmp.eq.s32.totalorder %v1000_v0, 15  ;;  %v1512_v44 = vpop.f32.mrf.mxu1 }
 0x155   :  { %1721 = vmatmul.f32.vlgmr.msra.gmra.mxu3 %v5994_v54  ;;  %v7884_v40 = vmov 0  ;;  %v7887_v38 = vrot.slane %v5808_v48, 1  ;;  %2135 = vmatpush.msra.mxu1 %v2134_v59  ;;  %v2151_v5 = vsub.f32 %v5989_v3, %v2150_v15  ;;  %v1329_v0 = vadd.f32 %v1328_v34, %v1261_v55 }
 0x156   :  { %7883 = vst [vmem:[#allocation21_spill] sm:$0xff] %v6004_v7  ;;  %v7885_v40 = vsel %vm6007_vm4, 4294967295, %v7884_v40  ;;  %1975 = vmatpush.msrb.mxu3 %v5641_v23  ;;  %v2146_v1 = vand.u32 4294901760, %v2145_v56  ;;  %v1513_v53 = vadd.f32 %v1512_v44, %v1464_v26  ;;  %1787 = vmatmul.f32.vlgmr.msrb.gmra.mxu0 %v6004_v7  ;;  %v6022_v33 = vand.u32 4294901760, %v6004_v7  ;;  %v1467_v31 = vpop.f32.mrf.mxu0 }
 0x157   :  { %7886 = vst [vmem:[#allocation16_spill] sm:$0xff] %v7885_v40  ;;  %v1076_v9 = vsel %vm1071_vm3, %v7887_v38, %v1075_v60  ;;  %2141 = vmatpush.msra.mxu1 %v2140_v13  ;;  %v982_v48 = vadd.f32 %v5733_v63, %v933_v35  ;;  %v7889_v59 = vrot.slane %v5694_v14, 7  ;;  %v7890_v4 = vrot.slane %v5728_v51, 7 }
 0x158   :  { %7888 = vst [vmem:[#allocation23_spill] sm:$0xff] %v6022_v33  ;;  %v1086_v2 = vsel %vm6007_vm4, 0.0, %v1076_v9  ;;  %2241 = vmatpush.msra.mxu3 %v5686_v45  ;;  %v2152_v34 = vand.u32 4294901760, %v2151_v5  ;;  %v7891_v55 = vand.u32 4294901760, %v5703_v43  ;;  %1841 = vmatmul.f32.vlgmr.msrb.gmra.mxu1 %v6022_v33  ;;  %v1594_v14 = vsub.f32 %v6004_v7, %v6022_v33  ;;  %v1333_v9 = vpop.f32.mrf.mxu2 }
 0x159   :  { %v1053_v23 = vsel %vm1047_vm0, %v7890_v4, %v7889_v59  ;;  %v1524_v56 = vadd.f32 %v1513_v53, %v1086_v2  ;;  %2147 = vmatpush.msra.mxu1 %v2146_v1  ;;  %v1385_v51 = vadd.f32 %v1384_v62, %v1329_v0  ;;  %v7893_v38 = vand.u32 4294901760, %v5723_v47 }
 0x15a   :  { %2300 = vmatpush.msrb.mxu0 %v7891_v55  ;;  %v1152_v13 = vadd.f32 %v5823_v21, %v1053_v23  ;;  %2243 = vmatpush.msra.mxu3 %v5705_v11  ;;  %v6043_v26 = vand.u32 4294901760, %v1594_v14  ;;  %v1077_v21 = vrot.slane %v982_v48, 1  ;;  %v1390_v48 = vpop.f32.mrf.mxu3 }
 0x15b   :  { %v6041_v35 = vand.u32 4294901760, %v1524_v56  ;;  %2153 = vmatpush.msra.mxu1 %v2152_v34  ;;  %v1468_v44 = vadd.f32 %v1467_v31, %v1385_v51  ;;  %v7897_v31 = vand.u32 4294901760, %v5771_v6 }
 0x15c   :  { %v1265_v63 = vadd.f32 %v5873_v10, %v1152_v13  ;;  %2304 = vmatpush.msrb.mxu0 %v7893_v38  ;;  %2245 = vmatpush.msra.mxu3 %v5720_v50  ;;  %v988_v10 = vadd.s32 24, %v5649_v58  ;;  %v1516_v62 = vpop.f32.mrf.mxu1  ;;  %v1078_v59 = vsel %vm1071_vm3, %v1075_v60, %v1077_v21  ;;  %v7896_v58 = vand.u32 4294901760, %v5746_v57  ;;  %v7905_v38 = vld [vmem:[#allocation15_spill] sm:$0xff] }
 0x15d   :  { %7892 = vst [vmem:[#allocation26_spill] sm:$0xff] %v6041_v35  ;;  %v6049_v1 = vsub.f32 %v1524_v56, %v6041_v35  ;;  %1596 = vmatmul.f32.vlgmr.msra.gmra.mxu2 %v6043_v26  ;;  %1725 = vmatmul.f32.gmra.mxu3 %v6041_v35  ;;  %v1517_v0 = vadd.f32 %v1516_v62, %v1468_v44  ;;  %v7908_v44 = vld [vmem:[#allocation22_spill] sm:$0xff] }
 0x15e   :  { %2379 = vmatpush.msrb.mxu1 %v5686_v45  ;;  %2247 = vmatpush.msra.mxu3 %v5743_v25  ;;  %v1334_v5 = vadd.f32 %v1333_v9, %v1265_v63  ;;  %v1014_v23 = vand.u32 15, %v988_v10  ;;  %v7909_v10 = vand.u32 4294901760, %v7908_v44 }
 0x15f   :  { %7894 = vst [vmem:[#allocation19_spill] sm:$0xff] %v6049_v1  ;;  %1792 = vmatmul.f32.gmra.mxu0 %v6049_v1  ;;  %v6058_v53 = vand.u32 4294901760, %v6049_v1  ;;  %2173 = vmatpush.msra.mxu2 %v5703_v43  ;;  %v1525_v45 = vadd.f32 %v1517_v0, %v1078_v59  ;;  %v1471_v43 = vpop.f32.mrf.mxu0 }
 0x160   :  { %2308 = vmatpush.msrb.mxu0 %v7896_v58  ;;  %2381 = vmatpush.msrb.mxu1 %v5705_v11  ;;  %v1391_v46 = vadd.f32 %v1390_v48, %v1334_v5  ;;  %v7898_v11 = vand.u32 4294901760, %v5786_v29  ;;  %vm6088_vm5 = vcmp.eq.s32.totalorder %v1014_v23, 15  ;;  %v7911_v5 = vld [vmem:[#allocation20_spill] sm:$0xff]  ;;  %v7913_v48 = vld [vmem:[#allocation18_spill] sm:$0xff] }
 0x161   :  { %7895 = vst [vmem:[#allocation24_spill] sm:$0xff] %v6058_v53  ;;  %1847 = vmatmul.f32.gmra.mxu1 %v6058_v53  ;;  %v1602_v4 = vsub.f32 %v6049_v1, %v6058_v53  ;;  %2249 = vmatpush.msra.mxu3 %v5763_v36  ;;  %v6074_v60 = vand.u32 4294901760, %v1525_v45  ;;  %v7914_v59 = vand.u32 4294901760, %v7913_v48 }
 0x162   :  { %2312 = vmatpush.msrb.mxu0 %v7897_v31  ;;  %2383 = vmatpush.msrb.mxu1 %v5720_v50  ;;  %v1472_v34 = vadd.f32 %v1471_v43, %v1391_v46  ;;  %v7900_v50 = vmov 0  ;;  %v7917_v31 = vld [vmem:[#allocation17_spill] sm:$0xff] }
 0x163   :  { %v6076_v2 = vand.u32 4294901760, %v1602_v4  ;;  %2176 = vmatpush.msra.mxu2 %v5723_v47  ;;  %2251 = vmatpush.msra.mxu3 %v5783_v17  ;;  %v6084_v55 = vsub.f32 %v1525_v45, %v6074_v60  ;;  %v7901_v50 = vsel %vm6088_vm5, 4294967295, %v7900_v50  ;;  %v7903_v47 = vrot.slane %v5836_v24, 1  ;;  %v2487_v4 = vld [vmem:[#allocation7 + $0x2d0] sm:$0xff] }
 0x164   :  { %2316 = vmatpush.msrb.mxu0 %v7898_v11  ;;  %2385 = vmatpush.msrb.mxu1 %v5743_v25  ;;  %7902 = vst [vmem:[#allocation25_spill] sm:$0xff] %v7901_v50  ;;  %v1520_v56 = vpop.f32.mrf.mxu1  ;;  %v7904_v24 = vand.u32 4294901760, %v5805_v27  ;;  %v6152_v23 = vand.u32 4294901760, %v2487_v4  ;;  %v2485_v11 = vld [vmem:[#allocation7 + $0x2c0] sm:$0xff]  ;;  %v2486_v50 = vld [vmem:[#allocation7 + $0x2c8] sm:$0xff] }
 0x165   :  { %7899 = vst [vmem:[#allocation29_spill] sm:$0xff] %v6084_v55  ;;  %1604 = vmatmul.f32.gmra.mxu2 %v6076_v2  ;;  %1729 = vmatmul.f32.gmra.mxu3 %v6074_v60  ;;  %v1084_v13 = vsel %vm1071_vm3, %v1077_v21, %v7903_v47  ;;  %v1521_v25 = vadd.f32 %v1520_v56, %v1472_v34  ;;  %v6099_v14 = vand.u32 4294901760, %v6084_v55  ;;  %v7906_v21 = vand.u32 4294901760, %v7905_v38  ;;  %v7918_v34 = vld [vmem:[#allocation12_spill] sm:$0xff] }
 0x166   :  { %2179 = vmatpush.msra.mxu2 %v5746_v57  ;;  %2253 = vmatpush.msra.mxu3 %v5802_v42  ;;  %v1088_v51 = vsel %vm6088_vm5, 0.0, %v1084_v13  ;;  %v7919_v47 = vand.u32 4294901760, %v7918_v34  ;;  %v6167_v56 = vand.u32 4294901760, %v2485_v11 }
 0x167   :  { %1797 = vmatmul.f32.gmra.mxu0 %v6084_v55  ;;  %2387 = vmatpush.msrb.mxu1 %v5763_v36  ;;  %v1526_v63 = vadd.f32 %v1521_v25, %v1088_v51  ;;  %v1610_v57 = vsub.f32 %v6084_v55, %v6099_v14  ;;  %v2483_v25 = vld [vmem:[#allocation7 + $0x2b0] sm:$0xff]  ;;  %v6172_v51 = vsub.f32 %v2487_v4, %v6152_v23 }
 0x168   :  { %2320 = vmatpush.msrb.mxu0 %v7904_v24  ;;  %2182 = vmatpush.msra.mxu2 %v5771_v6  ;;  %v7907_v6 = vld [vmem:[#allocation14_spill] sm:$0xff] }
 0x169   :  { %1853 = vmatmul.f32.gmra.mxu1 %v6099_v14  ;;  %2255 = vmatpush.msra.mxu3 %v5830_v39  ;;  %v6114_v36 = vand.u32 4294901760, %v1526_v63  ;;  %v6116_v9 = vand.u32 4294901760, %v1610_v57  ;;  %v2481_v57 = vld [vmem:[#allocation7 + $0x2a0] sm:$0xff] }
 0x16a   :  { %2324 = vmatpush.msrb.mxu0 %v7906_v21  ;;  %2389 = vmatpush.msrb.mxu1 %v5783_v17  ;;  %v2491_v17 = vld [vmem:[#allocation7 + $0x2f0] sm:$0xff]  ;;  %v6194_v21 = vand.u32 4294901760, %v2481_v57 }
 0x16b   :  { %2185 = vmatpush.msra.mxu2 %v5786_v29  ;;  %2257 = vmatpush.msra.mxu3 %v7907_v6  ;;  %v6124_v62 = vsub.f32 %v1526_v63, %v6114_v36  ;;  %v6130_v29 = vand.u32 4294901760, %v2491_v17  ;;  %v6177_v63 = vand.u32 4294901760, %v2483_v25 }
 0x16c   :  { %2328 = vmatpush.msrb.mxu0 %v7909_v10  ;;  %2391 = vmatpush.msrb.mxu1 %v5802_v42  ;;  %v2489_v42 = vld [vmem:[#allocation7 + $0x2e0] sm:$0xff] }
 0x16d   :  { %7910 = vst [vmem:[#allocation28_spill] sm:$0xff] %v6124_v62  ;;  %1612 = vmatmul.f32.gmra.mxu2 %v6116_v9  ;;  %1733 = vmatmul.f32.gmra.mxu3 %v6114_v36  ;;  %v6134_v0 = vand.u32 4294901760, %v6124_v62  ;;  %v6140_v58 = vand.u32 4294901760, %v2489_v42  ;;  %v6147_v45 = vsub.f32 %v2491_v17, %v6130_v29 }
 0x16e   :  { %2188 = vmatpush.msra.mxu2 %v5805_v27  ;;  %2259 = vmatpush.msra.mxu3 %v7911_v5 }
 0x16f   :  { %1802 = vmatmul.f32.gmra.mxu0 %v6124_v62  ;;  %7912 = vst [vmem:[#allocation27_spill] sm:$0xff] %v6134_v0  ;;  %2393 = vmatpush.msrb.mxu1 %v5830_v39  ;;  %v1618_v27 = vsub.f32 %v6124_v62, %v6134_v0  ;;  %v7915_v39 = vand.u32 4294901760, %v5880_v20  ;;  %v6159_v46 = vsub.f32 %v2489_v42, %v6140_v58  ;;  %v7667_v13 = vand.u32 4294901760, %v6147_v45 }
 0x170   :  { %2332 = vmatpush.msrb.mxu0 %v7914_v59  ;;  %2191 = vmatpush.msra.mxu2 %v7905_v38 }
 0x171   :  { %1859 = vmatmul.f32.gmra.mxu1 %v6134_v0  ;;  %2261 = vmatpush.msra.mxu3 %v5877_v52  ;;  %v6154_v43 = vand.u32 4294901760, %v1618_v27  ;;  %v7665_v24 = vand.u32 4294901760, %v6159_v46  ;;  %v2561_v38 = vsub.f32 %v6147_v45, %v7667_v13  ;;  %v2475_v27 = vld [vmem:[#allocation7 + $0x270] sm:$0xff] }
 0x172   :  { %2336 = vmatpush.msrb.mxu0 %v7915_v39  ;;  %2395 = vmatpush.msrb.mxu1 %v7907_v6  ;;  %v6239_v39 = vand.u32 4294901760, %v2475_v27 }
 0x173   :  { %7916 = vst [vmem:[#allocation30_spill] sm:$0xff] %v6154_v43  ;;  %2194 = vmatpush.msra.mxu2 %v7908_v44  ;;  %2263 = vmatpush.msra.mxu3 %v7917_v31  ;;  %v2567_v6 = vsub.f32 %v6159_v46, %v7665_v24  ;;  %v6202_v44 = vsub.f32 %v2483_v25, %v6177_v63  ;;  %v2562_v10 = vand.u32 4294901760, %v2561_v38  ;;  %v2488_v24 = vld [vmem:[#allocation7 + $0x2d8] sm:$0xff] }
 0x174   :  { %2340 = vmatpush.msrb.mxu0 %v7919_v47  ;;  %2397 = vmatpush.msrb.mxu1 %v7911_v5  ;;  %v6388_v13 = vand.u32 4294901760, %v2488_v24 }
 0x175   :  { %1620 = vmatmul.f32.gmra.mxu2 %v6154_v43  ;;  %1977 = vmatmul.f32.vlgmr.msrb.gmra.mxu3 %v5994_v54  ;;  %v2568_v42 = vand.u32 4294901760, %v2567_v6 }
 0x176   :  { %2197 = vmatpush.msra.mxu2 %v7913_v48  ;;  %2265 = vmatpush.msra.mxu3 %v5920_v49  ;;  %v7658_v48 = vand.u32 4294901760, %v6202_v44 }
 0x177   :  { %2030 = vmatmul.f32.vlgmr.msra.gmra.mxu0 %v6043_v26  ;;  %2399 = vmatpush.msrb.mxu1 %v5877_v52  ;;  %v6188_v52 = vsub.f32 %v2485_v11, %v6167_v56 }
 0x178   :  { %2344 = vmatpush.msrb.mxu0 %v2126_v8  ;;  %2200 = vmatpush.msra.mxu2 %v5880_v20  ;;  %v7664_v8 = vand.u32 4294901760, %v6172_v51  ;;  %v2479_v20 = vld [vmem:[#allocation7 + $0x290] sm:$0xff] }
 0x179   :  { %2155 = vmatmul.f32.vlgmr.msra.gmra.mxu1 %v5994_v54  ;;  %2267 = vmatpush.msra.mxu3 %v5936_v61  ;;  %v7661_v17 = vand.u32 4294901760, %v6188_v52  ;;  %v6210_v5 = vand.u32 4294901760, %v2479_v20 }
 0x17a   :  { %2348 = vmatpush.msrb.mxu0 %v2132_v19  ;;  %2401 = vmatpush.msrb.mxu1 %v7917_v31  ;;  %v2477_v19 = vld [vmem:[#allocation7 + $0x280] sm:$0xff]  ;;  %v2585_v31 = vsub.f32 %v6202_v44, %v7658_v48 }
 0x17b   :  { %2203 = vmatpush.msra.mxu2 %v7918_v34  ;;  %2269 = vmatpush.msra.mxu3 %v5951_v16  ;;  %v6223_v59 = vand.u32 4294901760, %v2477_v19 }
 0x17c   :  { %2352 = vmatpush.msrb.mxu0 %v2138_v22  ;;  %2403 = vmatpush.msrb.mxu1 %v5920_v49  ;;  %v2573_v22 = vsub.f32 %v6172_v51, %v7664_v8  ;;  %v6218_v49 = vsub.f32 %v2481_v57, %v6194_v21  ;;  %v2586_v25 = vand.u32 4294901760, %v2585_v31 }
 0x17d   :  { %1928 = vmatmul.f32.vlgmr.msrb.gmra.mxu2 %v5994_v54  ;;  %1981 = vmatmul.f32.gmra.mxu3 %v6041_v35  ;;  %v6246_v11 = vsub.f32 %v2477_v19, %v6223_v59 }
 0x17e   :  { %2206 = vmatpush.msra.mxu2 %v5930_v37  ;;  %2271 = vmatpush.msra.mxu3 %v5968_v30  ;;  %v2579_v37 = vsub.f32 %v6188_v52, %v7661_v17  ;;  %v2574_v4 = vand.u32 4294901760, %v2573_v22  ;;  %v2492_v17 = vld [vmem:[#allocation7 + $0x2f8] sm:$0xff] }
 0x17f   :  { %2038 = vmatmul.f32.gmra.mxu0 %v6076_v2  ;;  %2405 = vmatpush.msrb.mxu1 %v5936_v61  ;;  %v6233_v61 = vsub.f32 %v2479_v20, %v6210_v5  ;;  %v7653_v57 = vand.u32 4294901760, %v6246_v11  ;;  %v2469_v20 = vld [vmem:[#allocation7 + $0x240] sm:$0xff] }
 0x180   :  { %2356 = vmatpush.msrb.mxu0 %v2144_v12  ;;  %2209 = vmatpush.msra.mxu2 %v5939_v32  ;;  %v7656_v12 = vand.u32 4294901760, %v6218_v49  ;;  %v2473_v32 = vld [vmem:[#allocation7 + $0x260] sm:$0xff]  ;;  %v6279_v22 = vand.u32 4294901760, %v2469_v20 }
 0x181   :  { %2159 = vmatmul.f32.gmra.mxu1 %v6041_v35  ;;  %2563 = vmatpush.msrb.mxu3 %v2562_v10  ;;  %v6253_v34 = vand.u32 4294901760, %v2473_v32 }
 0x182   :  { %2360 = vmatpush.msrb.mxu0 %v2150_v15  ;;  %2407 = vmatpush.msrb.mxu1 %v5951_v16  ;;  %v2471_v16 = vld [vmem:[#allocation7 + $0x250] sm:$0xff]  ;;  %v2580_v15 = vand.u32 4294901760, %v2579_v37  ;;  %v2591_v47 = vsub.f32 %v6218_v49, %v7656_v12  ;;  %v2465_v37 = vld [vmem:[#allocation7 + $0x220] sm:$0xff] }
 0x183   :  { %2212 = vmatpush.msra.mxu2 %v5954_v28  ;;  %2569 = vmatpush.msrb.mxu3 %v2568_v42  ;;  %v7655_v28 = vand.u32 4294901760, %v6233_v61  ;;  %v6265_v38 = vand.u32 4294901760, %v2471_v16  ;;  %v6274_v6 = vsub.f32 %v2473_v32, %v6253_v34  ;;  %v2603_v42 = vsub.f32 %v6246_v11, %v7653_v57  ;;  %v2463_v57 = vld [vmem:[#allocation7 + $0x210] sm:$0xff]  ;;  %v2461_v12 = vld [vmem:[#allocation7 + $0x200] sm:$0xff] }
 0x184   :  { %2409 = vmatpush.msrb.mxu1 %v5968_v30  ;;  %2673 = vmatpush.msra.mxu0 %v6147_v45  ;;  %v6260_v30 = vsub.f32 %v2475_v27, %v6239_v39  ;;  %v2592_v19 = vand.u32 4294901760, %v2591_v47  ;;  %v6333_v48 = vand.u32 4294901760, %v2461_v12 }
 0x185   :  { %1932 = vmatmul.f32.gmra.mxu2 %v6041_v35  ;;  %1985 = vmatmul.f32.gmra.mxu3 %v6074_v60  ;;  %v6286_v27 = vsub.f32 %v2471_v16, %v6265_v38  ;;  %v7657_v32 = vand.u32 4294901760, %v6274_v6  ;;  %v2604_v47 = vand.u32 4294901760, %v2603_v42 }
 0x186   :  { %2215 = vmatpush.msra.mxu2 %v5971_v18  ;;  %2575 = vmatpush.msrb.mxu3 %v2574_v4  ;;  %v2597_v18 = vsub.f32 %v6233_v61, %v7655_v28  ;;  %v7654_v10 = vand.u32 4294901760, %v6260_v30  ;;  %v6319_v28 = vand.u32 4294901760, %v2463_v57 }
 0x187   :  { %2046 = vmatmul.f32.gmra.mxu0 %v6116_v9  ;;  %2741 = vmatpush.msra.mxu1 %v6130_v29 }
 0x188   :  { %2676 = vmatpush.msra.mxu0 %v6159_v46  ;;  %2218 = vmatpush.msra.mxu2 %v5989_v3  ;;  %v2467_v3 = vld [vmem:[#allocation7 + $0x230] sm:$0xff]  ;;  %v2598_v4 = vand.u32 4294901760, %v2597_v18  ;;  %v2609_v16 = vsub.f32 %v6260_v30, %v7654_v10  ;;  %v6305_v18 = vand.u32 4294901760, %v2465_v37 }
 0x189   :  { %2163 = vmatmul.f32.gmra.mxu1 %v6074_v60  ;;  %2581 = vmatpush.msrb.mxu3 %v2580_v15  ;;  %v6293_v31 = vand.u32 4294901760, %v2467_v3  ;;  %v6300_v15 = vsub.f32 %v2469_v20, %v6279_v22  ;;  %v2615_v20 = vsub.f32 %v6274_v6, %v7657_v32 }
 0x18a   :  { %2679 = vmatpush.msra.mxu0 %v6172_v51  ;;  %2743 = vmatpush.msra.mxu1 %v6140_v58  ;;  %v2610_v42 = vand.u32 4294901760, %v2609_v16 }
 0x18b   :  { %2494 = vmatpush.msrb.mxu2 %v6130_v29  ;;  %2587 = vmatpush.msrb.mxu3 %v2586_v25  ;;  %v7659_v25 = vand.u32 4294901760, %v6286_v27  ;;  %v7660_v10 = vand.u32 4294901760, %v6300_v15  ;;  %v2616_v16 = vand.u32 4294901760, %v2615_v20 }
 0x18c   :  { %2682 = vmatpush.msra.mxu0 %v6188_v52  ;;  %2745 = vmatpush.msra.mxu1 %v6152_v23 }
 0x18d   :  { %1936 = vmatmul.f32.gmra.mxu2 %v6074_v60  ;;  %1989 = vmatmul.f32.gmra.mxu3 %v6114_v36 }
 0x18e   :  { %2496 = vmatpush.msrb.mxu2 %v6140_v58  ;;  %2593 = vmatpush.msrb.mxu3 %v2592_v19  ;;  %v6314_v19 = vsub.f32 %v2467_v3, %v6293_v31  ;;  %v6326_v3 = vsub.f32 %v2465_v37, %v6305_v18  ;;  %v2627_v37 = vsub.f32 %v6300_v15, %v7660_v10 }
 0x18f   :  { %2054 = vmatmul.f32.gmra.mxu0 %v6154_v43  ;;  %2747 = vmatpush.msra.mxu1 %v6167_v56  ;;  %v2476_v43 = vld [vmem:[#allocation7 + $0x278] sm:$0xff] }
 0x190   :  { %2685 = vmatpush.msra.mxu0 %v6202_v44  ;;  %2498 = vmatpush.msrb.mxu2 %v6152_v23  ;;  %7920 = vst [vmem:[#allocation31_spill] sm:$0xff] %v6314_v19  ;;  %v7662_v32 = vand.u32 4294901760, %v6314_v19  ;;  %v7663_v20 = vand.u32 4294901760, %v6326_v3 }
 0x191   :  { %2167 = vmatmul.f32.gmra.mxu1 %v6114_v36  ;;  %2599 = vmatpush.msrb.mxu3 %v2598_v4  ;;  %v2621_v4 = vsub.f32 %v6286_v27, %v7659_v25  ;;  %7921 = vst [vmem:[#allocation15_spill] sm:$0xff] %v6326_v3 }
 0x192   :  { %2688 = vmatpush.msra.mxu0 %v6218_v49  ;;  %2749 = vmatpush.msra.mxu1 %v6177_v63 }
 0x193   :  { %2500 = vmatpush.msrb.mxu2 %v6167_v56  ;;  %2605 = vmatpush.msrb.mxu3 %v2604_v47  ;;  %v6340_v47 = vsub.f32 %v2463_v57, %v6319_v28  ;;  %v2622_v25 = vand.u32 4294901760, %v2621_v4  ;;  %v6352_v57 = vsub.f32 %v2461_v12, %v6333_v48  ;;  %v2628_v4 = vand.u32 4294901760, %v2627_v37 }
 0x194   :  { %2691 = vmatpush.msra.mxu0 %v6233_v61  ;;  %2751 = vmatpush.msra.mxu1 %v6194_v21 }
 0x195   :  { %1940 = vmatmul.f32.gmra.mxu2 %v6114_v36  ;;  %2275 = vmatmul.f32.vlgmr.msra.gmra.mxu3 %v6022_v33  ;;  %7922 = vst [vmem:[#allocation14_spill] sm:$0xff] %v6340_v47  ;;  %v7666_v10 = vand.u32 4294901760, %v6340_v47  ;;  %v7670_v37 = vand.u32 4294901760, %v6352_v57 }
 0x196   :  { %2502 = vmatpush.msrb.mxu2 %v6177_v63  ;;  %2611 = vmatpush.msrb.mxu3 %v2610_v42  ;;  %v2633_v42 = vsub.f32 %v6314_v19, %v7662_v32  ;;  %7923 = vst [vmem:[#allocation22_spill] sm:$0xff] %v6352_v57  ;;  %v2490_v32 = vld [vmem:[#allocation7 + $0x2e8] sm:$0xff] }
 0x197   :  { %2362 = vmatmul.f32.vlgmr.msrb.gmra.mxu0 %v5994_v54  ;;  %2753 = vmatpush.msra.mxu1 %v6210_v5 }
 0x198   :  { %2694 = vmatpush.msra.mxu0 %v6246_v11  ;;  %2504 = vmatpush.msrb.mxu2 %v6194_v21  ;;  %v2634_v12 = vand.u32 4294901760, %v2633_v42  ;;  %v6376_v42 = vand.u32 4294901760, %v2490_v32 }
 0x199   :  { %2411 = vmatmul.f32.vlgmr.msrb.gmra.mxu1 %v5994_v54  ;;  %2617 = vmatpush.msrb.mxu3 %v2616_v16  ;;  %v2639_v16 = vsub.f32 %v6326_v3, %v7663_v20  ;;  %v6370_v20 = vand.u32 4294901760, %v2492_v17 }
 0x19a   :  { %2697 = vmatpush.msra.mxu0 %v6260_v30  ;;  %2755 = vmatpush.msra.mxu1 %v6223_v59 }
 0x19b   :  { %2506 = vmatpush.msrb.mxu2 %v6210_v5  ;;  %2623 = vmatpush.msrb.mxu3 %v2622_v25  ;;  %v2645_v25 = vsub.f32 %v6340_v47, %v7666_v10  ;;  %v2640_v8 = vand.u32 4294901760, %v2639_v16  ;;  %v6385_v16 = vsub.f32 %v2492_v17, %v6370_v20  ;;  %v2484_v17 = vld [vmem:[#allocation7 + $0x2b8] sm:$0xff] }
 0x19c   :  { %2700 = vmatpush.msra.mxu0 %v6274_v6  ;;  %2757 = vmatpush.msra.mxu1 %v6239_v39  ;;  %v6409_v40 = vand.u32 4294901760, %v2484_v17 }
 0x19d   :  { %2221 = vmatmul.f32.vlgmr.msra.gmra.mxu2 %v6004_v7  ;;  %2281 = vmatmul.f32.gmra.mxu3 %v6058_v53  ;;  %v2646_v10 = vand.u32 4294901760, %v2645_v25  ;;  %7924 = vst [vmem:[#allocation20_spill] sm:$0xff] %v6385_v16 }
 0x19e   :  { %2508 = vmatpush.msrb.mxu2 %v6223_v59  ;;  %2629 = vmatpush.msrb.mxu3 %v2628_v4  ;;  %v2651_v4 = vsub.f32 %v6352_v57, %v7670_v37  ;;  %v6399_v37 = vand.u32 4294901760, %v2486_v50 }
 0x19f   :  { %2366 = vmatmul.f32.gmra.mxu0 %v6041_v35  ;;  %2759 = vmatpush.msra.mxu1 %v6253_v34 }
 0x1a0   :  { %2703 = vmatpush.msra.mxu0 %v6286_v27  ;;  %2510 = vmatpush.msrb.mxu2 %v6239_v39  ;;  %v2652_v25 = vand.u32 4294901760, %v2651_v4  ;;  %v6418_v41 = vsub.f32 %v2486_v50, %v6399_v37  ;;  %v6431_v50 = vsub.f32 %v2484_v17, %v6409_v40 }
 0x1a1   :  { %2415 = vmatmul.f32.gmra.mxu1 %v6041_v35  ;;  %2635 = vmatpush.msrb.mxu3 %v2634_v12  ;;  %v6393_v12 = vsub.f32 %v2490_v32, %v6376_v42  ;;  %v6404_v32 = vsub.f32 %v2488_v24, %v6388_v13 }
 0x1a2   :  { %2706 = vmatpush.msra.mxu0 %v6300_v15  ;;  %2761 = vmatpush.msra.mxu1 %v6265_v38  ;;  %7927 = vst [vmem:[#allocation12_spill] sm:$0xff] %v6418_v41 }
 0x1a3   :  { %2512 = vmatpush.msrb.mxu2 %v6253_v34  ;;  %2641 = vmatpush.msrb.mxu3 %v2640_v8  ;;  %7925 = vst [vmem:[#allocation18_spill] sm:$0xff] %v6393_v12  ;;  %v7677_v8 = vand.u32 4294901760, %v6385_v16 }
 0x1a4   :  { %2709 = vmatpush.msra.mxu0 %v6314_v19  ;;  %2763 = vmatpush.msra.mxu1 %v6279_v22  ;;  %7926 = vst [vmem:[#allocation17_spill] sm:$0xff] %v6404_v32 }
 0x1a5   :  { %2226 = vmatmul.f32.gmra.mxu2 %v6049_v1  ;;  %2287 = vmatmul.f32.gmra.mxu3 %v6099_v14  ;;  %v2995_v24 = vsub.f32 %v6385_v16, %v7677_v8  ;;  %7929 = vst [vmem:[#allocation34_spill] sm:$0xff] %v6431_v50 }
 0x1a6   :  { %2514 = vmatpush.msrb.mxu2 %v6265_v38  ;;  %2647 = vmatpush.msrb.mxu3 %v2646_v10  ;;  %v2482_v10 = vld [vmem:[#allocation7 + $0x2a8] sm:$0xff] }
 0x1a7   :  { %2370 = vmatmul.f32.gmra.mxu0 %v6074_v60  ;;  %2765 = vmatpush.msra.mxu1 %v6293_v31  ;;  %v2996_v4 = vand.u32 4294901760, %v2995_v24 }
 0x1a8   :  { %2712 = vmatpush.msra.mxu0 %v6326_v3  ;;  %2516 = vmatpush.msrb.mxu2 %v6279_v22  ;;  %v6423_v3 = vand.u32 4294901760, %v2482_v10 }
 0x1a9   :  { %2419 = vmatmul.f32.gmra.mxu1 %v6074_v60  ;;  %2653 = vmatpush.msrb.mxu3 %v2652_v25  ;;  %v2480_v25 = vld [vmem:[#allocation7 + $0x298] sm:$0xff] }
 0x1aa   :  { %2715 = vmatpush.msra.mxu0 %v6340_v47  ;;  %2767 = vmatpush.msra.mxu1 %v6305_v18  ;;  %v7928_v47 = vand.u32 4294901760, %v6393_v12  ;;  %v6438_v16 = vand.u32 4294901760, %v2480_v25 }
 0x1ab   :  { %2518 = vmatpush.msrb.mxu2 %v6293_v31  ;;  %2879 = vmatpush.msra.mxu3 %v6130_v29  ;;  %v2478_v29 = vld [vmem:[#allocation7 + $0x288] sm:$0xff] }
 0x1ac   :  { %2718 = vmatpush.msra.mxu0 %v6352_v57  ;;  %2769 = vmatpush.msra.mxu1 %v6319_v28  ;;  %v3001_v8 = vsub.f32 %v6393_v12, %v7928_v47  ;;  %v7930_v47 = vand.u32 4294901760, %v6404_v32  ;;  %v6446_v12 = vsub.f32 %v2482_v10, %v6423_v3  ;;  %v6451_v19 = vand.u32 4294901760, %v2478_v29 }
 0x1ad   :  { %2231 = vmatmul.f32.gmra.mxu2 %v6084_v55  ;;  %2293 = vmatmul.f32.gmra.mxu3 %v6134_v0 }
 0x1ae   :  { %2520 = vmatpush.msrb.mxu2 %v6305_v18  ;;  %2771 = vmatpush.msra.mxu1 %v6333_v48  ;;  %v3007_v17 = vsub.f32 %v6404_v32, %v7930_v47  ;;  %v3002_v24 = vand.u32 4294901760, %v3001_v8  ;;  %v6460_v47 = vsub.f32 %v2480_v25, %v6438_v16  ;;  %v6465_v32 = vand.u32 4294901760, %v2476_v43 }
 0x1af   :  { %2374 = vmatmul.f32.gmra.mxu0 %v6114_v36  ;;  %2881 = vmatpush.msra.mxu3 %v6140_v58  ;;  %v7931_v58 = vand.u32 4294901760, %v6418_v41  ;;  %v6472_v25 = vsub.f32 %v2478_v29, %v6451_v19  ;;  %v7934_v29 = vand.u32 4294901760, %v6446_v12 }
 0x1b0   :  { %2928 = vmatpush.msrb.mxu0 %v6370_v20  ;;  %2522 = vmatpush.msrb.mxu2 %v6319_v28  ;;  %v3008_v8 = vand.u32 4294901760, %v3007_v17  ;;  %v7933_v17 = vand.u32 4294901760, %v6147_v45  ;;  %v7935_v45 = vand.u32 4294901760, %v6159_v46 }
 0x1b1   :  { %2423 = vmatmul.f32.gmra.mxu1 %v6114_v36  ;;  %2883 = vmatpush.msra.mxu3 %v6152_v23  ;;  %v3013_v10 = vsub.f32 %v6418_v41, %v7931_v58  ;;  %v2474_v23 = vld [vmem:[#allocation7 + $0x268] sm:$0xff] }
 0x1b2   :  { %2930 = vmatpush.msrb.mxu0 %v6376_v42  ;;  %2997 = vmatpush.msrb.mxu1 %v2996_v4  ;;  %v7932_v4 = vand.u32 4294901760, %v6431_v50  ;;  %v6480_v41 = vand.u32 4294901760, %v2474_v23 }
 0x1b3   :  { %2524 = vmatpush.msrb.mxu2 %v6333_v48  ;;  %2885 = vmatpush.msra.mxu3 %v6167_v56  ;;  %v2472_v56 = vld [vmem:[#allocation7 + $0x258] sm:$0xff]  ;;  %v3014_v57 = vand.u32 4294901760, %v3013_v10 }
 0x1b4   :  { %2932 = vmatpush.msrb.mxu0 %v6388_v13  ;;  %3003 = vmatpush.msrb.mxu1 %v3002_v24  ;;  %v3019_v58 = vsub.f32 %v6431_v50, %v7932_v4  ;;  %v3025_v4 = vsub.f32 %v6446_v12, %v7934_v29  ;;  %v6487_v50 = vsub.f32 %v2476_v43, %v6465_v32  ;;  %v2470_v24 = vld [vmem:[#allocation7 + $0x248] sm:$0xff]  ;;  %v7936_v43 = vand.u32 4294901760, %v6460_v47 }
 0x1b5   :  { %2236 = vmatmul.f32.gmra.mxu2 %v6124_v62  ;;  %2655 = vmatmul.f32.vlgmr.msrb.gmra.mxu3 %v5994_v54  ;;  %v6502_v46 = vsub.f32 %v2474_v23, %v6480_v41  ;;  %v6508_v10 = vand.u32 4294901760, %v2470_v24 }
 0x1b6   :  { %2800 = vmatpush.msra.mxu2 %v7933_v17  ;;  %2887 = vmatpush.msra.mxu3 %v6177_v63  ;;  %v3020_v63 = vand.u32 4294901760, %v3019_v58  ;;  %v6493_v17 = vand.u32 4294901760, %v2472_v56  ;;  %v7937_v58 = vand.u32 4294901760, %v6172_v51  ;;  %v3026_v29 = vand.u32 4294901760, %v3025_v4  ;;  %v2466_v51 = vld [vmem:[#allocation7 + $0x228] sm:$0xff] }
 0x1b7   :  { %2721 = vmatmul.f32.vlgmr.msra.gmra.mxu0 %v6004_v7  ;;  %3009 = vmatpush.msrb.mxu1 %v3008_v8  ;;  %v3031_v8 = vsub.f32 %v6460_v47, %v7936_v43 }
 0x1b8   :  { %2934 = vmatpush.msrb.mxu0 %v6399_v37  ;;  %2804 = vmatpush.msra.mxu2 %v7935_v45  ;;  %v7692_v45 = vand.u32 4294901760, %v6487_v50  ;;  %v6515_v23 = vsub.f32 %v2472_v56, %v6493_v17 }
 0x1b9   :  { %2775 = vmatmul.f32.vlgmr.msra.gmra.mxu1 %v6022_v33  ;;  %2889 = vmatpush.msra.mxu3 %v6194_v21  ;;  %v2468_v21 = vld [vmem:[#allocation7 + $0x238] sm:$0xff]  ;;  %v3032_v4 = vand.u32 4294901760, %v3031_v8 }
 0x1ba   :  { %2936 = vmatpush.msrb.mxu0 %v6409_v40  ;;  %3015 = vmatpush.msrb.mxu1 %v3014_v57  ;;  %v7938_v57 = vand.u32 4294901760, %v6472_v25  ;;  %v3043_v56 = vsub.f32 %v6487_v50, %v7692_v45 }
 0x1bb   :  { %2808 = vmatpush.msra.mxu2 %v7937_v58  ;;  %2891 = vmatpush.msra.mxu3 %v6210_v5  ;;  %v7939_v5 = vand.u32 4294901760, %v6188_v52  ;;  %v6523_v58 = vand.u32 4294901760, %v2468_v21  ;;  %v7940_v52 = vand.u32 4294901760, %v6202_v44 }
 0x1bc   :  { %2938 = vmatpush.msrb.mxu0 %v6423_v3  ;;  %3021 = vmatpush.msrb.mxu1 %v3020_v63  ;;  %v3037_v43 = vsub.f32 %v6472_v25, %v7938_v57  ;;  %v6530_v57 = vsub.f32 %v2470_v24, %v6508_v10  ;;  %v2464_v63 = vld [vmem:[#allocation7 + $0x218] sm:$0xff]  ;;  %v7941_v24 = vand.u32 4294901760, %v6502_v46  ;;  %v3044_v45 = vand.u32 4294901760, %v3043_v56 }
 0x1bd   :  { %2530 = vmatmul.f32.vlgmr.msrb.gmra.mxu2 %v6043_v26  ;;  %2659 = vmatmul.f32.gmra.mxu3 %v6041_v35  ;;  %v6545_v44 = vsub.f32 %v2468_v21, %v6523_v58 }
 0x1be   :  { %2812 = vmatpush.msra.mxu2 %v7939_v5  ;;  %2893 = vmatpush.msra.mxu3 %v6223_v59  ;;  %v3038_v59 = vand.u32 4294901760, %v3037_v43  ;;  %v6536_v5 = vand.u32 4294901760, %v2466_v51  ;;  %v2462_v43 = vld [vmem:[#allocation7 + $0x208] sm:$0xff]  ;;  %v3060_v8 = vand.u32 4294901760, %v6530_v57 }
 0x1bf   :  { %2726 = vmatmul.f32.gmra.mxu0 %v6049_v1  ;;  %3027 = vmatpush.msrb.mxu1 %v3026_v29  ;;  %v3049_v29 = vsub.f32 %v6502_v46, %v7941_v24 }
 0x1c0   :  { %2940 = vmatpush.msrb.mxu0 %v6438_v16  ;;  %2816 = vmatpush.msra.mxu2 %v7940_v52  ;;  %v7942_v52 = vand.u32 4294901760, %v6218_v49  ;;  %v6558_v21 = vsub.f32 %v2466_v51, %v6536_v5  ;;  %v6562_v49 = vand.u32 4294901760, %v2462_v43  ;;  %v3061_v51 = vsub.f32 %v6530_v57, %v3060_v8 }
 0x1c1   :  { %2781 = vmatmul.f32.gmra.mxu1 %v6058_v53  ;;  %2895 = vmatpush.msra.mxu3 %v6239_v39  ;;  %v6551_v39 = vand.u32 4294901760, %v2464_v63  ;;  %v3050_v56 = vand.u32 4294901760, %v3049_v29 }
 0x1c2   :  { %2942 = vmatpush.msrb.mxu0 %v6451_v19  ;;  %3033 = vmatpush.msrb.mxu1 %v3032_v4  ;;  %v7943_v4 = vand.u32 4294901760, %v6515_v23  ;;  %v3062_v29 = vand.u32 4294901760, %v3061_v51 }
 0x1c3   :  { %2820 = vmatpush.msra.mxu2 %v7942_v52  ;;  %2897 = vmatpush.msra.mxu3 %v6253_v34  ;;  %v7944_v34 = vand.u32 4294901760, %v6233_v61  ;;  %v6573_v52 = vsub.f32 %v2464_v63, %v6551_v39  ;;  %v7945_v61 = vand.u32 4294901760, %v6246_v11  ;;  %v7946_v11 = vand.u32 4294901760, %v6260_v30 }
 0x1c4   :  { %2944 = vmatpush.msrb.mxu0 %v6465_v32  ;;  %3039 = vmatpush.msrb.mxu1 %v3038_v59  ;;  %v3055_v24 = vsub.f32 %v6515_v23, %v7943_v4  ;;  %v3066_v59 = vand.u32 4294901760, %v6545_v44  ;;  %v7947_v30 = vand.u32 4294901760, %v6274_v6 }
 0x1c5   :  { %2538 = vmatmul.f32.gmra.mxu2 %v6076_v2  ;;  %2663 = vmatmul.f32.gmra.mxu3 %v6074_v60 }
 0x1c6   :  { %2824 = vmatpush.msra.mxu2 %v7944_v34  ;;  %2899 = vmatpush.msra.mxu3 %v6265_v38  ;;  %v3056_v4 = vand.u32 4294901760, %v3055_v24  ;;  %v7695_v38 = vand.u32 4294901760, %v6558_v21  ;;  %v3067_v63 = vsub.f32 %v6545_v44, %v3066_v59  ;;  %v7694_v24 = vand.u32 4294901760, %v6573_v52 }
 0x1c7   :  { %2731 = vmatmul.f32.gmra.mxu0 %v6084_v55  ;;  %3045 = vmatpush.msrb.mxu1 %v3044_v45  ;;  %v6582_v45 = vsub.f32 %v2462_v43, %v6562_v49 }
 0x1c8   :  { %2946 = vmatpush.msrb.mxu0 %v6480_v41  ;;  %2828 = vmatpush.msra.mxu2 %v7945_v61  ;;  %v3079_v34 = vsub.f32 %v6573_v52, %v7694_v24 }
 0x1c9   :  { %2787 = vmatmul.f32.gmra.mxu1 %v6099_v14  ;;  %2901 = vmatpush.msra.mxu3 %v6279_v22  ;;  %v3073_v22 = vsub.f32 %v6558_v21, %v7695_v38  ;;  %v7693_v43 = vand.u32 4294901760, %v6582_v45 }
 0x1ca   :  { %2948 = vmatpush.msrb.mxu0 %v6493_v17  ;;  %3051 = vmatpush.msrb.mxu1 %v3050_v56  ;;  %v7948_v56 = vand.u32 4294901760, %v6286_v27  ;;  %v3080_v61 = vand.u32 4294901760, %v3079_v34  ;;  %v7960_v34 = vld [vmem:[#allocation14_spill] sm:$0xff] }
 0x1cb   :  { %2832 = vmatpush.msra.mxu2 %v7946_v11  ;;  %2903 = vmatpush.msra.mxu3 %v6293_v31  ;;  %v3068_v31 = vand.u32 4294901760, %v3067_v63  ;;  %v3074_v51 = vand.u32 4294901760, %v3073_v22  ;;  %v3085_v6 = vsub.f32 %v6582_v45, %v7693_v43  ;;  %v7952_v63 = vld [vmem:[#allocation31_spill] sm:$0xff]  ;;  %v7989_v43 = vand.u32 4294901760, %v6515_v23 }
 0x1cc   :  { %2950 = vmatpush.msrb.mxu0 %v6508_v10  ;;  %3057 = vmatpush.msrb.mxu1 %v3056_v4  ;;  %v7951_v4 = vld [vmem:[#allocation30_spill] sm:$0xff]  ;;  %v7953_v11 = vand.u32 4294901760, %v7952_v63  ;;  %v7967_v63 = vld [vmem:[#allocation17_spill] sm:$0xff] }
 0x1cd   :  { %2546 = vmatmul.f32.gmra.mxu2 %v6116_v9  ;;  %2667 = vmatmul.f32.gmra.mxu3 %v6114_v36 }
 0x1ce   :  { %2836 = vmatpush.msra.mxu2 %v7947_v30  ;;  %2905 = vmatpush.msra.mxu3 %v6305_v18  ;;  %v7949_v18 = vand.u32 4294901760, %v6300_v15  ;;  %v7958_v30 = vld [vmem:[#allocation20_spill] sm:$0xff] }
 0x1cf   :  { %2736 = vmatmul.f32.gmra.mxu0 %v6124_v62  ;;  %3063 = vmatpush.msrb.mxu1 %v3062_v29 }
 0x1d0   :  { %2952 = vmatpush.msrb.mxu0 %v6523_v58  ;;  %2840 = vmatpush.msra.mxu2 %v7948_v56  ;;  %v7961_v56 = vand.u32 4294901760, %v7960_v34 }
 0x1d1   :  { %2793 = vmatmul.f32.gmra.mxu1 %v6134_v0  ;;  %2907 = vmatpush.msra.mxu3 %v6319_v28  ;;  %v3086_v28 = vand.u32 4294901760, %v3085_v6 }
 0x1d2   :  { %2954 = vmatpush.msrb.mxu0 %v6536_v5  ;;  %3069 = vmatpush.msrb.mxu1 %v3068_v31  ;;  %v7959_v31 = vand.u32 4294901760, %v7958_v30 }
 0x1d3   :  { %2844 = vmatpush.msra.mxu2 %v7949_v18  ;;  %2909 = vmatpush.msra.mxu3 %v6333_v48  ;;  %v6618_v27 = vpop.f32.mrf.mxu0  ;;  %v7955_v48 = vld [vmem:[#allocation15_spill] sm:$0xff] }
 0x1d4   :  { %7950 = vst [vmem:[#allocation35_spill] sm:$0xff] %v6618_v27  ;;  %2956 = vmatpush.msrb.mxu0 %v6551_v39  ;;  %3075 = vmatpush.msrb.mxu1 %v3074_v51  ;;  %v7956_v15 = vand.u32 4294901760, %v7955_v48  ;;  %v7962_v51 = vld [vmem:[#allocation18_spill] sm:$0xff] }
 0x1d5   :  { %2554 = vmatmul.f32.gmra.mxu2 %v7951_v4  ;;  %2911 = vmatmul.f32.vlgmr.msra.gmra.mxu3 %v5994_v54  ;;  %v6625_v29 = vpop.f32.mrf.mxu1  ;;  %v7963_v6 = vand.u32 4294901760, %v7962_v51 }
 0x1d6   :  { %2848 = vmatpush.msra.mxu2 %v7953_v11  ;;  %7954 = vst [vmem:[#allocation31_spill] sm:$0xff] %v6625_v29  ;;  %2958 = vmatpush.msrb.mxu0 %v6562_v49  ;;  %v7968_v11 = vand.u32 4294901760, %v7967_v63  ;;  %v2428_v29 = vld [vmem:[#allocation7 + $0x100] sm:$0xff] }
 0x1d7   :  { %3081 = vmatpush.msrb.mxu1 %v3080_v61  ;;  %3175 = vmatpush.msrb.mxu3 %v6370_v20  ;;  %v7965_v61 = vld [vmem:[#allocation22_spill] sm:$0xff] }
 0x1d8   :  { %2852 = vmatpush.msra.mxu2 %v7956_v15  ;;  %2964 = vmatmul.f32.vlgmr.msrb.gmra.mxu0 %v6043_v26  ;;  %v6632_v22 = vpop.f32.mrf.mxu3 }
 0x1d9   :  { %7957 = vst [vmem:[#allocation15_spill] sm:$0xff] %v6632_v22  ;;  %3087 = vmatpush.msrb.mxu1 %v3086_v28  ;;  %3177 = vmatpush.msrb.mxu3 %v6376_v42  ;;  %v7966_v28 = vand.u32 4294901760, %v7965_v61 }
 0x1da   :  { %3234 = vmatpush.msra.mxu0 %v7959_v31  ;;  %2856 = vmatpush.msra.mxu2 %v7961_v56  ;;  %v7972_v31 = vld [vmem:[#allocation12_spill] sm:$0xff] }
 0x1db   :  { %3089 = vmatmul.f32.vlgmr.msrb.gmra.mxu1 %v5994_v54  ;;  %3179 = vmatpush.msrb.mxu3 %v6388_v13  ;;  %v7973_v34 = vand.u32 4294901760, %v7972_v31 }
 0x1dc   :  { %3238 = vmatpush.msra.mxu0 %v7963_v6  ;;  %3313 = vmatpush.msra.mxu1 %v6370_v20  ;;  %v6644_v18 = vpop.f32.mrf.mxu0 }
 0x1dd   :  { %7964 = vst [vmem:[#allocation20_spill] sm:$0xff] %v6644_v18  ;;  %2860 = vmatpush.msra.mxu2 %v7966_v28  ;;  %3181 = vmatpush.msrb.mxu3 %v6399_v37  ;;  %v2458_v28 = vld [vmem:[#allocation7 + $0x1f0] sm:$0xff] }
 0x1de   :  { %3242 = vmatpush.msra.mxu0 %v7968_v11  ;;  %3315 = vmatpush.msra.mxu1 %v6376_v42  ;;  %v6652_v48 = vpop.f32.mrf.mxu1  ;;  %v7974_v42 = vld [vmem:[#allocation34_spill] sm:$0xff] }
 0x1df   :  { %7969 = vst [vmem:[#allocation14_spill] sm:$0xff] %v6652_v48  ;;  %2862 = vmatmul.f32.vlgmr.msra.gmra.mxu2 %v5994_v54  ;;  %2915 = vmatmul.f32.gmra.mxu3 %v6041_v35  ;;  %v7975_v56 = vand.u32 4294901760, %v7974_v42  ;;  %v7997_v48 = vand.u32 4294901760, %v6573_v52 }
 0x1e0   :  { %3107 = vmatpush.msrb.mxu2 %v7958_v30  ;;  %3183 = vmatpush.msrb.mxu3 %v6409_v40  ;;  %v6658_v20 = vpop.f32.mrf.mxu2  ;;  %v6660_v15 = vpop.f32.mrf.mxu3 }
 0x1e1   :  { %7970 = vst [vmem:[#allocation18_spill] sm:$0xff] %v6658_v20  ;;  %3246 = vmatpush.msra.mxu0 %v7973_v34  ;;  %3317 = vmatpush.msra.mxu1 %v6388_v13  ;;  %v7977_v13 = vand.u32 4294901760, %v6446_v12  ;;  %v7984_v34 = vand.u32 4294901760, %v6487_v50 }
 0x1e2   :  { %7971 = vst [vmem:[#allocation22_spill] sm:$0xff] %v6660_v15  ;;  %2972 = vmatmul.f32.gmra.mxu0 %v6076_v2  ;;  %3110 = vmatpush.msrb.mxu2 %v7962_v51  ;;  %v2432_v15 = vld [vmem:[#allocation7 + $0x120] sm:$0xff] }
 0x1e3   :  { %3185 = vmatpush.msrb.mxu3 %v6423_v3  ;;  %3250 = vmatpush.msra.mxu0 %v7975_v56  ;;  %v2452_v56 = vld [vmem:[#allocation7 + $0x1c0] sm:$0xff] }
 0x1e4   :  { %3319 = vmatpush.msra.mxu1 %v6399_v37  ;;  %3113 = vmatpush.msrb.mxu2 %v7967_v63  ;;  %v6672_v30 = vpop.f32.mrf.mxu0  ;;  %v7979_v37 = vand.u32 4294901760, %v6460_v47  ;;  %v7982_v63 = vand.u32 4294901760, %v6472_v25 }
 0x1e5   :  { %7976 = vst [vmem:[#allocation17_spill] sm:$0xff] %v6672_v30  ;;  %3093 = vmatmul.f32.gmra.mxu1 %v6041_v35  ;;  %3187 = vmatpush.msrb.mxu3 %v6438_v16  ;;  %v2442_v30 = vld [vmem:[#allocation7 + $0x170] sm:$0xff] }
 0x1e6   :  { %3254 = vmatpush.msra.mxu0 %v7977_v13  ;;  %3321 = vmatpush.msra.mxu1 %v6409_v40  ;;  %v6679_v51 = vpop.f32.mrf.mxu1  ;;  %v2456_v40 = vld [vmem:[#allocation7 + $0x1e0] sm:$0xff] }
 0x1e7   :  { %7978 = vst [vmem:[#allocation12_spill] sm:$0xff] %v6679_v51  ;;  %3116 = vmatpush.msrb.mxu2 %v7972_v31  ;;  %3189 = vmatpush.msrb.mxu3 %v6451_v19  ;;  %v2454_v31 = vld [vmem:[#allocation7 + $0x1d0] sm:$0xff] }
 0x1e8   :  { %3258 = vmatpush.msra.mxu0 %v7979_v37  ;;  %3323 = vmatpush.msra.mxu1 %v6423_v3  ;;  %v6686_v6 = vpop.f32.mrf.mxu2  ;;  %v6688_v61 = vpop.f32.mrf.mxu3  ;;  %v6697_v3 = vand.u32 4294901760, %v2458_v28  ;;  %v6717_v13 = vand.u32 4294901760, %v2454_v31  ;;  %v7986_v37 = vand.u32 4294901760, %v6502_v46 }
 0x1e9   :  { %7980 = vst [vmem:[#allocation34_spill] sm:$0xff] %v6686_v6  ;;  %2866 = vmatmul.f32.gmra.mxu2 %v6041_v35  ;;  %2919 = vmatmul.f32.gmra.mxu3 %v6074_v60 }
 0x1ea   :  { %7981 = vst [vmem:[#allocation36_spill] sm:$0xff] %v6688_v61  ;;  %3119 = vmatpush.msrb.mxu2 %v7974_v42  ;;  %3191 = vmatpush.msrb.mxu3 %v6465_v32  ;;  %v6706_v42 = vand.u32 4294901760, %v2456_v40 }
 0x1eb   :  { %3262 = vmatpush.msra.mxu0 %v7982_v63  ;;  %3325 = vmatpush.msra.mxu1 %v6438_v16 }
 0x1ec   :  { %2980 = vmatmul.f32.gmra.mxu0 %v6116_v9  ;;  %3122 = vmatpush.msrb.mxu2 %v6446_v12  ;;  %v6701_v11 = vpop.f32.mrf.mxu0  ;;  %v6715_v12 = vsub.f32 %v2458_v28, %v6697_v3  ;;  %v6729_v63 = vsub.f32 %v2456_v40, %v6706_v42  ;;  %v6731_v28 = vand.u32 4294901760, %v2452_v56 }
 0x1ed   :  { %7983 = vst [vmem:[#allocation37_spill] sm:$0xff] %v6701_v11  ;;  %3193 = vmatpush.msrb.mxu3 %v6480_v41  ;;  %3266 = vmatpush.msra.mxu0 %v7984_v34  ;;  %v2450_v34 = vld [vmem:[#allocation7 + $0x1b0] sm:$0xff] }
 0x1ee   :  { %3327 = vmatpush.msra.mxu1 %v6451_v19  ;;  %3125 = vmatpush.msrb.mxu2 %v6460_v47  ;;  %v6710_v16 = vpop.f32.mrf.mxu1  ;;  %v6753_v24 = vsub.f32 %v2452_v56, %v6731_v28 }
 0x1ef   :  { %7985 = vst [vmem:[#allocation38_spill] sm:$0xff] %v6710_v16  ;;  %3097 = vmatmul.f32.gmra.mxu1 %v6074_v60  ;;  %3195 = vmatpush.msrb.mxu3 %v6493_v17 }
 0x1f0   :  { %3270 = vmatpush.msra.mxu0 %v7986_v37  ;;  %3329 = vmatpush.msra.mxu1 %v6465_v32  ;;  %v6722_v19 = vpop.f32.mrf.mxu2  ;;  %v6724_v47 = vpop.f32.mrf.mxu3  ;;  %v7696_v32 = vand.u32 4294901760, %v6715_v12  ;;  %v6746_v37 = vand.u32 4294901760, %v2450_v34 }
 0x1f1   :  { %7987 = vst [vmem:[#allocation39_spill] sm:$0xff] %v6722_v19  ;;  %3128 = vmatpush.msrb.mxu2 %v6472_v25  ;;  %3197 = vmatpush.msrb.mxu3 %v6508_v10  ;;  %v6740_v25 = vsub.f32 %v2454_v31, %v6717_v13  ;;  %v2446_v31 = vld [vmem:[#allocation7 + $0x190] sm:$0xff] }
 0x1f2   :  { %7988 = vst [vmem:[#allocation40_spill] sm:$0xff] %v6724_v47  ;;  %3274 = vmatpush.msra.mxu0 %v7989_v43  ;;  %3331 = vmatpush.msra.mxu1 %v6480_v41  ;;  %v2448_v43 = vld [vmem:[#allocation7 + $0x1a0] sm:$0xff]  ;;  %v6775_v41 = vsub.f32 %v2450_v34, %v6746_v37  ;;  %v2457_v47 = vld [vmem:[#allocation7 + $0x1e8] sm:$0xff] }
 0x1f3   :  { %2870 = vmatmul.f32.gmra.mxu2 %v6074_v60  ;;  %2923 = vmatmul.f32.gmra.mxu3 %v6114_v36  ;;  %v6766_v56 = vand.u32 4294901760, %v2448_v43 }
 0x1f4   :  { %3131 = vmatpush.msrb.mxu2 %v6487_v50  ;;  %3199 = vmatpush.msrb.mxu3 %v6523_v58  ;;  %v6744_v40 = vpop.f32.mrf.mxu0 }
 0x1f5   :  { %7990 = vst [vmem:[#allocation41_spill] sm:$0xff] %v6744_v40  ;;  %3278 = vmatpush.msra.mxu0 %v3060_v8  ;;  %3333 = vmatpush.msra.mxu1 %v6493_v17  ;;  %v3513_v17 = vsub.f32 %v6715_v12, %v7696_v32  ;;  %v7994_v32 = vand.u32 4294901760, %v6729_v63  ;;  %v7996_v40 = vand.u32 4294901760, %v6740_v25 }
 0x1f6   :  { %2988 = vmatmul.f32.gmra.mxu0 %v7951_v4  ;;  %3134 = vmatpush.msrb.mxu2 %v6502_v46  ;;  %v6757_v50 = vpop.f32.mrf.mxu1 }
 0x1f7   :  { %7991 = vst [vmem:[#allocation42_spill] sm:$0xff] %v6757_v50  ;;  %3201 = vmatpush.msrb.mxu3 %v6536_v5  ;;  %3282 = vmatpush.msra.mxu0 %v3066_v59  ;;  %v2444_v59 = vld [vmem:[#allocation7 + $0x180] sm:$0xff]  ;;  %v3519_v8 = vsub.f32 %v6729_v63, %v7994_v32  ;;  %v6783_v50 = vand.u32 4294901760, %v2446_v31  ;;  %v3514_v34 = vand.u32 4294901760, %v3513_v17  ;;  %v3525_v51 = vsub.f32 %v6740_v25, %v7996_v40 }
 0x1f8   :  { %3335 = vmatpush.msra.mxu1 %v6508_v10  ;;  %3137 = vmatpush.msrb.mxu2 %v6515_v23  ;;  %v6770_v46 = vpop.f32.mrf.mxu2  ;;  %v6772_v38 = vpop.f32.mrf.mxu3  ;;  %v7995_v23 = vand.u32 4294901760, %v6558_v21  ;;  %v6794_v32 = vsub.f32 %v2448_v43, %v6766_v56  ;;  %v6796_v10 = vand.u32 4294901760, %v2444_v59  ;;  %v7999_v43 = vand.u32 4294901760, %v6753_v24 }
 0x1f9   :  { %7992 = vst [vmem:[#allocation43_spill] sm:$0xff] %v6770_v46  ;;  %3101 = vmatmul.f32.gmra.mxu1 %v6114_v36  ;;  %3203 = vmatpush.msrb.mxu3 %v6551_v39  ;;  %v3520_v40 = vand.u32 4294901760, %v3519_v8  ;;  %v3526_v8 = vand.u32 4294901760, %v3525_v51 }
 0x1fa   :  { %7993 = vst [vmem:[#allocation44_spill] sm:$0xff] %v6772_v38  ;;  %3286 = vmatpush.msra.mxu0 %v7995_v23  ;;  %3337 = vmatpush.msra.mxu1 %v6523_v58  ;;  %v3531_v17 = vsub.f32 %v6753_v24, %v7999_v43  ;;  %v6810_v23 = vsub.f32 %v2446_v31, %v6783_v50  ;;  %v7697_v61 = vand.u32 4294901760, %v6794_v32 }
 0x1fb   :  { %3140 = vmatpush.msrb.mxu2 %v6530_v57  ;;  %3205 = vmatpush.msrb.mxu3 %v6562_v49  ;;  %v6817_v57 = vand.u32 4294901760, %v2442_v30  ;;  %v6822_v43 = vsub.f32 %v2444_v59, %v6796_v10 }
 0x1fc   :  { %3290 = vmatpush.msra.mxu0 %v7997_v48  ;;  %3339 = vmatpush.msra.mxu1 %v6536_v5  ;;  %v6801_v58 = vpop.f32.mrf.mxu0  ;;  %v8000_v5 = vand.u32 4294901760, %v6582_v45  ;;  %v3532_v51 = vand.u32 4294901760, %v3531_v17 }
 0x1fd   :  { %7998 = vst [vmem:[#allocation45_spill] sm:$0xff] %v6801_v58  ;;  %2874 = vmatmul.f32.gmra.mxu2 %v6114_v36  ;;  %3209 = vmatmul.f32.vlgmr.msrb.gmra.mxu3 %v6022_v33  ;;  %v2440_v58 = vld [vmem:[#allocation7 + $0x160] sm:$0xff] }
 0x1fe   :  { %3143 = vmatpush.msrb.mxu2 %v6545_v44  ;;  %3294 = vmatpush.msra.mxu0 %v8000_v5  ;;  %v6815_v48 = vpop.f32.mrf.mxu1  ;;  %v8002_v44 = vand.u32 4294901760, %v6775_v41 }
 0x1ff   :  { %8001 = vst [vmem:[#allocation46_spill] sm:$0xff] %v6815_v48  ;;  %3341 = vmatpush.msra.mxu1 %v6551_v39  ;;  %3515 = vmatpush.msra.mxu3 %v3514_v34  ;;  %v2438_v39 = vld [vmem:[#allocation7 + $0x150] sm:$0xff]  ;;  %v6835_v34 = vand.u32 4294901760, %v2440_v58 }
 0x200   :  { %3146 = vmatpush.msrb.mxu2 %v6558_v21  ;;  %3296 = vmatmul.f32.vlgmr.msra.gmra.mxu0 %v5994_v54  ;;  %v3537_v31 = vsub.f32 %v6775_v41, %v8002_v44  ;;  %v6829_v5 = vpop.f32.mrf.mxu2  ;;  %v6831_v48 = vpop.f32.mrf.mxu3  ;;  %v6840_v21 = vsub.f32 %v2442_v30, %v6817_v57  ;;  %v2436_v44 = vld [vmem:[#allocation7 + $0x140] sm:$0xff]  ;;  %v6847_v17 = vand.u32 4294901760, %v2438_v39  ;;  %v8005_v30 = vand.u32 4294901760, %v6810_v23 }
 0x201   :  { %8003 = vst [vmem:[#allocation47_spill] sm:$0xff] %v6829_v5  ;;  %3343 = vmatpush.msra.mxu1 %v6562_v49  ;;  %3521 = vmatpush.msra.mxu3 %v3520_v40  ;;  %v3543_v49 = vsub.f32 %v6794_v32, %v7697_v61  ;;  %v6858_v61 = vsub.f32 %v2440_v58, %v6835_v34  ;;  %v6860_v40 = vand.u32 4294901760, %v2436_v44  ;;  %v6895_v5 = vand.u32 4294901760, %v2432_v15 }
 0x202   :  { %8004 = vst [vmem:[#allocation48_spill] sm:$0xff] %v6831_v48  ;;  %3625 = vmatpush.msrb.mxu0 %v6715_v12  ;;  %3149 = vmatpush.msrb.mxu2 %v6573_v52  ;;  %v3538_v52 = vand.u32 4294901760, %v3537_v31  ;;  %v2434_v48 = vld [vmem:[#allocation7 + $0x130] sm:$0xff] }
 0x203   :  { %3345 = vmatmul.f32.vlgmr.msra.gmra.mxu1 %v5994_v54  ;;  %3527 = vmatpush.msra.mxu3 %v3526_v8  ;;  %v3549_v8 = vsub.f32 %v6810_v23, %v8005_v30  ;;  %8006 = vst [vmem:[#allocation49_spill] sm:$0xff] %v6858_v61  ;;  %v6873_v30 = vsub.f32 %v2438_v39, %v6847_v17  ;;  %v6880_v19 = vand.u32 4294901760, %v2434_v48 }
 0x204   :  { %3628 = vmatpush.msrb.mxu0 %v6729_v63  ;;  %3693 = vmatpush.msrb.mxu1 %v6697_v3  ;;  %v6851_v59 = vpop.f32.mrf.mxu0  ;;  %v6886_v39 = vsub.f32 %v2436_v44, %v6860_v40  ;;  %8013 = vst [vmem:[#allocation54_spill] sm:$0xff] %v6895_v5 }
 0x205   :  { %3152 = vmatpush.msrb.mxu2 %v6582_v45  ;;  %3533 = vmatpush.msra.mxu3 %v3532_v51  ;;  %v3544_v45 = vand.u32 4294901760, %v3543_v49  ;;  %v8007_v51 = vand.u32 4294901760, %v6822_v43  ;;  %8008 = vst [vmem:[#allocation50_spill] sm:$0xff] %v6873_v30  ;;  %v3550_v49 = vand.u32 4294901760, %v3549_v8 }
 0x206   :  { %3631 = vmatpush.msrb.mxu0 %v6740_v25  ;;  %3695 = vmatpush.msrb.mxu1 %v6706_v42  ;;  %v6864_v31 = vpop.f32.mrf.mxu1  ;;  %8011 = vst [vmem:[#allocation53_spill] sm:$0xff] %v6886_v39 }
 0x207   :  { %3155 = vmatmul.f32.vlgmr.msrb.gmra.mxu2 %v6004_v7  ;;  %3215 = vmatmul.f32.gmra.mxu3 %v6058_v53  ;;  %v3555_v58 = vsub.f32 %v6822_v43, %v8007_v51  ;;  %v6902_v51 = vsub.f32 %v2434_v48, %v6880_v19  ;;  %v8016_v48 = vand.u32 4294901760, %v6873_v30 }
 0x208   :  { %3446 = vmatpush.msra.mxu2 %v6697_v3  ;;  %3539 = vmatpush.msra.mxu3 %v3538_v52  ;;  %v6876_v18 = vpop.f32.mrf.mxu2  ;;  %v6878_v38 = vpop.f32.mrf.mxu3  ;;  %v8012_v52 = vand.u32 4294901760, %v6840_v21 }
 0x209   :  { %8009 = vst [vmem:[#allocation51_spill] sm:$0xff] %v6876_v18  ;;  %3634 = vmatpush.msrb.mxu0 %v6753_v24  ;;  %3697 = vmatpush.msrb.mxu1 %v6717_v13  ;;  %v2430_v18 = vld [vmem:[#allocation7 + $0x110] sm:$0xff]  ;;  %v3556_v6 = vand.u32 4294901760, %v3555_v58 }
 0x20a   :  { %8010 = vst [vmem:[#allocation52_spill] sm:$0xff] %v6878_v38  ;;  %3300 = vmatmul.f32.gmra.mxu0 %v6041_v35  ;;  %3448 = vmatpush.msra.mxu2 %v6706_v42  ;;  %v3561_v38 = vsub.f32 %v6840_v21, %v8012_v52  ;;  %v6909_v8 = vand.u32 4294901760, %v2430_v18  ;;  %v6922_v52 = vand.u32 4294901760, %v2428_v29 }
 0x20b   :  { %3545 = vmatpush.msra.mxu3 %v3544_v45  ;;  %3637 = vmatpush.msrb.mxu0 %v6775_v41  ;;  %8014 = vst [vmem:[#allocation55_spill] sm:$0xff] %v6902_v51  ;;  %v8015_v45 = vand.u32 4294901760, %v6858_v61 }
 0x20c   :  { %3699 = vmatpush.msrb.mxu1 %v6731_v28  ;;  %3450 = vmatpush.msra.mxu2 %v6717_v13  ;;  %v6899_v44 = vpop.f32.mrf.mxu0  ;;  %v3562_v16 = vand.u32 4294901760, %v3561_v38  ;;  %v6937_v20 = vsub.f32 %v2430_v18, %v6909_v8  ;;  %v8023_v18 = vand.u32 4294901760, %v6902_v51 }
 0x20d   :  { %3349 = vmatmul.f32.gmra.mxu1 %v6041_v35  ;;  %3551 = vmatpush.msra.mxu3 %v3550_v49  ;;  %v3567_v58 = vsub.f32 %v6858_v61, %v8015_v45  ;;  %v3573_v49 = vsub.f32 %v6873_v30, %v8016_v48  ;;  %v6920_v45 = vsub.f32 %v2432_v15, %v6895_v5  ;;  %v8020_v15 = vand.u32 4294901760, %v6886_v39 }
 0x20e   :  { %3640 = vmatpush.msrb.mxu0 %v6794_v32  ;;  %3701 = vmatpush.msrb.mxu1 %v6746_v37  ;;  %v6913_v27 = vpop.f32.mrf.mxu1  ;;  %8021 = vst [vmem:[#allocation59_spill] sm:$0xff] %v6937_v20 }
 0x20f   :  { %3452 = vmatpush.msra.mxu2 %v6731_v28  ;;  %3557 = vmatpush.msra.mxu3 %v3556_v6  ;;  %8017 = vst [vmem:[#allocation56_spill] sm:$0xff] %v6920_v45  ;;  %v3568_v6 = vand.u32 4294901760, %v3567_v58  ;;  %v3579_v48 = vsub.f32 %v6886_v39, %v8020_v15  ;;  %v3574_v38 = vand.u32 4294901760, %v3573_v49  ;;  %v3585_v58 = vsub.f32 %v6902_v51, %v8023_v18 }
 0x210   :  { %3643 = vmatpush.msrb.mxu0 %v6810_v23  ;;  %3703 = vmatpush.msrb.mxu1 %v6766_v56  ;;  %v6927_v11 = vpop.f32.mrf.mxu2  ;;  %v6929_v22 = vpop.f32.mrf.mxu3  ;;  %v8026_v18 = vand.u32 4294901760, %v6920_v45 }
 0x211   :  { %8018 = vst [vmem:[#allocation57_spill] sm:$0xff] %v6927_v11  ;;  %3160 = vmatmul.f32.gmra.mxu2 %v6049_v1  ;;  %3221 = vmatmul.f32.gmra.mxu3 %v6099_v14  ;;  %v2459_v11 = vld [vmem:[#allocation7 + $0x1f8] sm:$0xff] }
 0x212   :  { %8019 = vst [vmem:[#allocation58_spill] sm:$0xff] %v6929_v22  ;;  %3454 = vmatpush.msra.mxu2 %v6746_v37  ;;  %3563 = vmatpush.msra.mxu3 %v3562_v16  ;;  %v6944_v22 = vsub.f32 %v2428_v29, %v6922_v52  ;;  %v3580_v16 = vand.u32 4294901760, %v3579_v48  ;;  %v3586_v48 = vand.u32 4294901760, %v3585_v58  ;;  %v2455_v58 = vld [vmem:[#allocation7 + $0x1d8] sm:$0xff] }
 0x213   :  { %3646 = vmatpush.msrb.mxu0 %v6822_v43  ;;  %3705 = vmatpush.msrb.mxu1 %v6783_v50 }
 0x214   :  { %8022 = vst [vmem:[#allocation60_spill] sm:$0xff] %v6944_v22  ;;  %3304 = vmatmul.f32.gmra.mxu0 %v6074_v60  ;;  %3456 = vmatpush.msra.mxu2 %v6766_v56  ;;  %v6951_v15 = vpop.f32.mrf.mxu0 }
 0x215   :  { %8024 = vst [vmem:[#allocation61_spill] sm:$0xff] %v6951_v15  ;;  %3569 = vmatpush.msra.mxu3 %v3568_v6  ;;  %3649 = vmatpush.msrb.mxu0 %v6840_v21  ;;  %v3591_v15 = vsub.f32 %v6920_v45, %v8026_v18  ;;  %v6978_v6 = vand.u32 4294901760, %v2457_v47 }
 0x216   :  { %3707 = vmatpush.msrb.mxu1 %v6796_v10  ;;  %3458 = vmatpush.msra.mxu2 %v6783_v50  ;;  %v6957_v29 = vpop.f32.mrf.mxu1 }
 0x217   :  { %8025 = vst [vmem:[#allocation62_spill] sm:$0xff] %v6957_v29  ;;  %3353 = vmatmul.f32.gmra.mxu1 %v6074_v60  ;;  %3575 = vmatpush.msra.mxu3 %v3574_v38  ;;  %v6970_v29 = vand.u32 4294901760, %v2459_v11  ;;  %v8030_v38 = vand.u32 4294901760, %v6937_v20 }
 0x218   :  { %3652 = vmatpush.msrb.mxu0 %v6858_v61  ;;  %3709 = vmatpush.msrb.mxu1 %v6817_v57  ;;  %v6966_v49 = vpop.f32.mrf.mxu2  ;;  %v6968_v46 = vpop.f32.mrf.mxu3  ;;  %8031 = vst [vmem:[#allocation66_spill] sm:$0xff] %v6978_v6  ;;  %v6993_v61 = vand.u32 4294901760, %v2455_v58 }
 0x219   :  { %8027 = vst [vmem:[#allocation63_spill] sm:$0xff] %v6966_v49  ;;  %3460 = vmatpush.msra.mxu2 %v6796_v10  ;;  %3581 = vmatpush.msra.mxu3 %v3580_v16  ;;  %v3597_v18 = vsub.f32 %v6937_v20, %v8030_v38  ;;  %v8032_v49 = vand.u32 4294901760, %v6944_v22  ;;  %v6987_v38 = vsub.f32 %v2459_v11, %v6970_v29 }
 0x21a   :  { %8028 = vst [vmem:[#allocation64_spill] sm:$0xff] %v6968_v46  ;;  %3655 = vmatpush.msrb.mxu0 %v6873_v30  ;;  %3711 = vmatpush.msrb.mxu1 %v6835_v34  ;;  %v3592_v46 = vand.u32 4294901760, %v3591_v15  ;;  %v2453_v15 = vld [vmem:[#allocation7 + $0x1c8] sm:$0xff] }
 0x21b   :  { %8029 = vst [vmem:[#allocation65_spill] sm:$0xff] %v6970_v29  ;;  %3165 = vmatmul.f32.gmra.mxu2 %v6084_v55  ;;  %3227 = vmatmul.f32.gmra.mxu3 %v6134_v0  ;;  %v3603_v16 = vsub.f32 %v6944_v22, %v8032_v49  ;;  %v3598_v30 = vand.u32 4294901760, %v3597_v18  ;;  %v6998_v49 = vsub.f32 %v2457_v47, %v6978_v6  ;;  %v7006_v18 = vand.u32 4294901760, %v6987_v38 }
 0x21c   :  { %3462 = vmatpush.msra.mxu2 %v6817_v57  ;;  %3587 = vmatpush.msra.mxu3 %v3586_v48  ;;  %8033 = vst [vmem:[#allocation67_spill] sm:$0xff] %v6987_v38  ;;  %v6989_v4 = vpop.f32.mrf.mxu0 }
 0x21d   :  { %8034 = vst [vmem:[#allocation68_spill] sm:$0xff] %v6989_v4  ;;  %3658 = vmatpush.msrb.mxu0 %v6886_v39  ;;  %3713 = vmatpush.msrb.mxu1 %v6847_v17  ;;  %v3604_v11 = vand.u32 4294901760, %v3603_v16  ;;  %v2451_v4 = vld [vmem:[#allocation7 + $0x1b8] sm:$0xff]  ;;  %v7008_v39 = vand.u32 4294901760, %v2453_v15  ;;  %v2449_v16 = vld [vmem:[#allocation7 + $0x1a8] sm:$0xff] }
 0x21e   :  { %8035 = vst [vmem:[#allocation69_spill] sm:$0xff] %v6993_v61  ;;  %3308 = vmatmul.f32.gmra.mxu0 %v6114_v36  ;;  %3464 = vmatpush.msra.mxu2 %v6835_v34  ;;  %v7000_v48 = vpop.f32.mrf.mxu1 }
 0x21f   :  { %8036 = vst [vmem:[#allocation70_spill] sm:$0xff] %v6998_v49  ;;  %3593 = vmatpush.msra.mxu3 %v3592_v46  ;;  %3661 = vmatpush.msrb.mxu0 %v6902_v51  ;;  %v7016_v46 = vsub.f32 %v2455_v58, %v6993_v61  ;;  %v7023_v51 = vand.u32 4294901760, %v2451_v4  ;;  %v7031_v58 = vsub.f32 %v2453_v15, %v7008_v39 }
 0x220   :  { %8037 = vst [vmem:[#allocation71_spill] sm:$0xff] %v7000_v48  ;;  %3715 = vmatpush.msrb.mxu1 %v6860_v40  ;;  %3466 = vmatpush.msra.mxu2 %v6847_v17  ;;  %v7010_v0 = vpop.f32.mrf.mxu2  ;;  %v7012_v47 = vpop.f32.mrf.mxu3  ;;  %v7021_v48 = vand.u32 4294901760, %v6998_v49 }
 0x221   :  { %8038 = vst [vmem:[#allocation72_spill] sm:$0xff] %v7006_v18  ;;  %3357 = vmatmul.f32.gmra.mxu1 %v6114_v36  ;;  %3599 = vmatpush.msra.mxu3 %v3598_v30  ;;  %v3947_v30 = vsub.f32 %v6987_v38, %v7006_v18  ;;  %v7047_v38 = vsub.f32 %v2451_v4, %v7023_v51 }
 0x222   :  { %8039 = vst [vmem:[#allocation73_spill] sm:$0xff] %v7010_v0  ;;  %3664 = vmatpush.msrb.mxu0 %v6920_v45  ;;  %3717 = vmatpush.msrb.mxu1 %v6880_v19  ;;  %v2447_v45 = vld [vmem:[#allocation7 + $0x198] sm:$0xff]  ;;  %v3953_v15 = vsub.f32 %v6998_v49, %v7021_v48 }
 0x223   :  { %8040 = vst [vmem:[#allocation74_spill] sm:$0xff] %v7012_v47  ;;  %3468 = vmatpush.msra.mxu2 %v6860_v40  ;;  %3605 = vmatpush.msra.mxu3 %v3604_v11  ;;  %v7033_v47 = vand.u32 4294901760, %v2449_v16  ;;  %v7040_v11 = vand.u32 4294901760, %v7016_v46  ;;  %v7053_v18 = vand.u32 4294901760, %v2447_v45 }
 0x224   :  { %8041 = vst [vmem:[#allocation75_spill] sm:$0xff] %v7016_v46  ;;  %3667 = vmatpush.msrb.mxu0 %v6937_v20  ;;  %3719 = vmatpush.msrb.mxu1 %v6895_v5  ;;  %v7035_v0 = vpop.f32.mrf.mxu0 }
 0x225   :  { %8042 = vst [vmem:[#allocation76_spill] sm:$0xff] %v7021_v48  ;;  %3170 = vmatmul.f32.gmra.mxu2 %v6124_v62  ;;  %3607 = vmatmul.f32.vlgmr.msra.gmra.mxu3 %v5994_v54  ;;  %v2445_v54 = vld [vmem:[#allocation7 + $0x188] sm:$0xff]  ;;  %v7058_v62 = vand.u32 4294901760, %v7031_v58  ;;  %v7061_v4 = vsub.f32 %v2449_v16, %v7033_v47 }
 0x226   :  { %8043 = vst [vmem:[#allocation77_spill] sm:$0xff] %v7031_v58  ;;  %3470 = vmatpush.msra.mxu2 %v6880_v19  ;;  %3670 = vmatpush.msrb.mxu0 %v6944_v22  ;;  %v7049_v20 = vpop.f32.mrf.mxu1  ;;  %v3948_v22 = vand.u32 4294901760, %v3947_v30  ;;  %v3954_v30 = vand.u32 4294901760, %v3953_v15  ;;  %v7074_v16 = vand.u32 4294901760, %v2445_v54 }
 0x227   :  { %8044 = vst [vmem:[#allocation78_spill] sm:$0xff] %v7040_v11  ;;  %3721 = vmatpush.msrb.mxu1 %v6909_v8  ;;  %3831 = vmatpush.msrb.mxu3 %v6697_v3  ;;  %v3959_v3 = vsub.f32 %v7016_v46, %v7040_v11  ;;  %v3965_v46 = vsub.f32 %v7031_v58, %v7058_v62  ;;  %v7085_v15 = vand.u32 4294901760, %v7061_v4  ;;  %v2439_v58 = vld [vmem:[#allocation7 + $0x158] sm:$0xff] }
 0x228   :  { %8045 = vst [vmem:[#allocation79_spill] sm:$0xff] %v7047_v38  ;;  %3472 = vmatpush.msra.mxu2 %v6895_v5  ;;  %3673 = vmatmul.f32.vlgmr.msrb.gmra.mxu0 %v6004_v7  ;;  %v7063_v49 = vpop.f32.mrf.mxu2  ;;  %v2288_v48 = vpop.f32.mrf.mxu3  ;;  %v2443_v5 = vld [vmem:[#allocation7 + $0x178] sm:$0xff]  ;;  %v7072_v7 = vand.u32 4294901760, %v7047_v38 }
 0x229   :  { %8046 = vst [vmem:[#allocation80_spill] sm:$0xff] %v7058_v62  ;;  %3723 = vmatpush.msrb.mxu1 %v6922_v52  ;;  %3833 = vmatpush.msrb.mxu3 %v6706_v42  ;;  %v7079_v42 = vsub.f32 %v2447_v45, %v7053_v18  ;;  %v7087_v11 = vand.u32 4294901760, %v2443_v5  ;;  %v7097_v45 = vsub.f32 %v2445_v54, %v7074_v16  ;;  %v3966_v54 = vand.u32 4294901760, %v3965_v46 }
 0x22a   :  { %8047 = vst [vmem:[#allocation81_spill] sm:$0xff] %v7063_v49  ;;  %3880 = vmatpush.msra.mxu0 %v6970_v29  ;;  %3474 = vmatpush.msra.mxu2 %v6909_v8  ;;  %v2441_v49 = vld [vmem:[#allocation7 + $0x168] sm:$0xff] }
 0x22b   :  { %8048 = vst [vmem:[#allocation82_spill] sm:$0xff] %v7072_v7  ;;  %3727 = vmatmul.f32.vlgmr.msrb.gmra.mxu1 %v6022_v33  ;;  %3835 = vmatpush.msrb.mxu3 %v6717_v13  ;;  %v3960_v13 = vand.u32 4294901760, %v3959_v3  ;;  %v7099_v33 = vand.u32 4294901760, %v2441_v49  ;;  %v8050_v3 = vand.u32 4294901760, %v6715_v12  ;;  %v8052_v12 = vand.u32 4294901760, %v6729_v63 }
 0x22c   :  { %3882 = vmatpush.msra.mxu0 %v6978_v6  ;;  %3949 = vmatpush.msra.mxu1 %v3948_v22  ;;  %v7089_v29 = vpop.f32.mrf.mxu0  ;;  %v3971_v22 = vsub.f32 %v7047_v38, %v7072_v7  ;;  %8049 = vst [vmem:[#allocation83_spill] sm:$0xff] %v7097_v45  ;;  %v2165_v6 = vadd.f32 %v6864_v31, %v6851_v59  ;;  %v7119_v7 = vand.u32 4294901760, %v2439_v58  ;;  %v7125_v46 = vand.u32 4294901760, %v7097_v45 }
 0x22d   :  { %3476 = vmatpush.msra.mxu2 %v6922_v52  ;;  %3837 = vmatpush.msrb.mxu3 %v6731_v28  ;;  %v7108_v28 = vand.u32 4294901760, %v7079_v42  ;;  %v7116_v38 = vsub.f32 %v2443_v5, %v7087_v11  ;;  %v7128_v5 = vsub.f32 %v2441_v49, %v7099_v33  ;;  %v8053_v63 = vand.u32 4294901760, %v6740_v25 }
 0x22e   :  { %3884 = vmatpush.msra.mxu0 %v6993_v61  ;;  %3955 = vmatpush.msra.mxu1 %v3954_v30  ;;  %v7101_v62 = vpop.f32.mrf.mxu1  ;;  %v3977_v30 = vsub.f32 %v7061_v4, %v7085_v15  ;;  %v3989_v25 = vsub.f32 %v7097_v45, %v7125_v46 }
 0x22f   :  { %3482 = vmatmul.f32.vlgmr.msra.gmra.mxu2 %v6043_v26  ;;  %3611 = vmatmul.f32.gmra.mxu3 %v6041_v35  ;;  %8051 = vst [vmem:[#allocation84_spill] sm:$0xff] %v7116_v38  ;;  %v2437_v35 = vld [vmem:[#allocation7 + $0x148] sm:$0xff] }
 0x230   :  { %3752 = vmatpush.msrb.mxu2 %v8050_v3  ;;  %3839 = vmatpush.msrb.mxu3 %v6746_v37  ;;  %v2232_v59 = vpop.f32.mrf.mxu2  ;;  %v2294_v31 = vpop.f32.mrf.mxu3  ;;  %v3972_v37 = vand.u32 4294901760, %v3971_v22  ;;  %v2435_v3 = vld [vmem:[#allocation7 + $0x138] sm:$0xff]  ;;  %v3978_v22 = vand.u32 4294901760, %v3977_v30 }
 0x231   :  { %3886 = vmatpush.msra.mxu0 %v7008_v39  ;;  %3961 = vmatpush.msra.mxu1 %v3960_v13  ;;  %v2233_v61 = vadd.f32 %v2232_v59, %v2165_v6  ;;  %v3983_v13 = vsub.f32 %v7079_v42, %v7108_v28  ;;  %v7137_v59 = vand.u32 4294901760, %v7116_v38  ;;  %v7155_v30 = vand.u32 4294901760, %v2435_v3 }
 0x232   :  { %3678 = vmatmul.f32.gmra.mxu0 %v6049_v1  ;;  %3756 = vmatpush.msrb.mxu2 %v8052_v12  ;;  %v7139_v12 = vand.u32 4294901760, %v2437_v35 }
 0x233   :  { %3841 = vmatpush.msrb.mxu3 %v6766_v56  ;;  %3888 = vmatpush.msra.mxu0 %v7023_v51  ;;  %v2289_v6 = vadd.f32 %v2288_v48, %v2233_v61  ;;  %v7146_v56 = vsub.f32 %v2439_v58, %v7119_v7  ;;  %v2433_v48 = vld [vmem:[#allocation7 + $0x128] sm:$0xff]  ;;  %v8054_v58 = vand.u32 4294901760, %v6753_v24 }
 0x234   :  { %3967 = vmatpush.msra.mxu1 %v3966_v54  ;;  %3760 = vmatpush.msrb.mxu2 %v8053_v63  ;;  %v7141_v49 = vpop.f32.mrf.mxu0  ;;  %v7153_v54 = vand.u32 4294901760, %v7128_v5  ;;  %v7170_v1 = vand.u32 4294901760, %v2433_v48 }
 0x235   :  { %3733 = vmatmul.f32.gmra.mxu1 %v6058_v53  ;;  %3843 = vmatpush.msrb.mxu3 %v6783_v50  ;;  %v2372_v61 = vadd.f32 %v7035_v0, %v2289_v6  ;;  %v2169_v50 = vadd.f32 %v6913_v27, %v6899_v44  ;;  %v3984_v0 = vand.u32 4294901760, %v3983_v13  ;;  %v7168_v6 = vsub.f32 %v2437_v35, %v7139_v12  ;;  %v2431_v53 = vld [vmem:[#allocation7 + $0x118] sm:$0xff] }
 0x236   :  { %3890 = vmatpush.msra.mxu0 %v7033_v47  ;;  %3973 = vmatpush.msra.mxu1 %v3972_v37  ;;  %v7157_v63 = vpop.f32.mrf.mxu1  ;;  %v3995_v37 = vsub.f32 %v7116_v38, %v7137_v59  ;;  %v8056_v13 = vand.u32 4294901760, %v6775_v41  ;;  %v3990_v35 = vand.u32 4294901760, %v3989_v25  ;;  %v8057_v41 = vand.u32 4294901760, %v6794_v32 }
 0x237   :  { %3764 = vmatpush.msrb.mxu2 %v8054_v58  ;;  %3845 = vmatpush.msrb.mxu3 %v6796_v10  ;;  %v7173_v24 = vadd.f32 %v7049_v20, %v2372_v61  ;;  %v7178_v10 = vand.u32 4294901760, %v7146_v56  ;;  %v7186_v20 = vsub.f32 %v2435_v3, %v7155_v30  ;;  %v2429_v61 = vld [vmem:[#allocation7 + $0x108] sm:$0xff]  ;;  %v7189_v58 = vand.u32 4294901760, %v2431_v53 }
 0x238   :  { %3892 = vmatpush.msra.mxu0 %v7053_v18  ;;  %3979 = vmatpush.msra.mxu1 %v3978_v22  ;;  %v2237_v45 = vpop.f32.mrf.mxu2  ;;  %v2656_v27 = vpop.f32.mrf.mxu3  ;;  %v4001_v22 = vsub.f32 %v7128_v5, %v7153_v54  ;;  %v7198_v25 = vsub.f32 %v2433_v48, %v7170_v1 }
 0x239   :  { %8055 = vst [vmem:[#allocation85_spill] sm:$0xff] %v7173_v24  ;;  %3490 = vmatmul.f32.gmra.mxu2 %v6076_v2  ;;  %3615 = vmatmul.f32.gmra.mxu3 %v6074_v60  ;;  %v2238_v44 = vadd.f32 %v2237_v45, %v2169_v50  ;;  %v7195_v45 = vand.u32 4294901760, %v7168_v6  ;;  %v7206_v50 = vand.u32 4294901760, %v2429_v61  ;;  %v7212_v48 = vand.u32 4294901760, %v7186_v20 }
 0x23a   :  { %3768 = vmatpush.msrb.mxu2 %v8056_v13  ;;  %3847 = vmatpush.msrb.mxu3 %v6817_v57  ;;  %v3996_v57 = vand.u32 4294901760, %v3995_v37  ;;  %v4002_v37 = vand.u32 4294901760, %v4001_v22  ;;  %v8060_v22 = vand.u32 4294901760, %v6822_v43 }
 0x23b   :  { %3894 = vmatpush.msra.mxu0 %v7074_v16  ;;  %3985 = vmatpush.msra.mxu1 %v3984_v0  ;;  %v2295_v38 = vadd.f32 %v2294_v31, %v2238_v44  ;;  %v4007_v31 = vsub.f32 %v7146_v56, %v7178_v10  ;;  %v8058_v0 = vand.u32 4294901760, %v6810_v23  ;;  %v4013_v23 = vsub.f32 %v7168_v6, %v7195_v45 }
 0x23c   :  { %3683 = vmatmul.f32.gmra.mxu0 %v6084_v55  ;;  %3772 = vmatpush.msrb.mxu2 %v8057_v41  ;;  %v7200_v3 = vpop.f32.mrf.mxu0  ;;  %v8093_v55 = vld [vmem:[#allocation75_spill] sm:$0xff] }
 0x23d   :  { %3849 = vmatpush.msrb.mxu3 %v6835_v34  ;;  %3896 = vmatpush.msra.mxu0 %v7087_v11  ;;  %v2376_v32 = vadd.f32 %v7089_v29, %v2295_v38  ;;  %v7219_v34 = vsub.f32 %v2431_v53, %v7189_v58  ;;  %v7225_v29 = vand.u32 4294901760, %v7198_v25  ;;  %v4008_v53 = vand.u32 4294901760, %v4007_v31 }
 0x23e   :  { %3991 = vmatpush.msra.mxu1 %v3990_v35  ;;  %3776 = vmatpush.msrb.mxu2 %v8058_v0  ;;  %v7214_v44 = vpop.f32.mrf.mxu1 }
 0x23f   :  { %3739 = vmatmul.f32.gmra.mxu1 %v6099_v14  ;;  %3851 = vmatpush.msrb.mxu3 %v6847_v17  ;;  %v7228_v35 = vadd.f32 %v7101_v62, %v2376_v32  ;;  %v7234_v17 = vsub.f32 %v2429_v61, %v7206_v50  ;;  %v7742_v62 = vrot.slane %v7173_v24, 7  ;;  %v7244_v43 = vand.u32 4294901760, %v7219_v34 }
 0x240   :  { %3898 = vmatpush.msra.mxu0 %v7099_v33  ;;  %3997 = vmatpush.msra.mxu1 %v3996_v57  ;;  %v2531_v38 = vpop.f32.mrf.mxu2  ;;  %v2660_v13 = vpop.f32.mrf.mxu3  ;;  %v4019_v57 = vsub.f32 %v7186_v20, %v7212_v48  ;;  %v4014_v61 = vand.u32 4294901760, %v4013_v23  ;;  %v4025_v31 = vsub.f32 %v7198_v25, %v7225_v29 }
 0x241   :  { %8059 = vst [vmem:[#allocation86_spill] sm:$0xff] %v7228_v35  ;;  %3780 = vmatpush.msrb.mxu2 %v8060_v22  ;;  %3853 = vmatpush.msrb.mxu3 %v6860_v40  ;;  %v2657_v41 = vadd.f32 %v2656_v27, %v2531_v38  ;;  %v7743_v0 = vrot.slane %v7228_v35, 7  ;;  %v8061_v27 = vand.u32 4294901760, %v6840_v21  ;;  %v7261_v21 = vand.u32 4294901760, %v7234_v17 }
 0x242   :  { %3900 = vmatpush.msra.mxu0 %v7119_v7  ;;  %4003 = vmatpush.msra.mxu1 %v4002_v37  ;;  %v4020_v38 = vand.u32 4294901760, %v4019_v57 }
 0x243   :  { %3498 = vmatmul.f32.gmra.mxu2 %v6116_v9  ;;  %3619 = vmatmul.f32.gmra.mxu3 %v6114_v36  ;;  %v2723_v40 = vadd.f32 %v7141_v49, %v2657_v41  ;;  %v7257_v37 = vsel %vm1047_vm0, %v7742_v62, %v7743_v0  ;;  %v8063_v49 = vld [vmem:[#allocation28_spill] sm:$0xff]  ;;  %v8067_v62 = vld [vmem:[#allocation50_spill] sm:$0xff] }
 0x244   :  { %3784 = vmatpush.msrb.mxu2 %v8061_v27  ;;  %3855 = vmatpush.msrb.mxu3 %v6880_v19  ;;  %v2732_v32 = vpop.f32.mrf.mxu0  ;;  %8062 = vst [vmem:[#allocation87_spill] sm:$0xff] %v7257_v37  ;;  %v8064_v19 = vld [vmem:[#allocation49_spill] sm:$0xff]  ;;  %v8066_v27 = vld [vmem:[#allocation54_spill] sm:$0xff]  ;;  %v8068_v0 = vand.u32 4294901760, %v8067_v62  ;;  %v4026_v37 = vand.u32 4294901760, %v4025_v31 }
 0x245   :  { %3902 = vmatpush.msra.mxu0 %v7139_v12  ;;  %4009 = vmatpush.msra.mxu1 %v4008_v53  ;;  %v8065_v23 = vand.u32 4294901760, %v8064_v19  ;;  %v7267_v41 = vadd.f32 %v7157_v63, %v2723_v40  ;;  %v4031_v53 = vsub.f32 %v7219_v34, %v7244_v43  ;;  %v4037_v63 = vsub.f32 %v7234_v17, %v7261_v21  ;;  %v8070_v40 = vld [vmem:[#allocation53_spill] sm:$0xff] }
 0x246   :  { %3688 = vmatmul.f32.gmra.mxu0 %v8063_v49  ;;  %v2788_v22 = vpop.f32.mrf.mxu1  ;;  %3857 = vmatpush.msrb.mxu3 %v8066_v27  ;;  %v8071_v27 = vand.u32 4294901760, %v8070_v40  ;;  %v8079_v40 = vld [vmem:[#allocation66_spill] sm:$0xff] }
 0x247   :  { %3788 = vmatpush.msrb.mxu2 %v8065_v23  ;;  %3904 = vmatpush.msra.mxu0 %v7155_v30  ;;  %v8069_v23 = vld [vmem:[#allocation27_spill] sm:$0xff]  ;;  %v4038_v31 = vand.u32 4294901760, %v4037_v63 }
 0x248   :  { %4015 = vmatpush.msra.mxu1 %v4014_v61  ;;  %v2539_v24 = vpop.f32.mrf.mxu2  ;;  %v2664_v19 = vpop.f32.mrf.mxu3  ;;  %3859 = vmatpush.msrb.mxu3 %v6909_v8  ;;  %v8072_v61 = vld [vmem:[#allocation30_spill] sm:$0xff]  ;;  %v8073_v8 = vld [vmem:[#allocation13_spill] sm:$0xff] }
 0x249   :  { %3792 = vmatpush.msrb.mxu2 %v8068_v0  ;;  %3745 = vmatmul.f32.gmra.mxu1 %v8069_v23  ;;  %v2661_v57 = vadd.f32 %v2660_v13, %v2539_v24  ;;  %v4032_v0 = vand.u32 4294901760, %v4031_v53  ;;  %v8074_v13 = vld [vmem:[#allocation55_spill] sm:$0xff]  ;;  %v8077_v53 = vld [vmem:[#allocation56_spill] sm:$0xff]  ;;  %v8092_v23 = vld [vmem:[#allocation82_spill] sm:$0xff] }
 0x24a   :  { %3906 = vmatpush.msra.mxu0 %v7170_v1  ;;  %4021 = vmatpush.msra.mxu1 %v4020_v38  ;;  %v8075_v35 = vand.u32 4294901760, %v8074_v13  ;;  %v8081_v13 = vld [vmem:[#allocation59_spill] sm:$0xff] }
 0x24b   :  { %3796 = vmatpush.msrb.mxu2 %v8071_v27  ;;  %3861 = vmatpush.msrb.mxu3 %v6922_v52  ;;  %v2728_v62 = vadd.f32 %v7200_v3, %v2661_v57  ;;  %v8076_v3 = vld [vmem:[#allocation65_spill] sm:$0xff]  ;;  %v8080_v27 = vld [vmem:[#allocation72_spill] sm:$0xff]  ;;  %v8082_v49 = vand.u32 4294901760, %v8081_v13 }
 0x24c   :  { %3908 = vmatpush.msra.mxu0 %v7189_v58  ;;  %4027 = vmatpush.msra.mxu1 %v4026_v37  ;;  %v2737_v24 = vpop.f32.mrf.mxu0  ;;  %v8078_v37 = vand.u32 4294901760, %v8077_v53  ;;  %v8090_v13 = vld [vmem:[#allocation80_spill] sm:$0xff] }
 0x24d   :  { %3506 = vmatmul.f32.gmra.mxu2 %v8072_v61  ;;  %3863 = vmatmul.f32.vlgmr.msrb.gmra.mxu3 %v8073_v8  ;;  %v7291_v52 = vadd.f32 %v7214_v44, %v2728_v62  ;;  %v8083_v44 = vld [vmem:[#allocation69_spill] sm:$0xff]  ;;  %v8084_v62 = vld [vmem:[#allocation76_spill] sm:$0xff] }
 0x24e   :  { %3800 = vmatpush.msrb.mxu2 %v8075_v35  ;;  %3910 = vmatpush.msra.mxu0 %v7206_v50  ;;  %v2794_v38 = vpop.f32.mrf.mxu1 }
 0x24f   :  { %4033 = vmatpush.msra.mxu1 %v4032_v0  ;;  %4127 = vmatpush.msra.mxu3 %v8076_v3 }
 0x250   :  { %3804 = vmatpush.msrb.mxu2 %v8078_v37  ;;  %3916 = vmatmul.f32.vlgmr.msra.gmra.mxu0 %v6043_v26  ;;  %v2547_v57 = vpop.f32.mrf.mxu2  ;;  %v2668_v63 = vpop.f32.mrf.mxu3  ;;  %v8085_v26 = vld [vmem:[#allocation60_spill] sm:$0xff]  ;;  %v8089_v37 = vld [vmem:[#allocation67_spill] sm:$0xff] }
 0x251   :  { %4039 = vmatpush.msra.mxu1 %v4038_v31  ;;  %4129 = vmatpush.msra.mxu3 %v8079_v40  ;;  %v2665_v35 = vadd.f32 %v2664_v19, %v2547_v57  ;;  %v8086_v53 = vand.u32 4294901760, %v8085_v26  ;;  %v8087_v19 = vld [vmem:[#allocation78_spill] sm:$0xff] }
 0x252   :  { %4186 = vmatpush.msrb.mxu0 %v8080_v27  ;;  %3808 = vmatpush.msrb.mxu2 %v8082_v49  ;;  %v8088_v49 = vld [vmem:[#allocation26_spill] sm:$0xff] }
 0x253   :  { %4041 = vmatmul.f32.vlgmr.msra.gmra.mxu1 %v8073_v8  ;;  %4131 = vmatpush.msra.mxu3 %v8083_v44  ;;  %v2733_v0 = vadd.f32 %v2732_v32, %v2665_v35 }
 0x254   :  { %4190 = vmatpush.msrb.mxu0 %v8084_v62  ;;  %4265 = vmatpush.msrb.mxu1 %v8076_v3 }
 0x255   :  { %3812 = vmatpush.msrb.mxu2 %v8086_v53  ;;  %4133 = vmatpush.msra.mxu3 %v7008_v39  ;;  %v7310_v31 = vadd.f32 %v2788_v22, %v2733_v0  ;;  %v2965_v32 = vpop.f32.mrf.mxu0  ;;  %v8091_v0 = vld [vmem:[#allocation70_spill] sm:$0xff] }
 0x256   :  { %4194 = vmatpush.msrb.mxu0 %v8087_v19  ;;  %4267 = vmatpush.msrb.mxu1 %v8079_v40 }
 0x257   :  { %3814 = vmatmul.f32.vlgmr.msrb.gmra.mxu2 %v8073_v8  ;;  %3867 = vmatmul.f32.gmra.mxu3 %v8088_v49 }
 0x258   :  { %4059 = vmatpush.msra.mxu2 %v8089_v37  ;;  %4135 = vmatpush.msra.mxu3 %v7023_v51  ;;  %v3090_v57 = vpop.f32.mrf.mxu1  ;;  %v2555_v35 = vpop.f32.mrf.mxu2 }
 0x259   :  { %4198 = vmatpush.msrb.mxu0 %v8090_v13  ;;  %4269 = vmatpush.msrb.mxu1 %v8083_v44  ;;  %v7318_v26 = vadd.f32 %v3090_v57, %v2965_v32  ;;  %v2669_v53 = vadd.f32 %v2668_v63, %v2555_v35  ;;  %v2912_v22 = vpop.f32.mrf.mxu3  ;;  %v8094_v63 = vld [vmem:[#allocation77_spill] sm:$0xff] }
 0x25a   :  { %3924 = vmatmul.f32.gmra.mxu0 %v6076_v2  ;;  %4062 = vmatpush.msra.mxu2 %v8091_v0 }
 0x25b   :  { %4137 = vmatpush.msra.mxu3 %v7033_v47  ;;  %4202 = vmatpush.msrb.mxu0 %v8092_v23  ;;  %v2738_v37 = vadd.f32 %v2737_v24, %v2669_v53  ;;  %v8095_v24 = vld [vmem:[#allocation79_spill] sm:$0xff] }
 0x25c   :  { %4271 = vmatpush.msrb.mxu1 %v7008_v39  ;;  %4065 = vmatpush.msra.mxu2 %v8093_v55 }
 0x25d   :  { %4045 = vmatmul.f32.gmra.mxu1 %v8088_v49  ;;  %4139 = vmatpush.msra.mxu3 %v7053_v18  ;;  %v7330_v2 = vadd.f32 %v2794_v38, %v2738_v37 }
 0x25e   :  { %4206 = vmatpush.msrb.mxu0 %v7085_v15  ;;  %4273 = vmatpush.msrb.mxu1 %v7023_v51 }
 0x25f   :  { %4068 = vmatpush.msra.mxu2 %v8094_v63  ;;  %4141 = vmatpush.msra.mxu3 %v7074_v16  ;;  %v2973_v55 = vpop.f32.mrf.mxu0 }
 0x260   :  { %4210 = vmatpush.msrb.mxu0 %v7108_v28  ;;  %4275 = vmatpush.msrb.mxu1 %v7033_v47 }
 0x261   :  { %3818 = vmatmul.f32.gmra.mxu2 %v8088_v49  ;;  %3871 = vmatmul.f32.gmra.mxu3 %v6074_v60 }
 0x262   :  { %4071 = vmatpush.msra.mxu2 %v8095_v24  ;;  %4143 = vmatpush.msra.mxu3 %v7087_v11  ;;  %v3094_v32 = vpop.f32.mrf.mxu1  ;;  %v2863_v38 = vpop.f32.mrf.mxu2 }
 0x263   :  { %4214 = vmatpush.msrb.mxu0 %v7125_v46  ;;  %4277 = vmatpush.msrb.mxu1 %v7053_v18  ;;  %v7342_v57 = vadd.f32 %v3094_v32, %v2973_v55  ;;  %v2864_v35 = vadd.f32 %v2863_v38, %v7267_v41  ;;  %v2916_v53 = vpop.f32.mrf.mxu3 }
 0x264   :  { %3932 = vmatmul.f32.gmra.mxu0 %v6116_v9  ;;  %4074 = vmatpush.msra.mxu2 %v7061_v4  ;;  %v8096_v9 = vld [vmem:[#allocation83_spill] sm:$0xff] }
 0x265   :  { %4145 = vmatpush.msra.mxu3 %v7099_v33  ;;  %4218 = vmatpush.msrb.mxu0 %v7137_v59  ;;  %v7349_v0 = vadd.f32 %v2912_v22, %v2864_v35 }
 0x266   :  { %4279 = vmatpush.msrb.mxu1 %v7074_v16  ;;  %4077 = vmatpush.msra.mxu2 %v7079_v42  ;;  %v8097_v42 = vld [vmem:[#allocation84_spill] sm:$0xff] }
 0x267   :  { %4049 = vmatmul.f32.gmra.mxu1 %v6074_v60  ;;  %4147 = vmatpush.msra.mxu3 %v7119_v7 }
 0x268   :  { %4222 = vmatpush.msrb.mxu0 %v7153_v54  ;;  %4281 = vmatpush.msrb.mxu1 %v7087_v11 }
 0x269   :  { %4080 = vmatpush.msra.mxu2 %v8096_v9  ;;  %4149 = vmatpush.msra.mxu3 %v7139_v12  ;;  %v2981_v4 = vpop.f32.mrf.mxu0 }
 0x26a   :  { %4226 = vmatpush.msrb.mxu0 %v7178_v10  ;;  %4283 = vmatpush.msrb.mxu1 %v7099_v33 }
 0x26b   :  { %3822 = vmatmul.f32.gmra.mxu2 %v6074_v60  ;;  %3875 = vmatmul.f32.gmra.mxu3 %v6114_v36 }
 0x26c   :  { %4083 = vmatpush.msra.mxu2 %v8097_v42  ;;  %4151 = vmatpush.msra.mxu3 %v7155_v30  ;;  %v3098_v41 = vpop.f32.mrf.mxu1  ;;  %v2867_v22 = vpop.f32.mrf.mxu2 }
 0x26d   :  { %4230 = vmatpush.msrb.mxu0 %v7195_v45  ;;  %4285 = vmatpush.msrb.mxu1 %v7119_v7  ;;  %v7367_v37 = vadd.f32 %v3098_v41, %v2981_v4  ;;  %v2868_v63 = vadd.f32 %v2867_v22, %v7291_v52  ;;  %v2920_v55 = vpop.f32.mrf.mxu3  ;;  %v3411_v52 = vrot.slane %v7349_v0, 1 }
 0x26e   :  { %3940 = vmatmul.f32.gmra.mxu0 %v8072_v61  ;;  %4086 = vmatpush.msra.mxu2 %v7128_v5 }
 0x26f   :  { %4153 = vmatpush.msra.mxu3 %v7170_v1  ;;  %4234 = vmatpush.msrb.mxu0 %v7212_v48  ;;  %v2917_v24 = vadd.f32 %v2916_v53, %v2868_v63 }
 0x270   :  { %4287 = vmatpush.msrb.mxu1 %v7139_v12  ;;  %4089 = vmatpush.msra.mxu2 %v7146_v56  ;;  %v8098_v56 = vld [vmem:[#allocation23_spill] sm:$0xff] }
 0x271   :  { %4053 = vmatmul.f32.gmra.mxu1 %v6114_v36  ;;  %4155 = vmatpush.msra.mxu3 %v7189_v58  ;;  %v3412_v32 = vrot.slane %v2917_v24, 1 }
 0x272   :  { %4238 = vmatpush.msrb.mxu0 %v7225_v29  ;;  %4289 = vmatpush.msrb.mxu1 %v7155_v30 }
 0x273   :  { %4092 = vmatpush.msra.mxu2 %v7168_v6  ;;  %4157 = vmatpush.msra.mxu3 %v7206_v50  ;;  %v7384_v5 = vsel %vm1071_vm3, %v3411_v52, %v3412_v32  ;;  %v2989_v61 = vpop.f32.mrf.mxu0 }
 0x274   :  { %4242 = vmatpush.msrb.mxu0 %v7244_v43  ;;  %4291 = vmatpush.msrb.mxu1 %v7170_v1 }
 0x275   :  { %3826 = vmatmul.f32.gmra.mxu2 %v6114_v36  ;;  %4161 = vmatmul.f32.vlgmr.msra.gmra.mxu3 %v8098_v56 }
 0x276   :  { %4095 = vmatpush.msra.mxu2 %v7186_v20  ;;  %4246 = vmatpush.msrb.mxu0 %v7261_v21  ;;  %v3102_v38 = vpop.f32.mrf.mxu1  ;;  %v2871_v6 = vpop.f32.mrf.mxu2 }
 0x277   :  { %4365 = vmatpush.msrb.mxu3 %v8076_v3  ;;  %4293 = vmatpush.msrb.mxu1 %v7189_v58  ;;  %v7394_v35 = vadd.f32 %v3102_v38, %v2989_v61  ;;  %v2872_v53 = vadd.f32 %v2871_v6, %v7310_v31  ;;  %v2924_v0 = vpop.f32.mrf.mxu3  ;;  %v8099_v31 = vld [vmem:[#allocation21_spill] sm:$0xff]  ;;  %v8105_v61 = vld [vmem:[#allocation43_spill] sm:$0xff]  ;;  %v8106_v38 = vld [vmem:[#allocation40_spill] sm:$0xff] }
 0x278   :  { %4098 = vmatpush.msra.mxu2 %v7198_v25  ;;  %4248 = vmatmul.f32.vlgmr.msrb.gmra.mxu0 %v8073_v8 }
 0x279   :  { %4366 = vmatpush.msrb.mxu3 %v8079_v40  ;;  %4295 = vmatpush.msrb.mxu1 %v7206_v50  ;;  %v2921_v20 = vadd.f32 %v2920_v55, %v2872_v53  ;;  %v8100_v40 = vld [vmem:[#allocation24_spill] sm:$0xff] }
 0x27a   :  { %4101 = vmatpush.msra.mxu2 %v7219_v34  ;;  %4297 = vmatmul.f32.vlgmr.msrb.gmra.mxu1 %v8073_v8 }
 0x27b   :  { %4367 = vmatpush.msrb.mxu3 %v8083_v44  ;;  %v3417_v3 = vrot.slane %v2921_v20, 1  ;;  %v8107_v20 = vld [vmem:[#allocation18_spill] sm:$0xff] }
 0x27c   :  { %4104 = vmatpush.msra.mxu2 %v7234_v17 }
 0x27d   :  { %4368 = vmatpush.msrb.mxu3 %v7008_v39  ;;  %4107 = vmatmul.f32.vlgmr.msra.gmra.mxu2 %v8099_v31  ;;  %v7408_v25 = vsel %vm1071_vm3, %v3412_v32, %v3417_v3 }
 0x27e   :  { %4167 = vmatmul.f32.gmra.mxu3 %v8100_v40  ;;  %4349 = vmatpush.msrb.mxu2 %v8080_v27  ;;  %v8109_v40 = vld [vmem:[#allocation37_spill] sm:$0xff] }
 0x27f   :  { %4369 = vmatpush.msrb.mxu3 %v7023_v51  ;;  %v8101_v51 = vld [vmem:[#allocation19_spill] sm:$0xff] }
 0x280   :  { %4350 = vmatpush.msrb.mxu2 %v8084_v62  ;;  %4252 = vmatmul.f32.gmra.mxu0 %v8088_v49  ;;  %v2875_v34 = vpop.f32.mrf.mxu2  ;;  %v3210_v17 = vpop.f32.mrf.mxu3  ;;  %v8102_v62 = vld [vmem:[#allocation29_spill] sm:$0xff] }
 0x281   :  { %4370 = vmatpush.msrb.mxu3 %v7033_v47  ;;  %v2876_v39 = vadd.f32 %v2875_v34, %v7330_v2 }
 0x282   :  { %4351 = vmatpush.msrb.mxu2 %v8087_v19  ;;  %4301 = vmatmul.f32.gmra.mxu1 %v8088_v49 }
 0x283   :  { %4371 = vmatpush.msrb.mxu3 %v7053_v18  ;;  %v2925_v8 = vadd.f32 %v2924_v0, %v2876_v39  ;;  %v3297_v18 = vpop.f32.mrf.mxu0  ;;  %v8110_v39 = vld [vmem:[#allocation35_spill] sm:$0xff] }
 0x284   :  { %4352 = vmatpush.msrb.mxu2 %v8090_v13 }
 0x285   :  { %4372 = vmatpush.msrb.mxu3 %v7074_v16  ;;  %4112 = vmatmul.f32.gmra.mxu2 %v8101_v51  ;;  %v3421_v27 = vrot.slane %v2925_v8, 1  ;;  %v8111_v8 = vld [vmem:[#allocation38_spill] sm:$0xff] }
 0x286   :  { %4173 = vmatmul.f32.gmra.mxu3 %v6099_v14  ;;  %4353 = vmatpush.msrb.mxu2 %v8092_v23 }
 0x287   :  { %4373 = vmatpush.msrb.mxu3 %v7087_v11  ;;  %v7427_v47 = vsel %vm1071_vm3, %v3417_v3, %v3421_v27  ;;  %v7430_v44 = vsel %vm1071_vm3, %v3421_v27, %v3411_v52  ;;  %v3346_v11 = vpop.f32.mrf.mxu1  ;;  %v8108_v3 = vld [vmem:[#allocation15_spill] sm:$0xff] }
 0x288   :  { %4354 = vmatpush.msrb.mxu2 %v7085_v15  ;;  %v8103_v15 = vld [vmem:[#allocation27_spill] sm:$0xff]  ;;  %v1723_v31 = vadd.f32 %v8108_v3, %v8107_v20 }
 0x289   :  { %4374 = vmatpush.msrb.mxu3 %v7099_v33 }
 0x28a   :  { %4355 = vmatpush.msrb.mxu2 %v7108_v28  ;;  %v3156_v16 = vpop.f32.mrf.mxu2  ;;  %v3216_v23 = vpop.f32.mrf.mxu3 }
 0x28b   :  { %4375 = vmatpush.msrb.mxu3 %v7119_v7  ;;  %v3157_v14 = vadd.f32 %v3156_v16, %v7318_v26  ;;  %v3301_v28 = vpop.f32.mrf.mxu0  ;;  %v8112_v16 = vld [vmem:[#allocation31_spill] sm:$0xff] }
 0x28c   :  { %4356 = vmatpush.msrb.mxu2 %v7125_v46 }
 0x28d   :  { %4376 = vmatpush.msrb.mxu3 %v7139_v12  ;;  %4117 = vmatmul.f32.gmra.mxu2 %v8102_v62  ;;  %v3211_v19 = vadd.f32 %v3210_v17, %v3157_v14  ;;  %v8104_v12 = vld [vmem:[#allocation28_spill] sm:$0xff]  ;;  %v1789_v17 = vadd.f32 %v8110_v39, %v1723_v31  ;;  %v8128_v31 = vld [vmem:[#allocation57_spill] sm:$0xff] }
 0x28e   :  { %4179 = vmatmul.f32.gmra.mxu3 %v8103_v15  ;;  %4357 = vmatpush.msrb.mxu2 %v7137_v59  ;;  %v8114_v15 = vld [vmem:[#allocation47_spill] sm:$0xff] }
 0x28f   :  { %4377 = vmatpush.msrb.mxu3 %v7155_v30  ;;  %v3298_v33 = vadd.f32 %v3297_v18, %v3211_v19  ;;  %v1843_v14 = vadd.f32 %v8112_v16, %v1789_v17 }
 0x290   :  { %4358 = vmatpush.msrb.mxu2 %v7153_v54 }
 0x291   :  { %4378 = vmatpush.msrb.mxu3 %v7170_v1  ;;  %v3347_v7 = vadd.f32 %v3346_v11, %v3298_v33  ;;  %v3350_v1 = vpop.f32.mrf.mxu1  ;;  %v1930_v33 = vadd.f32 %v8114_v15, %v1843_v14 }
 0x292   :  { %4359 = vmatpush.msrb.mxu2 %v7178_v10 }
 0x293   :  { %4379 = vmatpush.msrb.mxu3 %v7189_v58 }
 0x294   :  { %4360 = vmatpush.msrb.mxu2 %v7195_v45  ;;  %v3161_v46 = vpop.f32.mrf.mxu2  ;;  %v3222_v30 = vpop.f32.mrf.mxu3  ;;  %v3414_v45 = vrot.slane %v3347_v7, 1  ;;  %v8115_v7 = vld [vmem:[#allocation34_spill] sm:$0xff] }
 0x295   :  { %4380 = vmatpush.msrb.mxu3 %v7206_v50  ;;  %4122 = vmatmul.f32.gmra.mxu2 %v8104_v12  ;;  %v3162_v59 = vadd.f32 %v3161_v46, %v7342_v57  ;;  %v3305_v50 = vpop.f32.mrf.mxu0  ;;  %v8117_v12 = vld [vmem:[#allocation58_spill] sm:$0xff] }
 0x296   :  { %4361 = vmatpush.msrb.mxu2 %v7212_v48  ;;  %4305 = vmatmul.f32.vlgmr.msrb.gmra.mxu3 %v6074_v60 }
 0x297   :  { %v3217_v54 = vadd.f32 %v3216_v23, %v3162_v59  ;;  %v8113_v23 = vld [vmem:[#allocation63_spill] sm:$0xff] }
 0x298   :  { %4362 = vmatpush.msrb.mxu2 %v7225_v29 }
 0x299   :  { %v3302_v10 = vadd.f32 %v3301_v28, %v3217_v54  ;;  %v3354_v29 = vpop.f32.mrf.mxu1  ;;  %v8116_v28 = vld [vmem:[#allocation22_spill] sm:$0xff]  ;;  %v8119_v54 = vld [vmem:[#allocation20_spill] sm:$0xff] }
 0x29a   :  { %4363 = vmatpush.msrb.mxu2 %v7244_v43  ;;  %v1727_v46 = vadd.f32 %v8116_v28, %v8115_v7 }
 0x29b   :  { %v3351_v58 = vadd.f32 %v3350_v1, %v3302_v10 }
 0x29c   :  { %4364 = vmatpush.msrb.mxu2 %v7261_v21  ;;  %v1794_v10 = vadd.f32 %v8119_v54, %v1727_v46 }
 0x29d   :  { %4256 = vmatmul.f32.vlgmr.msrb.gmra.mxu2 %v6074_v60  ;;  %v3415_v49 = vrot.slane %v3351_v58, 1  ;;  %v3309_v9 = vpop.f32.mrf.mxu0 }
 0x29e   :  { %4309 = vmatmul.f32.gmra.mxu3 %v6114_v36  ;;  %v3166_v48 = vpop.f32.mrf.mxu2  ;;  %v3228_v26 = vpop.f32.mrf.mxu3 }
 0x29f   :  { %v3167_v13 = vadd.f32 %v3166_v48, %v7367_v37  ;;  %v7460_v2 = vsel %vm1071_vm3, %v3414_v45, %v3415_v49  ;;  %v8121_v48 = vld [vmem:[#allocation36_spill] sm:$0xff] }
 0x2a1   :  { %v3223_v57 = vadd.f32 %v3222_v30, %v3167_v13  ;;  %v3358_v37 = vpop.f32.mrf.mxu1  ;;  %v8118_v30 = vld [vmem:[#allocation44_spill] sm:$0xff] }
 0x2a2   :  { %v1979_v1 = vadd.f32 %v8118_v30, %v1930_v33 }
 0x2a3   :  { %v3306_v43 = vadd.f32 %v3305_v50, %v3223_v57  ;;  %v8122_v57 = vld [vmem:[#allocation14_spill] sm:$0xff] }
 0x2a5   :  { %4260 = vmatmul.f32.gmra.mxu2 %v6114_v36  ;;  %v3355_v21 = vadd.f32 %v3354_v29, %v3306_v43  ;;  %v3674_v52 = vpop.f32.mrf.mxu0  ;;  %v1735_v36 = vadd.f32 %v8106_v38, %v8105_v61  ;;  %v1849_v43 = vadd.f32 %v8122_v57, %v1794_v10  ;;  %v8127_v38 = vld [vmem:[#allocation12_spill] sm:$0xff]  ;;  %v8133_v57 = vld [vmem:[#allocation73_spill] sm:$0xff] }
 0x2a7   :  { %v3419_v60 = vrot.slane %v3355_v21, 1  ;;  %v1804_v34 = vadd.f32 %v8109_v40, %v1735_v36 }
 0x2a8   :  { %v3171_v4 = vpop.f32.mrf.mxu2  ;;  %v3608_v41 = vpop.f32.mrf.mxu3 }
 0x2a9   :  { %v3172_v42 = vadd.f32 %v3171_v4, %v7394_v35  ;;  %v7465_v22 = vsel %vm1071_vm3, %v3415_v49, %v3419_v60  ;;  %v3728_v0 = vpop.f32.mrf.mxu1  ;;  %v1861_v51 = vadd.f32 %v8111_v8, %v1804_v34  ;;  %v8120_v49 = vld [vmem:[#allocation39_spill] sm:$0xff] }
 0x2aa   :  { %v1731_v13 = vadd.f32 %v8121_v48, %v8120_v49  ;;  %v8132_v48 = vld [vmem:[#allocation42_spill] sm:$0xff] }
 0x2ab   :  { %v3229_v63 = vadd.f32 %v3228_v26, %v3172_v42  ;;  %v1942_v11 = vadd.f32 %v8113_v23, %v1861_v51  ;;  %v3373_v26 = vrot.slane %v1979_v1, 7  ;;  %v8124_v42 = vld [vmem:[#allocation17_spill] sm:$0xff]  ;;  %v8129_v51 = vld [vmem:[#allocation52_spill] sm:$0xff] }
 0x2ad   :  { %v3310_v55 = vadd.f32 %v3309_v9, %v3229_v63  ;;  %v1991_v59 = vadd.f32 %v8117_v12, %v1942_v11 }
 0x2af   :  { %v3359_v24 = vadd.f32 %v3358_v37, %v3310_v55  ;;  %v3679_v27 = vpop.f32.mrf.mxu0  ;;  %v3363_v58 = vrot.slane %v1991_v59, 7  ;;  %v1799_v37 = vadd.f32 %v8124_v42, %v1731_v13 }
 0x2b1   :  { %v3423_v32 = vrot.slane %v3359_v24, 1  ;;  %v3393_v9 = vsel %vm1047_vm0, %v3363_v58, %v3373_v26  ;;  %v1855_v36 = vadd.f32 %v8127_v38, %v1799_v37 }
 0x2b2   :  { %v3483_v56 = vpop.f32.mrf.mxu2  ;;  %v3612_v6 = vpop.f32.mrf.mxu3  ;;  %v3395_v55 = vsel %vm5751_vm1, 0.0, %v3393_v9 }
 0x2b3   :  { %v7470_v53 = vsel %vm1071_vm3, %v3419_v60, %v3423_v32  ;;  %v7473_v35 = vsel %vm1071_vm3, %v3423_v32, %v3414_v45  ;;  %v3734_v19 = vpop.f32.mrf.mxu1  ;;  %v8123_v60 = vld [vmem:[#allocation51_spill] sm:$0xff]  ;;  %v3484_v24 = vadd.f32 %v3483_v56, %v3395_v55  ;;  %v8126_v32 = vld [vmem:[#allocation48_spill] sm:$0xff]  ;;  %v1938_v40 = vadd.f32 %v8128_v31, %v1855_v36  ;;  %v8137_v36 = vld [vmem:[#allocation46_spill] sm:$0xff] }
 0x2b4   :  { %v1934_v4 = vadd.f32 %v8123_v60, %v1849_v43  ;;  %v8135_v55 = vld [vmem:[#allocation64_spill] sm:$0xff] }
 0x2b5   :  { %v3609_v34 = vadd.f32 %v3608_v41, %v3484_v24  ;;  %v1987_v16 = vadd.f32 %v8129_v51, %v1938_v40 }
 0x2b6   :  { %v1983_v61 = vadd.f32 %v8126_v32, %v1934_v4 }
 0x2b7   :  { %v3675_v14 = vadd.f32 %v3674_v52, %v3609_v34  ;;  %v3379_v15 = vrot.slane %v1987_v16, 7 }
 0x2b8   :  { %v3375_v17 = vrot.slane %v1983_v61, 7 }
 0x2b9   :  { %v3684_v45 = vpop.f32.mrf.mxu0  ;;  %v3729_v33 = vadd.f32 %v3728_v0, %v3675_v14  ;;  %v3383_v61 = vsel %vm1047_vm0, %v3379_v15, %v3363_v58  ;;  %v8141_v58 = vld [vmem:[#allocation74_spill] sm:$0xff] }
 0x2ba   :  { %v3376_v23 = vsel %vm1047_vm0, %v3373_v26, %v3375_v17  ;;  %v3380_v30 = vsel %vm1047_vm0, %v3375_v17, %v3379_v15  ;;  %v8139_v17 = vld [vmem:[#allocation81_spill] sm:$0xff] }
 0x2bb   :  { %v3399_v52 = vsel %vm5775_vm2, 0.0, %v3380_v30 }
 0x2bc   :  { %v3491_v18 = vpop.f32.mrf.mxu2  ;;  %v3616_v62 = vpop.f32.mrf.mxu3 }
 0x2bd   :  { %v3740_v21 = vpop.f32.mrf.mxu1  ;;  %v3492_v11 = vadd.f32 %v3491_v18, %v3376_v23  ;;  %v8131_v18 = vld [vmem:[#allocation41_spill] sm:$0xff] }
 0x2be   :  { %v2157_v13 = vadd.f32 %v8132_v48, %v8131_v18 }
 0x2bf   :  { %v3613_v28 = vadd.f32 %v3612_v6, %v3492_v11 }
 0x2c0   :  { %v2223_v43 = vadd.f32 %v8133_v57, %v2157_v13  ;;  %v8145_v13 = vld [vmem:[#allocation71_spill] sm:$0xff] }
 0x2c1   :  { %v3680_v54 = vadd.f32 %v3679_v27, %v3613_v28  ;;  %v3439_v27 = vsel %vm6007_vm4, 0.0, %v7408_v25 }
 0x2c3   :  { %v3689_v20 = vpop.f32.mrf.mxu0  ;;  %v3735_v26 = vadd.f32 %v3734_v19, %v3680_v54  ;;  %v8136_v19 = vld [vmem:[#allocation45_spill] sm:$0xff] }
 0x2c4   :  { %v2161_v31 = vadd.f32 %v8137_v36, %v8136_v19 }
 0x2c6   :  { %v3499_v50 = vpop.f32.mrf.mxu2  ;;  %v3620_v29 = vpop.f32.mrf.mxu3  ;;  %v2228_v51 = vadd.f32 %v8139_v17, %v2161_v31 }
 0x2c7   :  { %v3746_v8 = vpop.f32.mrf.mxu1  ;;  %v3500_v49 = vadd.f32 %v3499_v50, %v3399_v52  ;;  %v2277_v50 = vadd.f32 %v8135_v55, %v2223_v43  ;;  %v3443_v43 = vsel %vm6088_vm5, 0.0, %v7430_v44 }
 0x2c9   :  { %v3617_v9 = vadd.f32 %v3616_v62, %v3500_v49  ;;  %v8138_v62 = vld [vmem:[#allocation61_spill] sm:$0xff] }
 0x2ca   :  { %v2364_v40 = vadd.f32 %v8138_v62, %v2277_v50 }
 0x2cb   :  { %v3685_v32 = vadd.f32 %v3684_v45, %v3617_v9 }
 0x2cd   :  { %v3917_v56 = vpop.f32.mrf.mxu0 }
 0x2d0   :  { %v3507_v3 = vpop.f32.mrf.mxu2  ;;  %v3864_v39 = vpop.f32.mrf.mxu3 }
 0x2d1   :  { %v4042_v59 = vpop.f32.mrf.mxu1  ;;  %v3508_v38 = vadd.f32 %v3507_v3, %v3383_v61  ;;  %v2283_v3 = vadd.f32 %v8141_v58, %v2228_v51 }
 0x2d3   :  { %v3621_v14 = vadd.f32 %v3620_v29, %v3508_v38 }
 0x2d5   :  { %v3690_v28 = vadd.f32 %v3689_v20, %v3621_v14 }
 0x2d7   :  { %v3925_v0 = vpop.f32.mrf.mxu0  ;;  %v3747_v54 = vadd.f32 %v3746_v8, %v3690_v28 }
 0x2da   :  { %v3815_v7 = vpop.f32.mrf.mxu2  ;;  %v3868_v12 = vpop.f32.mrf.mxu3 }
 0x2db   :  { %v3816_v46 = vadd.f32 %v3815_v7, %v3729_v33  ;;  %v4046_v42 = vpop.f32.mrf.mxu1  ;;  %v8140_v33 = vld [vmem:[#allocation62_spill] sm:$0xff] }
 0x2dc   :  { %v2413_v45 = vadd.f32 %v8140_v33, %v2364_v40 }
 0x2dd   :  { %v3865_v41 = vadd.f32 %v3864_v39, %v3816_v46  ;;  %v3741_v39 = vadd.f32 %v3740_v21, %v3685_v32  ;;  %v8143_v21 = vld [vmem:[#allocation86_spill] sm:$0xff] }
 0x2de   :  { %v3374_v46 = vrot.slane %v2413_v45, 7 }
 0x2df   :  { %v4313_v1 = vadd.f32 %v3865_v41, %v7384_v5  ;;  %v8144_v41 = vrot.slane %v8143_v21, 7 }
 0x2e1   :  { %4321 = vst [vmem:[#allocation8] sm:$0xff] %v4313_v1  ;;  %v3933_v34 = vpop.f32.mrf.mxu0  ;;  %v3394_v1 = vsel %vm1047_vm0, %v8144_v41, %v3374_v46 }
 0x2e2   :  { %v3396_v48 = vsel %vm5751_vm1, 0.0, %v3394_v1 }
 0x2e3   :  { %v3918_v20 = vadd.f32 %v3917_v56, %v3396_v48 }
 0x2e4   :  { %v3819_v6 = vpop.f32.mrf.mxu2  ;;  %v3872_v4 = vpop.f32.mrf.mxu3 }
 0x2e5   :  { %v3820_v60 = vadd.f32 %v3819_v6, %v3735_v26  ;;  %v4050_v11 = vpop.f32.mrf.mxu1 }
 0x2e7   :  { %v3869_v37 = vadd.f32 %v3868_v12, %v3820_v60  ;;  %v8142_v12 = vld [vmem:[#allocation68_spill] sm:$0xff] }
 0x2e8   :  { %v2368_v30 = vadd.f32 %v8142_v12, %v2283_v3  ;;  %v8149_v3 = vld [vmem:[#allocation87_spill] sm:$0xff] }
 0x2e9   :  { %v4315_v24 = vadd.f32 %v3869_v37, %v3439_v27 }
 0x2ea   :  { %v2417_v26 = vadd.f32 %v8145_v13, %v2368_v30 }
 0x2eb   :  { %4323 = vst [vmem:[#allocation8 + $0x10] sm:$0xff] %v4315_v24  ;;  %v3941_v29 = vpop.f32.mrf.mxu0 }
 0x2ec   :  { %v3377_v60 = vrot.slane %v2417_v26, 7 }
 0x2ee   :  { %v3823_v16 = vpop.f32.mrf.mxu2  ;;  %v3876_v23 = vpop.f32.mrf.mxu3  ;;  %v3378_v27 = vsel %vm1047_vm0, %v3374_v46, %v3377_v60 }
 0x2ef   :  { %v3824_v25 = vadd.f32 %v3823_v16, %v3741_v39  ;;  %v3926_v50 = vadd.f32 %v3925_v0, %v3378_v27  ;;  %v3440_v0 = vsel %vm6007_vm4, 0.0, %v7465_v22  ;;  %v8147_v16 = vld [vmem:[#allocation85_spill] sm:$0xff] }
 0x2f0   :  { %v8148_v14 = vrot.slane %v8147_v16, 7 }
 0x2f1   :  { %v3873_v7 = vadd.f32 %v3872_v4, %v3824_v25  ;;  %v4043_v4 = vadd.f32 %v4042_v59, %v3918_v20  ;;  %v4047_v56 = vadd.f32 %v4046_v42, %v3926_v50 }
 0x2f2   :  { %v3382_v42 = vsel %vm1047_vm0, %v3377_v60, %v8148_v14 }
 0x2f3   :  { %v4317_v15 = vadd.f32 %v3873_v7, %v7427_v47  ;;  %v4054_v47 = vpop.f32.mrf.mxu1 }
 0x2f5   :  { %4325 = vst [vmem:[#allocation8 + $0x20] sm:$0xff] %v4317_v15  ;;  %v4249_v55 = vpop.f32.mrf.mxu0  ;;  %v3942_v15 = vadd.f32 %v3941_v29, %v8149_v3  ;;  %v3444_v29 = vsel %vm6088_vm5, 0.0, %v7473_v35 }
 0x2f7   :  { %v4055_v46 = vadd.f32 %v4054_v47, %v3942_v15 }
 0x2f8   :  { %v3827_v52 = vpop.f32.mrf.mxu2  ;;  %v4162_v49 = vpop.f32.mrf.mxu3 }
 0x2f9   :  { %v3828_v18 = vadd.f32 %v3827_v52, %v3747_v54 }
 0x2fb   :  { %v3877_v6 = vadd.f32 %v3876_v23, %v3828_v18  ;;  %v4298_v32 = vpop.f32.mrf.mxu1 }
 0x2fd   :  { %v4319_v9 = vadd.f32 %v3877_v6, %v3443_v43  ;;  %v4253_v59 = vpop.f32.mrf.mxu0 }
 0x2ff   :  { %4327 = vst [vmem:[#allocation8 + $0x30] sm:$0xff] %v4319_v9 }
 0x300   :  { %v4108_v8 = vpop.f32.mrf.mxu2 }
 0x301   :  { %v4109_v37 = vadd.f32 %v4108_v8, %v4043_v4  ;;  %v4168_v63 = vpop.f32.mrf.mxu3 }
 0x303   :  { %v4163_v24 = vadd.f32 %v4162_v49, %v4109_v37  ;;  %v4302_v39 = vpop.f32.mrf.mxu1 }
 0x305   :  { %v4250_v61 = vadd.f32 %v4249_v55, %v4163_v24 }
 0x307   :  { %v4299_v38 = vadd.f32 %v4298_v32, %v4250_v61 }
 0x308   :  { %v4113_v19 = vpop.f32.mrf.mxu2 }
 0x309   :  { %v4314_v36 = vadd.f32 %v4299_v38, %v7460_v2  ;;  %v4114_v44 = vadd.f32 %v4113_v19, %v4047_v56  ;;  %v4174_v62 = vpop.f32.mrf.mxu3  ;;  %v3400_v2 = vsel %vm5775_vm2, 0.0, %v3382_v42 }
 0x30a   :  { %v3934_v23 = vadd.f32 %v3933_v34, %v3400_v2 }
 0x30b   :  { %4322 = vst [vmem:[#allocation8 + $0x8] sm:$0xff] %v4314_v36  ;;  %v4169_v31 = vadd.f32 %v4168_v63, %v4114_v44 }
 0x30c   :  { %v4051_v7 = vadd.f32 %v4050_v11, %v3934_v23 }
 0x30d   :  { %v4254_v40 = vadd.f32 %v4253_v59, %v4169_v31 }
 0x30f   :  { %v4303_v17 = vadd.f32 %v4302_v39, %v4254_v40 }
 0x310   :  { %v4118_v51 = vpop.f32.mrf.mxu2 }
 0x311   :  { %v4316_v25 = vadd.f32 %v4303_v17, %v3440_v0  ;;  %v4180_v33 = vpop.f32.mrf.mxu3  ;;  %v4119_v58 = vadd.f32 %v4118_v51, %v4051_v7 }
 0x313   :  { %4324 = vst [vmem:[#allocation8 + $0x18] sm:$0xff] %v4316_v25  ;;  %v4175_v28 = vadd.f32 %v4174_v62, %v4119_v58 }
 0x318   :  { %v4123_v45 = vpop.f32.mrf.mxu2 }
 0x319   :  { %v4306_v5 = vpop.f32.mrf.mxu3  ;;  %v4124_v30 = vadd.f32 %v4123_v45, %v4055_v46 }
 0x31b   :  { %v4181_v1 = vadd.f32 %v4180_v33, %v4124_v30 }
 0x320   :  { %v4257_v22 = vpop.f32.mrf.mxu2 }
 0x321   :  { %v4258_v12 = vadd.f32 %v4257_v22, %v4175_v28  ;;  %v4310_v34 = vpop.f32.mrf.mxu3 }
 0x323   :  { %v4307_v21 = vadd.f32 %v4306_v5, %v4258_v12 }
 0x325   :  { %v4318_v41 = vadd.f32 %v4307_v21, %v7470_v53 }
 0x327   :  { %4326 = vst [vmem:[#allocation8 + $0x28] sm:$0xff] %v4318_v41 }
 0x328   :  { %v4261_v10 = vpop.f32.mrf.mxu2 }
 0x329   :  { %v4262_v54 = vadd.f32 %v4261_v10, %v4181_v1 }
 0x32b   :  { %v4311_v11 = vadd.f32 %v4310_v34, %v4262_v54 }
 0x32d   :  { %v4320_v52 = vadd.f32 %v4311_v11, %v3444_v29 }
 0x32f   :  { %4328 = vst [vmem:[#allocation8 + $0x38] sm:$0xff] %v4320_v52 }
 0x330   :  { %4341 = dma.vmem_to_hbm [thread:$0]  %s4334_s2, 1024, %s4336_s5, [#allocation4], %s4496_s28, %s4496_s28, %s4497_s29  }
 0x331   :  { %4489 = dma.done.wait [#allocation4], 1024  }
 0x332   :  { %4490 = vsyncadd [#allocation4], 4294966272 }
 0x333   :  { %4346 = vsyncpa [#allocation3], 1 }
 0x334   :  { %4347 = vsyncpa [#allocation6], 1 }
 0x335   :  { %4348 = vsyncpa [#allocation4], 1 }

</bundles_post_ra>
